<compile_context>
chip_gen: v7x
topology: tpu7x:2x2x1
jax: 0.10.0
libtpu: 0.0.40
codegen_flags: <defaults>
</compile_context>

<pallas_src>
import functools

import jax
import jax.numpy as jnp
from jax.experimental import pallas as pl
from jax.experimental.pallas import tpu as pltpu

LANE = 128
EPS = 1e-5


def _round_up(v, m):
    return (v + m - 1) // m * m


# ----------------------------------------------------------------------------
# In-kernel helpers
# ----------------------------------------------------------------------------
def _tap_window(in_ref, dh, dw, stride, Ho, Wo):
    """[Ho, Wo, C] window of 3x3 tap (dh, dw).

    in_ref is either [1, s*s, Ht, Wt, C] (parity/"tap" layout, stride >= 1) or
    [1, Ht, Wt, C] (already stride-1 padded activation).  Ht = Ho + 2.
    """
    a, b = dh // stride, dw // stride
    if len(in_ref.shape) == 5:
        p = (dh % stride) * stride + (dw % stride)
        return in_ref[0, p, a:a + Ho, b:b + Wo, :]
    return in_ref[0, a:a + Ho, b:b + Wo, :]


def _conv3x3(in_ref, w_ref, stride, Ho, Wo):
    """3x3 conv as 9 accumulating MXU matmuls.  Returns f32 [Ho*Wo, Cout]."""
    acc = None
    for dh in range(3):
        for dw in range(3):
            patch = _tap_window(in_ref, dh, dw, stride, Ho, Wo)
            patch2d = patch.reshape(Ho * Wo, patch.shape[-1])
            term = jnp.dot(patch2d, w_ref[dh * 3 + dw],
                           preferred_element_type=jnp.float32)
            acc = term if acc is None else acc + term
    return acc


def _bn_scale_shift(sum_row, sumsq_row, g_row, b_row, inv_count):
    """Fold train-mode BN into (scale, shift): y*scale + shift."""
    mean = sum_row * inv_count
    var = jnp.maximum(sumsq_row * inv_count - mean * mean, 0.0)
    scale = g_row * jax.lax.rsqrt(var + EPS)
    shift = b_row - mean * scale
    return scale, shift


# ----------------------------------------------------------------------------
# Kernel A: conv1 (3x3, stride s) + BN1 + ReLU      (two-phase over batch)
# ----------------------------------------------------------------------------
def _conv_bn_relu_kernel(x_ref, w_ref, g_ref, b_ref, o_ref, stat_ref, *,
                         stride, Ho, Wo, inv_count):
    phase = pl.program_id(0)

    @pl.when((phase == 0) & (pl.program_id(1) == 0))
    def _init_stats():
        stat_ref[...] = jnp.zeros_like(stat_ref)

    acc = _conv3x3(x_ref, w_ref, stride, Ho, Wo)          # [Ho*Wo, Cop] f32

    @pl.when(phase == 0)
    def _accumulate():
        stat_ref[0:1, :] += jnp.sum(acc, axis=0, keepdims=True)
        stat_ref[1:2, :] += jnp.sum(acc * acc, axis=0, keepdims=True)
        o_ref[...] = jnp.zeros_like(o_ref)                # deterministic filler

    @pl.when(phase == 1)
    def _apply():
        scale, shift = _bn_scale_shift(stat_ref[0:1, :], stat_ref[1:2, :],
                                       g_ref[...], b_ref[...], inv_count)
        y = jnp.maximum(acc * scale + shift, 0.0)         # single FMA + ReLU
        o_ref[...] = y.reshape(1, Ho, Wo, y.shape[-1]).astype(o_ref.dtype)


# ----------------------------------------------------------------------------
# Kernel B: conv2 (3x3, stride 1) + BN2 + shortcut(+BN) + add + ReLU (fused)
# ----------------------------------------------------------------------------
def _conv_bn_residual_kernel(*refs, stride, Ho, Wo, inv_count, conv_shortcut):
    if conv_shortcut:
        (h_ref, w2_ref, g2_ref, b2_ref, x_ref, ws_ref, gs_ref, bs_ref,
         o_ref, stat_ref) = refs
    else:
        h_ref, w2_ref, g2_ref, b2_ref, x_ref, o_ref, stat_ref = refs

    phase = pl.program_id(0)

    @pl.when((phase == 0) & (pl.program_id(1) == 0))
    def _init_stats():
        stat_ref[...] = jnp.zeros_like(stat_ref)

    # main branch: 3x3 / stride-1 conv over zero-padded h1 block
    acc2 = _conv3x3(h_ref, w2_ref, 1, Ho, Wo)             # [Ho*Wo, Cop] f32

    # shortcut operand = centre tap (1,1) of the stride-s tap layout of x,
    # i.e. x[:, ::s, ::s, :]  (1x1-conv input or identity value)
    p = (1 % stride) * stride + (1 % stride)
    a = 1 // stride
    xc = x_ref[0, p, a:a + Ho, a:a + Wo, :]
    xc = xc.reshape(Ho * Wo, xc.shape[-1])

    if conv_shortcut:
        acc_s = jnp.dot(xc, ws_ref[...], preferred_element_type=jnp.float32)

    @pl.when(phase == 0)
    def _accumulate():
        stat_ref[0:1, :] += jnp.sum(acc2, axis=0, keepdims=True)
        stat_ref[1:2, :] += jnp.sum(acc2 * acc2, axis=0, keepdims=True)
        if conv_shortcut:
            stat_ref[2:3, :] += jnp.sum(acc_s, axis=0, keepdims=True)
            stat_ref[3:4, :] += jnp.sum(acc_s * acc_s, axis=0, keepdims=True)
        o_ref[...] = jnp.zeros_like(o_ref)

    @pl.when(phase == 1)
    def _apply():
        sc2, sh2 = _bn_scale_shift(stat_ref[0:1, :], stat_ref[1:2, :],
                                   g2_ref[...], b2_ref[...], inv_count)
        y = acc2 * sc2 + sh2
        if conv_shortcut:
            scs, shs = _bn_scale_shift(stat_ref[2:3, :], stat_ref[3:4, :],
                                       gs_ref[...], bs_ref[...], inv_count)
            res = acc_s * scs + shs
        else:
            res = xc.astype(jnp.float32)
        out = jnp.maximum(y + res, 0.0)
        o_ref[...] = out.reshape(1, Ho, Wo, out.shape[-1]).astype(o_ref.dtype)


# ----------------------------------------------------------------------------
# pallas_call wrappers
# ----------------------------------------------------------------------------
_COMPILER_PARAMS = pltpu.CompilerParams(
    # batch axis carries the BN-stat accumulator -> must be 'arbitrary'
    dimension_semantics=("arbitrary", "arbitrary"),
    # explicit budget: per-image blocks are sized to fit v7x's 64 MiB VMEM
    # (32 MiB scoped default) with double-buffering headroom
    vmem_limit_bytes=32 * 1024 * 1024,
)


def _conv1_call(x_taps, w1, g1, be1, *, stride, Ho, Wo, out_dtype):
    N, ss = x_taps.shape[0], x_taps.shape[1]
    Ht, Wt = Ho + 2, Wo + 2
    Cip, Cop = x_taps.shape[-1], w1.shape[-1]
    inv_count = 1.0 / float(N * Ho * Wo)
    kern = functools.partial(_conv_bn_relu_kernel, stride=stride, Ho=Ho, Wo=Wo,
                             inv_count=inv_count)
    return pl.pallas_call(
        kern,
        grid=(2, N),                                   # (phase, batch image)
        in_specs=[
            pl.BlockSpec((1, ss, Ht, Wt, Cip), lambda p, n: (n, 0, 0, 0, 0)),
            pl.BlockSpec((9, Cip, Cop), lambda p, n: (0, 0, 0)),
            pl.BlockSpec((1, Cop), lambda p, n: (0, 0)),
            pl.BlockSpec((1, Cop), lambda p, n: (0, 0)),
        ],
        out_specs=pl.BlockSpec((1, Ho, Wo, Cop), lambda p, n: (n, 0, 0, 0)),
        out_shape=jax.ShapeDtypeStruct((N, Ho, Wo, Cop), out_dtype),
        scratch_shapes=[pltpu.VMEM((2, Cop), jnp.float32)],   # sum / sumsq
        compiler_params=_COMPILER_PARAMS,
    )(x_taps, w1, g1, be1)


def _conv2_res_call(h_pad, w2, g2, be2, x_taps, ws, gs, bes, *, stride, Ho, Wo):
    N = h_pad.shape[0]
    Ht, Wt = Ho + 2, Wo + 2
    Cop = w2.shape[-1]
    ss, Cip = x_taps.shape[1], x_taps.shape[-1]
    conv_shortcut = ws is not None
    inv_count = 1.0 / float(N * Ho * Wo)
    kern = functools.partial(_conv_bn_residual_kernel, stride=stride, Ho=Ho,
                             Wo=Wo, inv_count=inv_count,
                             conv_shortcut=conv_shortcut)
    in_specs = [
        pl.BlockSpec((1, Ht, Wt, Cop), lambda p, n: (n, 0, 0, 0)),        # h1 pad
        pl.BlockSpec((9, Cop, Cop), lambda p, n: (0, 0, 0)),              # w2
        pl.BlockSpec((1, Cop), lambda p, n: (0, 0)),                      # gamma2
        pl.BlockSpec((1, Cop), lambda p, n: (0, 0)),                      # beta2
        pl.BlockSpec((1, ss, Ht, Wt, Cip), lambda p, n: (n, 0, 0, 0, 0)),  # x taps
    ]
    args = [h_pad, w2, g2, be2, x_taps]
    if conv_shortcut:
        in_specs += [
            pl.BlockSpec((Cip, Cop), lambda p, n: (0, 0)),                # ws
            pl.BlockSpec((1, Cop), lambda p, n: (0, 0)),                  # gamma_s
            pl.BlockSpec((1, Cop), lambda p, n: (0, 0)),                  # beta_s
        ]
        args += [ws, gs, bes]
    nstat = 4 if conv_shortcut else 2
    return pl.pallas_call(
        kern,
        grid=(2, N),
        in_specs=in_specs,
        out_specs=pl.BlockSpec((1, Ho, Wo, Cop), lambda p, n: (n, 0, 0, 0)),
        out_shape=jax.ShapeDtypeStruct((N, Ho, Wo, Cop), jnp.float32),
        scratch_shapes=[pltpu.VMEM((nstat, Cop), jnp.float32)],
        compiler_params=_COMPILER_PARAMS,
    )(*args)


# ----------------------------------------------------------------------------
# Wrapper-side layout glue (single ~1x pass, no 9x im2col)
# ----------------------------------------------------------------------------
def _tap_layout(x_nhwc, stride, Ho, Wo, Cp, dtype):
    """conv-pad(1) + channel-pad to Cp + space-to-parity.

    Returns [N, s*s, Ho+2, Wo+2, Cp]; tap (dh,dw) of a 3x3/stride-s conv is the
    contiguous window [parity, dh//s : dh//s+Ho, dw//s : dw//s+Wo, :].
    """
    N, H, W, C = x_nhwc.shape
    Ht, Wt = Ho + 2, Wo + 2
    pad_h = stride * Ht - H - 1          # 1 leading pad row + alignment tail
    pad_w = stride * Wt - W - 1
    xp = jnp.pad(x_nhwc.astype(dtype),
                 ((0, 0), (1, pad_h), (1, pad_w), (0, Cp - C)))
    xr = xp.reshape(N, Ht, stride, Wt, stride, Cp)
    return jnp.transpose(xr, (0, 2, 4, 1, 3, 5)).reshape(
        N, stride * stride, Ht, Wt, Cp)


def _stack_w3x3(w_oihw, Cip, Cop, dtype):
    Co, Ci, _, _ = w_oihw.shape
    w = jnp.transpose(w_oihw, (2, 3, 1, 0)).reshape(9, Ci, Co)   # [tap, Ci, Co]
    return jnp.pad(w, ((0, 0), (0, Cip - Ci), (0, Cop - Co))).astype(dtype)


def _pad_vec(v, Cp):
    return jnp.pad(v.astype(jnp.float32), (0, Cp - v.shape[0])).reshape(1, Cp)


# ----------------------------------------------------------------------------
# ResBlk forward
# ----------------------------------------------------------------------------
def resblk_forward_nhwc(x_nhwc, params, *, ch_in, ch_out, stride,
                        compute_dtype=jnp.bfloat16):
    """NHWC-native forward (keep NHWC end-to-end when stacking blocks)."""
    N, H, W, _ = x_nhwc.shape
    Ho = (H + 2 - 3) // stride + 1
    Wo = (W + 2 - 3) // stride + 1
    Cip, Cop = _round_up(ch_in, LANE), _round_up(ch_out, LANE)
    conv_shortcut = ch_out != ch_in
    if not conv_shortcut:
        assert stride == 1, \
            "identity shortcut requires stride == 1 (PyTorch module would " \
            "shape-error otherwise)"

    # shared tap layout of x: feeds conv1 AND the shortcut (its centre tap is
    # exactly x[:, ::stride, ::stride, :]) -- no separate XLA strided slice.
    x_taps = _tap_layout(x_nhwc, stride, Ho, Wo, Cip, compute_dtype)

    # conv1 + bn1 + relu (conv bias dropped: cancelled by BN)
    w1 = _stack_w3x3(params["w1"], Cip, Cop, compute_dtype)
    h1 = _conv1_call(x_taps, w1, _pad_vec(params["g1"], Cop),
                     _pad_vec(params["be1"], Cop),
                     stride=stride, Ho=Ho, Wo=Wo, out_dtype=compute_dtype)

    # zero halo for conv2's stride-1 taps (cheap; could be fused into kernel A)
    h1_pad = jnp.pad(h1, ((0, 0), (1, 1), (1, 1), (0, 0)))

    w2 = _stack_w3x3(params["w2"], Cop, Cop, compute_dtype)
    if conv_shortcut:
        ws = jnp.pad(params["ws"][:, :, 0, 0].T,
                     ((0, Cip - ch_in), (0, Cop - ch_out))).astype(compute_dtype)
        gs, bes = _pad_vec(params["gs"], Cop), _pad_vec(params["bes"], Cop)
    else:
        ws = gs = bes = None

    out_pad = _conv2_res_call(h1_pad, w2, _pad_vec(params["g2"], Cop),
                              _pad_vec(params["be2"], Cop),
                              x_taps, ws, gs, bes,
                              stride=stride, Ho=Ho, Wo=Wo)
    return out_pad[..., :ch_out]                         # [N, Ho, Wo, ch_out]


def resblk_forward(x_nchw, params, *, ch_in, ch_out, stride,
                   compute_dtype=jnp.bfloat16):
    """PyTorch-layout (NCHW) convenience wrapper."""
    x = jnp.transpose(x_nchw, (0, 2, 3, 1))
    out = resblk_forward_nhwc(x, params, ch_in=ch_in, ch_out=ch_out,
                              stride=stride, compute_dtype=compute_dtype)
    return jnp.transpose(out, (0, 3, 1, 2))


# ----------------------------------------------------------------------------
# Pure-JAX reference (PyTorch semantics; compute_dtype mirrors the MXU dtype)
# ----------------------------------------------------------------------------
def resblk_reference(x, params, *, ch_in, ch_out, stride,
                     compute_dtype=jnp.float32):
    cd = compute_dtype

    def conv(inp, w, b, s, pad):
        y = jax.lax.conv_general_dilated(
            inp.astype(cd), w.astype(cd), (s, s), ((pad, pad), (pad, pad)),
            dimension_numbers=("NCHW", "OIHW", "NCHW"),
            preferred_element_type=jnp.float32,
            precision=jax.lax.Precision.HIGHEST)
        return y + b[None, :, None, None].astype(jnp.float32)

    def bn(y, g, be):
        mean = jnp.mean(y, axis=(0, 2, 3), keepdims=True)
        var = jnp.mean((y - mean) ** 2, axis=(0, 2, 3), keepdims=True)
        return (y - mean) * jax.lax.rsqrt(var + EPS) * g[None, :, None, None] \
            + be[None, :, None, None]

    out = jax.nn.relu(bn(conv(x, params["w1"], params["b1"], stride, 1),
                         params["g1"], params["be1"]))
    out = bn(conv(out, params["w2"], params["b2"], 1, 1),
             params["g2"], params["be2"])
    if ch_out != ch_in:
        sc = bn(conv(x, params["ws"], params["bs"], stride, 0),
                params["gs"], params["bes"])
    else:
        sc = x.astype(cd).astype(jnp.float32)
    return jax.nn.relu(out + sc)


def make_params(key, ch_in, ch_out):
    ks = jax.random.split(key, 9)
    p = {
        "w1": jax.random.normal(ks[0], (ch_out, ch_in, 3, 3), jnp.float32) * 0.1,
        "b1": jax.random.normal(ks[1], (ch_out,), jnp.float32) * 0.1,
        "g1": 1.0 + 0.1 * jax.random.normal(ks[2], (ch_out,), jnp.float32),
        "be1": 0.1 * jax.random.normal(ks[3], (ch_out,), jnp.float32),
        "w2": jax.random.normal(ks[4], (ch_out, ch_out, 3, 3), jnp.float32) * 0.1,
        "b2": jax.random.normal(ks[5], (ch_out,), jnp.float32) * 0.1,
        "g2": 1.0 + 0.1 * jax.random.normal(ks[6], (ch_out,), jnp.float32),
        "be2": 0.1 * jax.random.normal(ks[7], (ch_out,), jnp.float32),
    }
    if ch_out != ch_in:
        ks2 = jax.random.split(ks[8], 4)
        p["ws"] = jax.random.normal(ks2[0], (ch_out, ch_in, 1, 1), jnp.float32) * 0.1
        p["bs"] = jax.random.normal(ks2[1], (ch_out,), jnp.float32) * 0.1
        p["gs"] = 1.0 + 0.1 * jax.random.normal(ks2[2], (ch_out,), jnp.float32)
        p["bes"] = 0.1 * jax.random.normal(ks2[3], (ch_out,), jnp.float32)
    return p


if __name__ == "__main__":
    key = jax.random.PRNGKey(0)

    configs = [
        # projection shortcut, stride 2, bf16 MXU path (default / fast path)
        dict(ch_in=4, ch_out=8, stride=2, N=2, H=16, W=16,
             dtype=jnp.bfloat16, atol=3e-2, rtol=3e-2),
        # same block, f32 path: tight check of exact PyTorch semantics
        dict(ch_in=4, ch_out=8, stride=2, N=2, H=16, W=16,
             dtype=jnp.float32, atol=2e-3, rtol=2e-3),
        # identity shortcut (ch_in == ch_out, stride 1), f32
        dict(ch_in=8, ch_out=8, stride=1, N=2, H=16, W=16,
             dtype=jnp.float32, atol=2e-3, rtol=2e-3),
    ]

    for cfg in configs:
        kx, kp, key = jax.random.split(key, 3)
        x = jax.random.normal(
            kx, (cfg["N"], cfg["ch_in"], cfg["H"], cfg["W"]), jnp.float32)
        params = make_params(kp, cfg["ch_in"], cfg["ch_out"])

        fwd = jax.jit(functools.partial(
            resblk_forward, ch_in=cfg["ch_in"], ch_out=cfg["ch_out"],
            stride=cfg["stride"], compute_dtype=cfg["dtype"]))
        out = jax.block_until_ready(fwd(x, params))

        ref = jax.block_until_ready(resblk_reference(
            x, params, ch_in=cfg["ch_in"], ch_out=cfg["ch_out"],
            stride=cfg["stride"], compute_dtype=cfg["dtype"]))

        Ho = (cfg["H"] + 2 - 3) // cfg["stride"] + 1
        Wo = (cfg["W"] + 2 - 3) // cfg["stride"] + 1
        assert out.shape == (cfg["N"], cfg["ch_out"], Ho, Wo), out.shape
        max_err = float(jnp.max(jnp.abs(out - ref)))
        assert jnp.allclose(out, ref, rtol=cfg["rtol"], atol=cfg["atol"]), \
            (cfg["ch_in"], cfg["ch_out"], cfg["stride"], str(cfg["dtype"]), max_err)

    print("KERNEL_OK")
</pallas_src>

<mosaic_0001>
module attributes {stable_mosaic.version = 11 : i64} {
  func.func @_conv_bn_relu_kernel(%arg0: i32, %arg1: i32, %arg2: memref<1x4x10x10x128xbf16, #tpu.memory_space<vmem>>, %arg3: memref<9x128x128xbf16, #tpu.memory_space<vmem>>, %arg4: memref<1x128xf32, #tpu.memory_space<vmem>>, %arg5: memref<1x128xf32, #tpu.memory_space<vmem>>, %arg6: memref<1x8x8x128xbf16, #tpu.memory_space<vmem>>, %arg7: memref<2x128xf32, #tpu.memory_space<vmem>>) attributes {dimension_semantics = [#tpu.dimension_semantics<arbitrary>, #tpu.dimension_semantics<arbitrary>], iteration_bounds = array<i64: 2, 2>, scalar_prefetch = 0 : i64, scratch_operands = 1 : i64, tpu.core_type = #tpu.core_type<tc>, window_params = [{transform_indices = @transform_0, window_bounds = array<i64: 1, 4, 10, 10, 128>}, {pipeline_mode = #tpu.pipeline_mode<synchronous>, transform_indices = @transform_1, window_bounds = array<i64: 9, 128, 128>}, {pipeline_mode = #tpu.pipeline_mode<synchronous>, transform_indices = @transform_2, window_bounds = array<i64: 1, 128>}, {pipeline_mode = #tpu.pipeline_mode<synchronous>, transform_indices = @transform_3, window_bounds = array<i64: 1, 128>}, {transform_indices = @transform_4, window_bounds = array<i64: 1, 8, 8, 128>}]} {
    %c0_i32 = arith.constant 0 : i32
    %0 = arith.cmpi eq, %arg0, %c0_i32 : i32
    %c0_i32_0 = arith.constant 0 : i32
    %1 = arith.cmpi eq, %arg1, %c0_i32_0 : i32
    %2 = arith.andi %0, %1 : i1
    %3 = arith.extui %2 : i1 to i32
    %c0_i32_1 = arith.constant 0 : i32
    %4 = arith.cmpi ne, %3, %c0_i32_1 : i32
    scf.if %4 {
      %cst_76 = arith.constant 0.000000e+00 : f32
      %73 = vector.broadcast %cst_76 : f32 to vector<2x128xf32>
      %c0_77 = arith.constant 0 : index
      %c0_78 = arith.constant 0 : index
      %74 = vector.load %arg7[%c0_77, %c0_78] : memref<2x128xf32, #tpu.memory_space<vmem>>, vector<2x128xf32>
      tpu.vector_store %arg7[%c0_77, %c0_78], %73 {strides = array<i32>} : memref<2x128xf32, #tpu.memory_space<vmem>>, vector<2x128xf32>,
    } else {
    }
    %c0 = arith.constant 0 : index
    %c0_2 = arith.constant 0 : index
    %c0_3 = arith.constant 0 : index
    %c0_4 = arith.constant 0 : index
    %c0_5 = arith.constant 0 : index
    %5 = vector.load %arg2[%c0, %c0_2, %c0_3, %c0_4, %c0_5] : memref<1x4x10x10x128xbf16, #tpu.memory_space<vmem>>, vector<1x1x8x8x128xbf16>
    %6 = vector.shape_cast %5 : vector<1x1x8x8x128xbf16> to vector<8x8x128xbf16>
    %7 = vector.shape_cast %6 : vector<8x8x128xbf16> to vector<64x128xbf16>
    %c0_6 = arith.constant 0 : index
    %c0_7 = arith.constant 0 : index
    %c0_8 = arith.constant 0 : index
    %8 = vector.load %arg3[%c0_6, %c0_7, %c0_8] : memref<9x128x128xbf16, #tpu.memory_space<vmem>>, vector<1x128x128xbf16>
    %9 = vector.shape_cast %8 : vector<1x128x128xbf16> to vector<128x128xbf16>
    %cst = arith.constant dense<0.000000e+00> : vector<64x128xf32>
    %10 = tpu.matmul %7, %9, %cst {dimension_numbers = #tpu.dot_dimension_numbers<[1], [0], [0], [1], [0, 0, 1, 1], [], []>} : vector<64x128xbf16>, vector<128x128xbf16>, vector<64x128xf32> -> vector<64x128xf32>
    %c0_9 = arith.constant 0 : index
    %c1 = arith.constant 1 : index
    %c0_10 = arith.constant 0 : index
    %c0_11 = arith.constant 0 : index
    %c0_12 = arith.constant 0 : index
    %11 = vector.load %arg2[%c0_9, %c1, %c0_10, %c0_11, %c0_12] : memref<1x4x10x10x128xbf16, #tpu.memory_space<vmem>>, vector<1x1x8x8x128xbf16>
    %12 = vector.shape_cast %11 : vector<1x1x8x8x128xbf16> to vector<8x8x128xbf16>
    %13 = vector.shape_cast %12 : vector<8x8x128xbf16> to vector<64x128xbf16>
    %c1_13 = arith.constant 1 : index
    %c0_14 = arith.constant 0 : index
    %c0_15 = arith.constant 0 : index
    %14 = vector.load %arg3[%c1_13, %c0_14, %c0_15] : memref<9x128x128xbf16, #tpu.memory_space<vmem>>, vector<1x128x128xbf16>
    %15 = vector.shape_cast %14 : vector<1x128x128xbf16> to vector<128x128xbf16>
    %cst_16 = arith.constant dense<0.000000e+00> : vector<64x128xf32>
    %16 = tpu.matmul %13, %15, %cst_16 {dimension_numbers = #tpu.dot_dimension_numbers<[1], [0], [0], [1], [0, 0, 1, 1], [], []>} : vector<64x128xbf16>, vector<128x128xbf16>, vector<64x128xf32> -> vector<64x128xf32>
    %17 = arith.addf %10, %16 : vector<64x128xf32>
    %c0_17 = arith.constant 0 : index
    %c0_18 = arith.constant 0 : index
    %c0_19 = arith.constant 0 : index
    %c1_20 = arith.constant 1 : index
    %c0_21 = arith.constant 0 : index
    %18 = vector.load %arg2[%c0_17, %c0_18, %c0_19, %c1_20, %c0_21] : memref<1x4x10x10x128xbf16, #tpu.memory_space<vmem>>, vector<1x1x8x8x128xbf16>
    %19 = vector.shape_cast %18 : vector<1x1x8x8x128xbf16> to vector<8x8x128xbf16>
    %20 = vector.shape_cast %19 : vector<8x8x128xbf16> to vector<64x128xbf16>
    %c2 = arith.constant 2 : index
    %c0_22 = arith.constant 0 : index
    %c0_23 = arith.constant 0 : index
    %21 = vector.load %arg3[%c2, %c0_22, %c0_23] : memref<9x128x128xbf16, #tpu.memory_space<vmem>>, vector<1x128x128xbf16>
    %22 = vector.shape_cast %21 : vector<1x128x128xbf16> to vector<128x128xbf16>
    %cst_24 = arith.constant dense<0.000000e+00> : vector<64x128xf32>
    %23 = tpu.matmul %20, %22, %cst_24 {dimension_numbers = #tpu.dot_dimension_numbers<[1], [0], [0], [1], [0, 0, 1, 1], [], []>} : vector<64x128xbf16>, vector<128x128xbf16>, vector<64x128xf32> -> vector<64x128xf32>
    %24 = arith.addf %17, %23 : vector<64x128xf32>
    %c0_25 = arith.constant 0 : index
    %c2_26 = arith.constant 2 : index
    %c0_27 = arith.constant 0 : index
    %c0_28 = arith.constant 0 : index
    %c0_29 = arith.constant 0 : index
    %25 = vector.load %arg2[%c0_25, %c2_26, %c0_27, %c0_28, %c0_29] : memref<1x4x10x10x128xbf16, #tpu.memory_space<vmem>>, vector<1x1x8x8x128xbf16>
    %26 = vector.shape_cast %25 : vector<1x1x8x8x128xbf16> to vector<8x8x128xbf16>
    %27 = vector.shape_cast %26 : vector<8x8x128xbf16> to vector<64x128xbf16>
    %c3 = arith.constant 3 : index
    %c0_30 = arith.constant 0 : index
    %c0_31 = arith.constant 0 : index
    %28 = vector.load %arg3[%c3, %c0_30, %c0_31] : memref<9x128x128xbf16, #tpu.memory_space<vmem>>, vector<1x128x128xbf16>
    %29 = vector.shape_cast %28 : vector<1x128x128xbf16> to vector<128x128xbf16>
    %cst_32 = arith.constant dense<0.000000e+00> : vector<64x128xf32>
    %30 = tpu.matmul %27, %29, %cst_32 {dimension_numbers = #tpu.dot_dimension_numbers<[1], [0], [0], [1], [0, 0, 1, 1], [], []>} : vector<64x128xbf16>, vector<128x128xbf16>, vector<64x128xf32> -> vector<64x128xf32>
    %31 = arith.addf %24, %30 : vector<64x128xf32>
    %c0_33 = arith.constant 0 : index
    %c3_34 = arith.constant 3 : index
    %c0_35 = arith.constant 0 : index
    %c0_36 = arith.constant 0 : index
    %c0_37 = arith.constant 0 : index
    %32 = vector.load %arg2[%c0_33, %c3_34, %c0_35, %c0_36, %c0_37] : memref<1x4x10x10x128xbf16, #tpu.memory_space<vmem>>, vector<1x1x8x8x128xbf16>
    %33 = vector.shape_cast %32 : vector<1x1x8x8x128xbf16> to vector<8x8x128xbf16>
    %34 = vector.shape_cast %33 : vector<8x8x128xbf16> to vector<64x128xbf16>
    %c4 = arith.constant 4 : index
    %c0_38 = arith.constant 0 : index
    %c0_39 = arith.constant 0 : index
    %35 = vector.load %arg3[%c4, %c0_38, %c0_39] : memref<9x128x128xbf16, #tpu.memory_space<vmem>>, vector<1x128x128xbf16>
    %36 = vector.shape_cast %35 : vector<1x128x128xbf16> to vector<128x128xbf16>
    %cst_40 = arith.constant dense<0.000000e+00> : vector<64x128xf32>
    %37 = tpu.matmul %34, %36, %cst_40 {dimension_numbers = #tpu.dot_dimension_numbers<[1], [0], [0], [1], [0, 0, 1, 1], [], []>} : vector<64x128xbf16>, vector<128x128xbf16>, vector<64x128xf32> -> vector<64x128xf32>
    %38 = arith.addf %31, %37 : vector<64x128xf32>
    %c0_41 = arith.constant 0 : index
    %c2_42 = arith.constant 2 : index
    %c0_43 = arith.constant 0 : index
    %c1_44 = arith.constant 1 : index
    %c0_45 = arith.constant 0 : index
    %39 = vector.load %arg2[%c0_41, %c2_42, %c0_43, %c1_44, %c0_45] : memref<1x4x10x10x128xbf16, #tpu.memory_space<vmem>>, vector<1x1x8x8x128xbf16>
    %40 = vector.shape_cast %39 : vector<1x1x8x8x128xbf16> to vector<8x8x128xbf16>
    %41 = vector.shape_cast %40 : vector<8x8x128xbf16> to vector<64x128xbf16>
    %c5 = arith.constant 5 : index
    %c0_46 = arith.constant 0 : index
    %c0_47 = arith.constant 0 : index
    %42 = vector.load %arg3[%c5, %c0_46, %c0_47] : memref<9x128x128xbf16, #tpu.memory_space<vmem>>, vector<1x128x128xbf16>
    %43 = vector.shape_cast %42 : vector<1x128x128xbf16> to vector<128x128xbf16>
    %cst_48 = arith.constant dense<0.000000e+00> : vector<64x128xf32>
    %44 = tpu.matmul %41, %43, %cst_48 {dimension_numbers = #tpu.dot_dimension_numbers<[1], [0], [0], [1], [0, 0, 1, 1], [], []>} : vector<64x128xbf16>, vector<128x128xbf16>, vector<64x128xf32> -> vector<64x128xf32>
    %45 = arith.addf %38, %44 : vector<64x128xf32>
    %c0_49 = arith.constant 0 : index
    %c0_50 = arith.constant 0 : index
    %c1_51 = arith.constant 1 : index
    %c0_52 = arith.constant 0 : index
    %c0_53 = arith.constant 0 : index
    %46 = vector.load %arg2[%c0_49, %c0_50, %c1_51, %c0_52, %c0_53] : memref<1x4x10x10x128xbf16, #tpu.memory_space<vmem>>, vector<1x1x8x8x128xbf16>
    %47 = vector.shape_cast %46 : vector<1x1x8x8x128xbf16> to vector<8x8x128xbf16>
    %48 = vector.shape_cast %47 : vector<8x8x128xbf16> to vector<64x128xbf16>
    %c6 = arith.constant 6 : index
    %c0_54 = arith.constant 0 : index
    %c0_55 = arith.constant 0 : index
    %49 = vector.load %arg3[%c6, %c0_54, %c0_55] : memref<9x128x128xbf16, #tpu.memory_space<vmem>>, vector<1x128x128xbf16>
    %50 = vector.shape_cast %49 : vector<1x128x128xbf16> to vector<128x128xbf16>
    %cst_56 = arith.constant dense<0.000000e+00> : vector<64x128xf32>
    %51 = tpu.matmul %48, %50, %cst_56 {dimension_numbers = #tpu.dot_dimension_numbers<[1], [0], [0], [1], [0, 0, 1, 1], [], []>} : vector<64x128xbf16>, vector<128x128xbf16>, vector<64x128xf32> -> vector<64x128xf32>
    %52 = arith.addf %45, %51 : vector<64x128xf32>
    %c0_57 = arith.constant 0 : index
    %c1_58 = arith.constant 1 : index
    %c1_59 = arith.constant 1 : index
    %c0_60 = arith.constant 0 : index
    %c0_61 = arith.constant 0 : index
    %53 = vector.load %arg2[%c0_57, %c1_58, %c1_59, %c0_60, %c0_61] : memref<1x4x10x10x128xbf16, #tpu.memory_space<vmem>>, vector<1x1x8x8x128xbf16>
    %54 = vector.shape_cast %53 : vector<1x1x8x8x128xbf16> to vector<8x8x128xbf16>
    %55 = vector.shape_cast %54 : vector<8x8x128xbf16> to vector<64x128xbf16>
    %c7 = arith.constant 7 : index
    %c0_62 = arith.constant 0 : index
    %c0_63 = arith.constant 0 : index
    %56 = vector.load %arg3[%c7, %c0_62, %c0_63] : memref<9x128x128xbf16, #tpu.memory_space<vmem>>, vector<1x128x128xbf16>
    %57 = vector.shape_cast %56 : vector<1x128x128xbf16> to vector<128x128xbf16>
    %cst_64 = arith.constant dense<0.000000e+00> : vector<64x128xf32>
    %58 = tpu.matmul %55, %57, %cst_64 {dimension_numbers = #tpu.dot_dimension_numbers<[1], [0], [0], [1], [0, 0, 1, 1], [], []>} : vector<64x128xbf16>, vector<128x128xbf16>, vector<64x128xf32> -> vector<64x128xf32>
    %59 = arith.addf %52, %58 : vector<64x128xf32>
    %c0_65 = arith.constant 0 : index
    %c0_66 = arith.constant 0 : index
    %c1_67 = arith.constant 1 : index
    %c1_68 = arith.constant 1 : index
    %c0_69 = arith.constant 0 : index
    %60 = vector.load %arg2[%c0_65, %c0_66, %c1_67, %c1_68, %c0_69] : memref<1x4x10x10x128xbf16, #tpu.memory_space<vmem>>, vector<1x1x8x8x128xbf16>
    %61 = vector.shape_cast %60 : vector<1x1x8x8x128xbf16> to vector<8x8x128xbf16>
    %62 = vector.shape_cast %61 : vector<8x8x128xbf16> to vector<64x128xbf16>
    %c8 = arith.constant 8 : index
    %c0_70 = arith.constant 0 : index
    %c0_71 = arith.constant 0 : index
    %63 = vector.load %arg3[%c8, %c0_70, %c0_71] : memref<9x128x128xbf16, #tpu.memory_space<vmem>>, vector<1x128x128xbf16>
    %64 = vector.shape_cast %63 : vector<1x128x128xbf16> to vector<128x128xbf16>
    %cst_72 = arith.constant dense<0.000000e+00> : vector<64x128xf32>
    %65 = tpu.matmul %62, %64, %cst_72 {dimension_numbers = #tpu.dot_dimension_numbers<[1], [0], [0], [1], [0, 0, 1, 1], [], []>} : vector<64x128xbf16>, vector<128x128xbf16>, vector<64x128xf32> -> vector<64x128xf32>
    %66 = arith.addf %59, %65 : vector<64x128xf32>
    %c0_i32_73 = arith.constant 0 : i32
    %67 = arith.cmpi eq, %arg0, %c0_i32_73 : i32
    %68 = arith.extui %67 : i1 to i32
    %c0_i32_74 = arith.constant 0 : i32
    %69 = arith.cmpi ne, %68, %c0_i32_74 : i32
    scf.if %69 {
      %c0_76 = arith.constant 0 : index
      %c0_77 = arith.constant 0 : index
      %73 = vector.load %arg7[%c0_76, %c0_77] : memref<2x128xf32, #tpu.memory_space<vmem>>, vector<1x128xf32>
      %cst_78 = arith.constant dense<0.000000e+00> : vector<128xf32>
      %74 = vector.multi_reduction <add>, %66, %cst_78 [0] : vector<64x128xf32> to vector<128xf32>
      %75 = vector.shape_cast %74 : vector<128xf32> to vector<1x128xf32>
      %76 = arith.addf %73, %75 : vector<1x128xf32>
      %c0_79 = arith.constant 0 : index
      %c0_80 = arith.constant 0 : index
      %77 = vector.load %arg7[%c0_79, %c0_80] : memref<2x128xf32, #tpu.memory_space<vmem>>, vector<1x128xf32>
      tpu.vector_store %arg7[%c0_79, %c0_80], %76 {strides = array<i32>} : memref<2x128xf32, #tpu.memory_space<vmem>>, vector<1x128xf32>,
      %c1_81 = arith.constant 1 : index
      %c0_82 = arith.constant 0 : index
      %78 = vector.load %arg7[%c1_81, %c0_82] : memref<2x128xf32, #tpu.memory_space<vmem>>, vector<1x128xf32>
      %79 = arith.mulf %66, %66 : vector<64x128xf32>
      %cst_83 = arith.constant dense<0.000000e+00> : vector<128xf32>
      %80 = vector.multi_reduction <add>, %79, %cst_83 [0] : vector<64x128xf32> to vector<128xf32>
      %81 = vector.shape_cast %80 : vector<128xf32> to vector<1x128xf32>
      %82 = arith.addf %78, %81 : vector<1x128xf32>
      %c1_84 = arith.constant 1 : index
      %c0_85 = arith.constant 0 : index
      %83 = vector.load %arg7[%c1_84, %c0_85] : memref<2x128xf32, #tpu.memory_space<vmem>>, vector<1x128xf32>
      tpu.vector_store %arg7[%c1_84, %c0_85], %82 {strides = array<i32>} : memref<2x128xf32, #tpu.memory_space<vmem>>, vector<1x128xf32>,
      %cst_86 = arith.constant 0.000000e+00 : bf16
      %84 = vector.broadcast %cst_86 : bf16 to vector<1x8x8x128xbf16>
      %c0_87 = arith.constant 0 : index
      %c0_88 = arith.constant 0 : index
      %c0_89 = arith.constant 0 : index
      %c0_90 = arith.constant 0 : index
      %85 = vector.load %arg6[%c0_87, %c0_88, %c0_89, %c0_90] : memref<1x8x8x128xbf16, #tpu.memory_space<vmem>>, vector<1x8x8x128xbf16>
      tpu.vector_store %arg6[%c0_87, %c0_88, %c0_89, %c0_90], %84 {strides = array<i32>} : memref<1x8x8x128xbf16, #tpu.memory_space<vmem>>, vector<1x8x8x128xbf16>,
    } else {
    }
    %c1_i32 = arith.constant 1 : i32
    %70 = arith.cmpi eq, %arg0, %c1_i32 : i32
    %71 = arith.extui %70 : i1 to i32
    %c0_i32_75 = arith.constant 0 : i32
    %72 = arith.cmpi ne, %71, %c0_i32_75 : i32
    scf.if %72 {
      %c0_76 = arith.constant 0 : index
      %c0_77 = arith.constant 0 : index
      %73 = vector.load %arg7[%c0_76, %c0_77] : memref<2x128xf32, #tpu.memory_space<vmem>>, vector<1x128xf32>
      %c1_78 = arith.constant 1 : index
      %c0_79 = arith.constant 0 : index
      %74 = vector.load %arg7[%c1_78, %c0_79] : memref<2x128xf32, #tpu.memory_space<vmem>>, vector<1x128xf32>
      %c0_80 = arith.constant 0 : index
      %c0_81 = arith.constant 0 : index
      %75 = vector.load %arg4[%c0_80, %c0_81] : memref<1x128xf32, #tpu.memory_space<vmem>>, vector<1x128xf32>
      %c0_82 = arith.constant 0 : index
      %c0_83 = arith.constant 0 : index
      %76 = vector.load %arg5[%c0_82, %c0_83] : memref<1x128xf32, #tpu.memory_space<vmem>>, vector<1x128xf32>
      %cst_84 = arith.constant 7.812500e-03 : f32
      %77 = vector.broadcast %cst_84 : f32 to vector<1x128xf32>
      %78 = arith.mulf %73, %77 : vector<1x128xf32>
      %cst_85 = arith.constant 7.812500e-03 : f32
      %79 = vector.broadcast %cst_85 : f32 to vector<1x128xf32>
      %80 = arith.mulf %74, %79 : vector<1x128xf32>
      %81 = arith.mulf %78, %78 : vector<1x128xf32>
      %82 = arith.subf %80, %81 : vector<1x128xf32>
      %cst_86 = arith.constant 0.000000e+00 : f32
      %83 = vector.broadcast %cst_86 : f32 to vector<1x128xf32>
      %84 = arith.maximumf %82, %83 : vector<1x128xf32>
      %cst_87 = arith.constant 9.99999974E-6 : f32
      %85 = vector.broadcast %cst_87 : f32 to vector<1x128xf32>
      %86 = arith.addf %84, %85 : vector<1x128xf32>
      %87 = math.rsqrt %86 : vector<1x128xf32>
      %88 = arith.mulf %75, %87 : vector<1x128xf32>
      %89 = arith.mulf %78, %88 : vector<1x128xf32>
      %90 = arith.subf %76, %89 : vector<1x128xf32>
      %91 = vector.broadcast %88 : vector<1x128xf32> to vector<64x128xf32>
      %92 = arith.mulf %66, %91 : vector<64x128xf32>
      %93 = vector.broadcast %90 : vector<1x128xf32> to vector<64x128xf32>
      %94 = arith.addf %92, %93 : vector<64x128xf32>
      %cst_88 = arith.constant 0.000000e+00 : f32
      %95 = vector.broadcast %cst_88 : f32 to vector<64x128xf32>
      %96 = arith.maximumf %94, %95 : vector<64x128xf32>
      %97 = vector.shape_cast %96 : vector<64x128xf32> to vector<1x8x8x128xf32>
      %98 = arith.truncf %97 : vector<1x8x8x128xf32> to vector<1x8x8x128xbf16>
      %c0_89 = arith.constant 0 : index
      %c0_90 = arith.constant 0 : index
      %c0_91 = arith.constant 0 : index
      %c0_92 = arith.constant 0 : index
      %99 = vector.load %arg6[%c0_89, %c0_90, %c0_91, %c0_92] : memref<1x8x8x128xbf16, #tpu.memory_space<vmem>>, vector<1x8x8x128xbf16>
      tpu.vector_store %arg6[%c0_89, %c0_90, %c0_91, %c0_92], %98 {strides = array<i32>} : memref<1x8x8x128xbf16, #tpu.memory_space<vmem>>, vector<1x8x8x128xbf16>,
    } else {
    }
    return
  }
  func.func @transform_0(%arg0: i32, %arg1: i32) -> (i32, i32, i32, i32, i32) {
    %c0_i32 = arith.constant 0 : i32
    %c0_i32_0 = arith.constant 0 : i32
    %c0_i32_1 = arith.constant 0 : i32
    %c0_i32_2 = arith.constant 0 : i32
    %c0_i32_3 = arith.constant 0 : i32
    return %arg1, %c0_i32, %c0_i32_0, %c0_i32_1, %c0_i32_2 : i32, i32, i32, i32, i32
  }
  func.func @transform_1(%arg0: i32, %arg1: i32) -> (i32, i32, i32) {
    %c0_i32 = arith.constant 0 : i32
    %c0_i32_0 = arith.constant 0 : i32
    %c0_i32_1 = arith.constant 0 : i32
    %c0_i32_2 = arith.constant 0 : i32
    return %c0_i32, %c0_i32_0, %c0_i32_1 : i32, i32, i32
  }
  func.func @transform_2(%arg0: i32, %arg1: i32) -> (i32, i32) {
    %c0_i32 = arith.constant 0 : i32
    %c0_i32_0 = arith.constant 0 : i32
    %c0_i32_1 = arith.constant 0 : i32
    return %c0_i32, %c0_i32_0 : i32, i32
  }
  func.func @transform_3(%arg0: i32, %arg1: i32) -> (i32, i32) {
    %c0_i32 = arith.constant 0 : i32
    %c0_i32_0 = arith.constant 0 : i32
    %c0_i32_1 = arith.constant 0 : i32
    return %c0_i32, %c0_i32_0 : i32, i32
  }
  func.func @transform_4(%arg0: i32, %arg1: i32) -> (i32, i32, i32, i32) {
    %c0_i32 = arith.constant 0 : i32
    %c0_i32_0 = arith.constant 0 : i32
    %c0_i32_1 = arith.constant 0 : i32
    %c0_i32_2 = arith.constant 0 : i32
    return %arg1, %c0_i32, %c0_i32_0, %c0_i32_1 : i32, i32, i32, i32
  }
}

module attributes {stable_mosaic.version = 11 : i64} {
  func.func @_conv_bn_residual_kernel(%arg0: i32, %arg1: i32, %arg2: memref<1x10x10x128xbf16, #tpu.memory_space<vmem>>, %arg3: memref<9x128x128xbf16, #tpu.memory_space<vmem>>, %arg4: memref<1x128xf32, #tpu.memory_space<vmem>>, %arg5: memref<1x128xf32, #tpu.memory_space<vmem>>, %arg6: memref<1x4x10x10x128xbf16, #tpu.memory_space<vmem>>, %arg7: memref<128x128xbf16, #tpu.memory_space<vmem>>, %arg8: memref<1x128xf32, #tpu.memory_space<vmem>>, %arg9: memref<1x128xf32, #tpu.memory_space<vmem>>, %arg10: memref<1x8x8x128xf32, #tpu.memory_space<vmem>>, %arg11: memref<4x128xf32, #tpu.memory_space<vmem>>) attributes {dimension_semantics = [#tpu.dimension_semantics<arbitrary>, #tpu.dimension_semantics<arbitrary>], iteration_bounds = array<i64: 2, 2>, scalar_prefetch = 0 : i64, scratch_operands = 1 : i64, tpu.core_type = #tpu.core_type<tc>, window_params = [{transform_indices = @transform_0, window_bounds = array<i64: 1, 10, 10, 128>}, {pipeline_mode = #tpu.pipeline_mode<synchronous>, transform_indices = @transform_1, window_bounds = array<i64: 9, 128, 128>}, {pipeline_mode = #tpu.pipeline_mode<synchronous>, transform_indices = @transform_2, window_bounds = array<i64: 1, 128>}, {pipeline_mode = #tpu.pipeline_mode<synchronous>, transform_indices = @transform_3, window_bounds = array<i64: 1, 128>}, {transform_indices = @transform_4, window_bounds = array<i64: 1, 4, 10, 10, 128>}, {pipeline_mode = #tpu.pipeline_mode<synchronous>, transform_indices = @transform_5, window_bounds = array<i64: 128, 128>}, {pipeline_mode = #tpu.pipeline_mode<synchronous>, transform_indices = @transform_6, window_bounds = array<i64: 1, 128>}, {pipeline_mode = #tpu.pipeline_mode<synchronous>, transform_indices = @transform_7, window_bounds = array<i64: 1, 128>}, {transform_indices = @transform_8, window_bounds = array<i64: 1, 8, 8, 128>}]} {
    %c0_i32 = arith.constant 0 : i32
    %0 = arith.cmpi eq, %arg0, %c0_i32 : i32
    %c0_i32_0 = arith.constant 0 : i32
    %1 = arith.cmpi eq, %arg1, %c0_i32_0 : i32
    %2 = arith.andi %0, %1 : i1
    %3 = arith.extui %2 : i1 to i32
    %c0_i32_1 = arith.constant 0 : i32
    %4 = arith.cmpi ne, %3, %c0_i32_1 : i32
    scf.if %4 {
      %cst_75 = arith.constant 0.000000e+00 : f32
      %78 = vector.broadcast %cst_75 : f32 to vector<4x128xf32>
      %c0_76 = arith.constant 0 : index
      %c0_77 = arith.constant 0 : index
      %79 = vector.load %arg11[%c0_76, %c0_77] : memref<4x128xf32, #tpu.memory_space<vmem>>, vector<4x128xf32>
      tpu.vector_store %arg11[%c0_76, %c0_77], %78 {strides = array<i32>} : memref<4x128xf32, #tpu.memory_space<vmem>>, vector<4x128xf32>,
    } else {
    }
    %c0 = arith.constant 0 : index
    %c0_2 = arith.constant 0 : index
    %c0_3 = arith.constant 0 : index
    %c0_4 = arith.constant 0 : index
    %5 = vector.load %arg2[%c0, %c0_2, %c0_3, %c0_4] : memref<1x10x10x128xbf16, #tpu.memory_space<vmem>>, vector<1x8x8x128xbf16>
    %6 = vector.shape_cast %5 : vector<1x8x8x128xbf16> to vector<8x8x128xbf16>
    %7 = vector.shape_cast %6 : vector<8x8x128xbf16> to vector<64x128xbf16>
    %c0_5 = arith.constant 0 : index
    %c0_6 = arith.constant 0 : index
    %c0_7 = arith.constant 0 : index
    %8 = vector.load %arg3[%c0_5, %c0_6, %c0_7] : memref<9x128x128xbf16, #tpu.memory_space<vmem>>, vector<1x128x128xbf16>
    %9 = vector.shape_cast %8 : vector<1x128x128xbf16> to vector<128x128xbf16>
    %cst = arith.constant dense<0.000000e+00> : vector<64x128xf32>
    %10 = tpu.matmul %7, %9, %cst {dimension_numbers = #tpu.dot_dimension_numbers<[1], [0], [0], [1], [0, 0, 1, 1], [], []>} : vector<64x128xbf16>, vector<128x128xbf16>, vector<64x128xf32> -> vector<64x128xf32>
    %c0_8 = arith.constant 0 : index
    %c0_9 = arith.constant 0 : index
    %c1 = arith.constant 1 : index
    %c0_10 = arith.constant 0 : index
    %11 = vector.load %arg2[%c0_8, %c0_9, %c1, %c0_10] : memref<1x10x10x128xbf16, #tpu.memory_space<vmem>>, vector<1x8x8x128xbf16>
    %12 = vector.shape_cast %11 : vector<1x8x8x128xbf16> to vector<8x8x128xbf16>
    %13 = vector.shape_cast %12 : vector<8x8x128xbf16> to vector<64x128xbf16>
    %c1_11 = arith.constant 1 : index
    %c0_12 = arith.constant 0 : index
    %c0_13 = arith.constant 0 : index
    %14 = vector.load %arg3[%c1_11, %c0_12, %c0_13] : memref<9x128x128xbf16, #tpu.memory_space<vmem>>, vector<1x128x128xbf16>
    %15 = vector.shape_cast %14 : vector<1x128x128xbf16> to vector<128x128xbf16>
    %cst_14 = arith.constant dense<0.000000e+00> : vector<64x128xf32>
    %16 = tpu.matmul %13, %15, %cst_14 {dimension_numbers = #tpu.dot_dimension_numbers<[1], [0], [0], [1], [0, 0, 1, 1], [], []>} : vector<64x128xbf16>, vector<128x128xbf16>, vector<64x128xf32> -> vector<64x128xf32>
    %17 = arith.addf %10, %16 : vector<64x128xf32>
    %c0_15 = arith.constant 0 : index
    %c0_16 = arith.constant 0 : index
    %c2 = arith.constant 2 : index
    %c0_17 = arith.constant 0 : index
    %18 = vector.load %arg2[%c0_15, %c0_16, %c2, %c0_17] : memref<1x10x10x128xbf16, #tpu.memory_space<vmem>>, vector<1x8x8x128xbf16>
    %19 = vector.shape_cast %18 : vector<1x8x8x128xbf16> to vector<8x8x128xbf16>
    %20 = vector.shape_cast %19 : vector<8x8x128xbf16> to vector<64x128xbf16>
    %c2_18 = arith.constant 2 : index
    %c0_19 = arith.constant 0 : index
    %c0_20 = arith.constant 0 : index
    %21 = vector.load %arg3[%c2_18, %c0_19, %c0_20] : memref<9x128x128xbf16, #tpu.memory_space<vmem>>, vector<1x128x128xbf16>
    %22 = vector.shape_cast %21 : vector<1x128x128xbf16> to vector<128x128xbf16>
    %cst_21 = arith.constant dense<0.000000e+00> : vector<64x128xf32>
    %23 = tpu.matmul %20, %22, %cst_21 {dimension_numbers = #tpu.dot_dimension_numbers<[1], [0], [0], [1], [0, 0, 1, 1], [], []>} : vector<64x128xbf16>, vector<128x128xbf16>, vector<64x128xf32> -> vector<64x128xf32>
    %24 = arith.addf %17, %23 : vector<64x128xf32>
    %c0_22 = arith.constant 0 : index
    %c1_23 = arith.constant 1 : index
    %c0_24 = arith.constant 0 : index
    %c0_25 = arith.constant 0 : index
    %25 = vector.load %arg2[%c0_22, %c1_23, %c0_24, %c0_25] : memref<1x10x10x128xbf16, #tpu.memory_space<vmem>>, vector<1x8x8x128xbf16>
    %26 = vector.shape_cast %25 : vector<1x8x8x128xbf16> to vector<8x8x128xbf16>
    %27 = vector.shape_cast %26 : vector<8x8x128xbf16> to vector<64x128xbf16>
    %c3 = arith.constant 3 : index
    %c0_26 = arith.constant 0 : index
    %c0_27 = arith.constant 0 : index
    %28 = vector.load %arg3[%c3, %c0_26, %c0_27] : memref<9x128x128xbf16, #tpu.memory_space<vmem>>, vector<1x128x128xbf16>
    %29 = vector.shape_cast %28 : vector<1x128x128xbf16> to vector<128x128xbf16>
    %cst_28 = arith.constant dense<0.000000e+00> : vector<64x128xf32>
    %30 = tpu.matmul %27, %29, %cst_28 {dimension_numbers = #tpu.dot_dimension_numbers<[1], [0], [0], [1], [0, 0, 1, 1], [], []>} : vector<64x128xbf16>, vector<128x128xbf16>, vector<64x128xf32> -> vector<64x128xf32>
    %31 = arith.addf %24, %30 : vector<64x128xf32>
    %c0_29 = arith.constant 0 : index
    %c1_30 = arith.constant 1 : index
    %c1_31 = arith.constant 1 : index
    %c0_32 = arith.constant 0 : index
    %32 = vector.load %arg2[%c0_29, %c1_30, %c1_31, %c0_32] : memref<1x10x10x128xbf16, #tpu.memory_space<vmem>>, vector<1x8x8x128xbf16>
    %33 = vector.shape_cast %32 : vector<1x8x8x128xbf16> to vector<8x8x128xbf16>
    %34 = vector.shape_cast %33 : vector<8x8x128xbf16> to vector<64x128xbf16>
    %c4 = arith.constant 4 : index
    %c0_33 = arith.constant 0 : index
    %c0_34 = arith.constant 0 : index
    %35 = vector.load %arg3[%c4, %c0_33, %c0_34] : memref<9x128x128xbf16, #tpu.memory_space<vmem>>, vector<1x128x128xbf16>
    %36 = vector.shape_cast %35 : vector<1x128x128xbf16> to vector<128x128xbf16>
    %cst_35 = arith.constant dense<0.000000e+00> : vector<64x128xf32>
    %37 = tpu.matmul %34, %36, %cst_35 {dimension_numbers = #tpu.dot_dimension_numbers<[1], [0], [0], [1], [0, 0, 1, 1], [], []>} : vector<64x128xbf16>, vector<128x128xbf16>, vector<64x128xf32> -> vector<64x128xf32>
    %38 = arith.addf %31, %37 : vector<64x128xf32>
    %c0_36 = arith.constant 0 : index
    %c1_37 = arith.constant 1 : index
    %c2_38 = arith.constant 2 : index
    %c0_39 = arith.constant 0 : index
    %39 = vector.load %arg2[%c0_36, %c1_37, %c2_38, %c0_39] : memref<1x10x10x128xbf16, #tpu.memory_space<vmem>>, vector<1x8x8x128xbf16>
    %40 = vector.shape_cast %39 : vector<1x8x8x128xbf16> to vector<8x8x128xbf16>
    %41 = vector.shape_cast %40 : vector<8x8x128xbf16> to vector<64x128xbf16>
    %c5 = arith.constant 5 : index
    %c0_40 = arith.constant 0 : index
    %c0_41 = arith.constant 0 : index
    %42 = vector.load %arg3[%c5, %c0_40, %c0_41] : memref<9x128x128xbf16, #tpu.memory_space<vmem>>, vector<1x128x128xbf16>
    %43 = vector.shape_cast %42 : vector<1x128x128xbf16> to vector<128x128xbf16>
    %cst_42 = arith.constant dense<0.000000e+00> : vector<64x128xf32>
    %44 = tpu.matmul %41, %43, %cst_42 {dimension_numbers = #tpu.dot_dimension_numbers<[1], [0], [0], [1], [0, 0, 1, 1], [], []>} : vector<64x128xbf16>, vector<128x128xbf16>, vector<64x128xf32> -> vector<64x128xf32>
    %45 = arith.addf %38, %44 : vector<64x128xf32>
    %c0_43 = arith.constant 0 : index
    %c2_44 = arith.constant 2 : index
    %c0_45 = arith.constant 0 : index
    %c0_46 = arith.constant 0 : index
    %46 = vector.load %arg2[%c0_43, %c2_44, %c0_45, %c0_46] : memref<1x10x10x128xbf16, #tpu.memory_space<vmem>>, vector<1x8x8x128xbf16>
    %47 = vector.shape_cast %46 : vector<1x8x8x128xbf16> to vector<8x8x128xbf16>
    %48 = vector.shape_cast %47 : vector<8x8x128xbf16> to vector<64x128xbf16>
    %c6 = arith.constant 6 : index
    %c0_47 = arith.constant 0 : index
    %c0_48 = arith.constant 0 : index
    %49 = vector.load %arg3[%c6, %c0_47, %c0_48] : memref<9x128x128xbf16, #tpu.memory_space<vmem>>, vector<1x128x128xbf16>
    %50 = vector.shape_cast %49 : vector<1x128x128xbf16> to vector<128x128xbf16>
    %cst_49 = arith.constant dense<0.000000e+00> : vector<64x128xf32>
    %51 = tpu.matmul %48, %50, %cst_49 {dimension_numbers = #tpu.dot_dimension_numbers<[1], [0], [0], [1], [0, 0, 1, 1], [], []>} : vector<64x128xbf16>, vector<128x128xbf16>, vector<64x128xf32> -> vector<64x128xf32>
    %52 = arith.addf %45, %51 : vector<64x128xf32>
    %c0_50 = arith.constant 0 : index
    %c2_51 = arith.constant 2 : index
    %c1_52 = arith.constant 1 : index
    %c0_53 = arith.constant 0 : index
    %53 = vector.load %arg2[%c0_50, %c2_51, %c1_52, %c0_53] : memref<1x10x10x128xbf16, #tpu.memory_space<vmem>>, vector<1x8x8x128xbf16>
    %54 = vector.shape_cast %53 : vector<1x8x8x128xbf16> to vector<8x8x128xbf16>
    %55 = vector.shape_cast %54 : vector<8x8x128xbf16> to vector<64x128xbf16>
    %c7 = arith.constant 7 : index
    %c0_54 = arith.constant 0 : index
    %c0_55 = arith.constant 0 : index
    %56 = vector.load %arg3[%c7, %c0_54, %c0_55] : memref<9x128x128xbf16, #tpu.memory_space<vmem>>, vector<1x128x128xbf16>
    %57 = vector.shape_cast %56 : vector<1x128x128xbf16> to vector<128x128xbf16>
    %cst_56 = arith.constant dense<0.000000e+00> : vector<64x128xf32>
    %58 = tpu.matmul %55, %57, %cst_56 {dimension_numbers = #tpu.dot_dimension_numbers<[1], [0], [0], [1], [0, 0, 1, 1], [], []>} : vector<64x128xbf16>, vector<128x128xbf16>, vector<64x128xf32> -> vector<64x128xf32>
    %59 = arith.addf %52, %58 : vector<64x128xf32>
    %c0_57 = arith.constant 0 : index
    %c2_58 = arith.constant 2 : index
    %c2_59 = arith.constant 2 : index
    %c0_60 = arith.constant 0 : index
    %60 = vector.load %arg2[%c0_57, %c2_58, %c2_59, %c0_60] : memref<1x10x10x128xbf16, #tpu.memory_space<vmem>>, vector<1x8x8x128xbf16>
    %61 = vector.shape_cast %60 : vector<1x8x8x128xbf16> to vector<8x8x128xbf16>
    %62 = vector.shape_cast %61 : vector<8x8x128xbf16> to vector<64x128xbf16>
    %c8 = arith.constant 8 : index
    %c0_61 = arith.constant 0 : index
    %c0_62 = arith.constant 0 : index
    %63 = vector.load %arg3[%c8, %c0_61, %c0_62] : memref<9x128x128xbf16, #tpu.memory_space<vmem>>, vector<1x128x128xbf16>
    %64 = vector.shape_cast %63 : vector<1x128x128xbf16> to vector<128x128xbf16>
    %cst_63 = arith.constant dense<0.000000e+00> : vector<64x128xf32>
    %65 = tpu.matmul %62, %64, %cst_63 {dimension_numbers = #tpu.dot_dimension_numbers<[1], [0], [0], [1], [0, 0, 1, 1], [], []>} : vector<64x128xbf16>, vector<128x128xbf16>, vector<64x128xf32> -> vector<64x128xf32>
    %66 = arith.addf %59, %65 : vector<64x128xf32>
    %c0_64 = arith.constant 0 : index
    %c3_65 = arith.constant 3 : index
    %c0_66 = arith.constant 0 : index
    %c0_67 = arith.constant 0 : index
    %c0_68 = arith.constant 0 : index
    %67 = vector.load %arg6[%c0_64, %c3_65, %c0_66, %c0_67, %c0_68] : memref<1x4x10x10x128xbf16, #tpu.memory_space<vmem>>, vector<1x1x8x8x128xbf16>
    %68 = vector.shape_cast %67 : vector<1x1x8x8x128xbf16> to vector<8x8x128xbf16>
    %69 = vector.shape_cast %68 : vector<8x8x128xbf16> to vector<64x128xbf16>
    %c0_69 = arith.constant 0 : index
    %c0_70 = arith.constant 0 : index
    %70 = vector.load %arg7[%c0_69, %c0_70] : memref<128x128xbf16, #tpu.memory_space<vmem>>, vector<128x128xbf16>
    %cst_71 = arith.constant dense<0.000000e+00> : vector<64x128xf32>
    %71 = tpu.matmul %69, %70, %cst_71 {dimension_numbers = #tpu.dot_dimension_numbers<[1], [0], [0], [1], [0, 0, 1, 1], [], []>} : vector<64x128xbf16>, vector<128x128xbf16>, vector<64x128xf32> -> vector<64x128xf32>
    %c0_i32_72 = arith.constant 0 : i32
    %72 = arith.cmpi eq, %arg0, %c0_i32_72 : i32
    %73 = arith.extui %72 : i1 to i32
    %c0_i32_73 = arith.constant 0 : i32
    %74 = arith.cmpi ne, %73, %c0_i32_73 : i32
    scf.if %74 {
      %c0_75 = arith.constant 0 : index
      %c0_76 = arith.constant 0 : index
      %78 = vector.load %arg11[%c0_75, %c0_76] : memref<4x128xf32, #tpu.memory_space<vmem>>, vector<1x128xf32>
      %cst_77 = arith.constant dense<0.000000e+00> : vector<128xf32>
      %79 = vector.multi_reduction <add>, %66, %cst_77 [0] : vector<64x128xf32> to vector<128xf32>
      %80 = vector.shape_cast %79 : vector<128xf32> to vector<1x128xf32>
      %81 = arith.addf %78, %80 : vector<1x128xf32>
      %c0_78 = arith.constant 0 : index
      %c0_79 = arith.constant 0 : index
      %82 = vector.load %arg11[%c0_78, %c0_79] : memref<4x128xf32, #tpu.memory_space<vmem>>, vector<1x128xf32>
      tpu.vector_store %arg11[%c0_78, %c0_79], %81 {strides = array<i32>} : memref<4x128xf32, #tpu.memory_space<vmem>>, vector<1x128xf32>,
      %c1_80 = arith.constant 1 : index
      %c0_81 = arith.constant 0 : index
      %83 = vector.load %arg11[%c1_80, %c0_81] : memref<4x128xf32, #tpu.memory_space<vmem>>, vector<1x128xf32>
      %84 = arith.mulf %66, %66 : vector<64x128xf32>
      %cst_82 = arith.constant dense<0.000000e+00> : vector<128xf32>
      %85 = vector.multi_reduction <add>, %84, %cst_82 [0] : vector<64x128xf32> to vector<128xf32>
      %86 = vector.shape_cast %85 : vector<128xf32> to vector<1x128xf32>
      %87 = arith.addf %83, %86 : vector<1x128xf32>
      %c1_83 = arith.constant 1 : index
      %c0_84 = arith.constant 0 : index
      %88 = vector.load %arg11[%c1_83, %c0_84] : memref<4x128xf32, #tpu.memory_space<vmem>>, vector<1x128xf32>
      tpu.vector_store %arg11[%c1_83, %c0_84], %87 {strides = array<i32>} : memref<4x128xf32, #tpu.memory_space<vmem>>, vector<1x128xf32>,
      %c2_85 = arith.constant 2 : index
      %c0_86 = arith.constant 0 : index
      %89 = vector.load %arg11[%c2_85, %c0_86] : memref<4x128xf32, #tpu.memory_space<vmem>>, vector<1x128xf32>
      %cst_87 = arith.constant dense<0.000000e+00> : vector<128xf32>
      %90 = vector.multi_reduction <add>, %71, %cst_87 [0] : vector<64x128xf32> to vector<128xf32>
      %91 = vector.shape_cast %90 : vector<128xf32> to vector<1x128xf32>
      %92 = arith.addf %89, %91 : vector<1x128xf32>
      %c2_88 = arith.constant 2 : index
      %c0_89 = arith.constant 0 : index
      %93 = vector.load %arg11[%c2_88, %c0_89] : memref<4x128xf32, #tpu.memory_space<vmem>>, vector<1x128xf32>
      tpu.vector_store %arg11[%c2_88, %c0_89], %92 {strides = array<i32>} : memref<4x128xf32, #tpu.memory_space<vmem>>, vector<1x128xf32>,
      %c3_90 = arith.constant 3 : index
      %c0_91 = arith.constant 0 : index
      %94 = vector.load %arg11[%c3_90, %c0_91] : memref<4x128xf32, #tpu.memory_space<vmem>>, vector<1x128xf32>
      %95 = arith.mulf %71, %71 : vector<64x128xf32>
      %cst_92 = arith.constant dense<0.000000e+00> : vector<128xf32>
      %96 = vector.multi_reduction <add>, %95, %cst_92 [0] : vector<64x128xf32> to vector<128xf32>
      %97 = vector.shape_cast %96 : vector<128xf32> to vector<1x128xf32>
      %98 = arith.addf %94, %97 : vector<1x128xf32>
      %c3_93 = arith.constant 3 : index
      %c0_94 = arith.constant 0 : index
      %99 = vector.load %arg11[%c3_93, %c0_94] : memref<4x128xf32, #tpu.memory_space<vmem>>, vector<1x128xf32>
      tpu.vector_store %arg11[%c3_93, %c0_94], %98 {strides = array<i32>} : memref<4x128xf32, #tpu.memory_space<vmem>>, vector<1x128xf32>,
      %cst_95 = arith.constant 0.000000e+00 : f32
      %100 = vector.broadcast %cst_95 : f32 to vector<1x8x8x128xf32>
      %c0_96 = arith.constant 0 : index
      %c0_97 = arith.constant 0 : index
      %c0_98 = arith.constant 0 : index
      %c0_99 = arith.constant 0 : index
      %101 = vector.load %arg10[%c0_96, %c0_97, %c0_98, %c0_99] : memref<1x8x8x128xf32, #tpu.memory_space<vmem>>, vector<1x8x8x128xf32>
      tpu.vector_store %arg10[%c0_96, %c0_97, %c0_98, %c0_99], %100 {strides = array<i32>} : memref<1x8x8x128xf32, #tpu.memory_space<vmem>>, vector<1x8x8x128xf32>,
    } else {
    }
    %c1_i32 = arith.constant 1 : i32
    %75 = arith.cmpi eq, %arg0, %c1_i32 : i32
    %76 = arith.extui %75 : i1 to i32
    %c0_i32_74 = arith.constant 0 : i32
    %77 = arith.cmpi ne, %76, %c0_i32_74 : i32
    scf.if %77 {
      %c0_75 = arith.constant 0 : index
      %c0_76 = arith.constant 0 : index
      %78 = vector.load %arg11[%c0_75, %c0_76] : memref<4x128xf32, #tpu.memory_space<vmem>>, vector<1x128xf32>
      %c1_77 = arith.constant 1 : index
      %c0_78 = arith.constant 0 : index
      %79 = vector.load %arg11[%c1_77, %c0_78] : memref<4x128xf32, #tpu.memory_space<vmem>>, vector<1x128xf32>
      %c0_79 = arith.constant 0 : index
      %c0_80 = arith.constant 0 : index
      %80 = vector.load %arg4[%c0_79, %c0_80] : memref<1x128xf32, #tpu.memory_space<vmem>>, vector<1x128xf32>
      %c0_81 = arith.constant 0 : index
      %c0_82 = arith.constant 0 : index
      %81 = vector.load %arg5[%c0_81, %c0_82] : memref<1x128xf32, #tpu.memory_space<vmem>>, vector<1x128xf32>
      %cst_83 = arith.constant 7.812500e-03 : f32
      %82 = vector.broadcast %cst_83 : f32 to vector<1x128xf32>
      %83 = arith.mulf %78, %82 : vector<1x128xf32>
      %cst_84 = arith.constant 7.812500e-03 : f32
      %84 = vector.broadcast %cst_84 : f32 to vector<1x128xf32>
      %85 = arith.mulf %79, %84 : vector<1x128xf32>
      %86 = arith.mulf %83, %83 : vector<1x128xf32>
      %87 = arith.subf %85, %86 : vector<1x128xf32>
      %cst_85 = arith.constant 0.000000e+00 : f32
      %88 = vector.broadcast %cst_85 : f32 to vector<1x128xf32>
      %89 = arith.maximumf %87, %88 : vector<1x128xf32>
      %cst_86 = arith.constant 9.99999974E-6 : f32
      %90 = vector.broadcast %cst_86 : f32 to vector<1x128xf32>
      %91 = arith.addf %89, %90 : vector<1x128xf32>
      %92 = math.rsqrt %91 : vector<1x128xf32>
      %93 = arith.mulf %80, %92 : vector<1x128xf32>
      %94 = arith.mulf %83, %93 : vector<1x128xf32>
      %95 = arith.subf %81, %94 : vector<1x128xf32>
      %96 = vector.broadcast %93 : vector<1x128xf32> to vector<64x128xf32>
      %97 = arith.mulf %66, %96 : vector<64x128xf32>
      %98 = vector.broadcast %95 : vector<1x128xf32> to vector<64x128xf32>
      %99 = arith.addf %97, %98 : vector<64x128xf32>
      %c2_87 = arith.constant 2 : index
      %c0_88 = arith.constant 0 : index
      %100 = vector.load %arg11[%c2_87, %c0_88] : memref<4x128xf32, #tpu.memory_space<vmem>>, vector<1x128xf32>
      %c3_89 = arith.constant 3 : index
      %c0_90 = arith.constant 0 : index
      %101 = vector.load %arg11[%c3_89, %c0_90] : memref<4x128xf32, #tpu.memory_space<vmem>>, vector<1x128xf32>
      %c0_91 = arith.constant 0 : index
      %c0_92 = arith.constant 0 : index
      %102 = vector.load %arg8[%c0_91, %c0_92] : memref<1x128xf32, #tpu.memory_space<vmem>>, vector<1x128xf32>
      %c0_93 = arith.constant 0 : index
      %c0_94 = arith.constant 0 : index
      %103 = vector.load %arg9[%c0_93, %c0_94] : memref<1x128xf32, #tpu.memory_space<vmem>>, vector<1x128xf32>
      %cst_95 = arith.constant 7.812500e-03 : f32
      %104 = vector.broadcast %cst_95 : f32 to vector<1x128xf32>
      %105 = arith.mulf %100, %104 : vector<1x128xf32>
      %cst_96 = arith.constant 7.812500e-03 : f32
      %106 = vector.broadcast %cst_96 : f32 to vector<1x128xf32>
      %107 = arith.mulf %101, %106 : vector<1x128xf32>
      %108 = arith.mulf %105, %105 : vector<1x128xf32>
      %109 = arith.subf %107, %108 : vector<1x128xf32>
      %cst_97 = arith.constant 0.000000e+00 : f32
      %110 = vector.broadcast %cst_97 : f32 to vector<1x128xf32>
      %111 = arith.maximumf %109, %110 : vector<1x128xf32>
      %cst_98 = arith.constant 9.99999974E-6 : f32
      %112 = vector.broadcast %cst_98 : f32 to vector<1x128xf32>
      %113 = arith.addf %111, %112 : vector<1x128xf32>
      %114 = math.rsqrt %113 : vector<1x128xf32>
      %115 = arith.mulf %102, %114 : vector<1x128xf32>
      %116 = arith.mulf %105, %115 : vector<1x128xf32>
      %117 = arith.subf %103, %116 : vector<1x128xf32>
      %118 = vector.broadcast %115 : vector<1x128xf32> to vector<64x128xf32>
      %119 = arith.mulf %71, %118 : vector<64x128xf32>
      %120 = vector.broadcast %117 : vector<1x128xf32> to vector<64x128xf32>
      %121 = arith.addf %119, %120 : vector<64x128xf32>
      %122 = arith.addf %99, %121 : vector<64x128xf32>
      %cst_99 = arith.constant 0.000000e+00 : f32
      %123 = vector.broadcast %cst_99 : f32 to vector<64x128xf32>
      %124 = arith.maximumf %122, %123 : vector<64x128xf32>
      %125 = vector.shape_cast %124 : vector<64x128xf32> to vector<1x8x8x128xf32>
      %c0_100 = arith.constant 0 : index
      %c0_101 = arith.constant 0 : index
      %c0_102 = arith.constant 0 : index
      %c0_103 = arith.constant 0 : index
      %126 = vector.load %arg10[%c0_100, %c0_101, %c0_102, %c0_103] : memref<1x8x8x128xf32, #tpu.memory_space<vmem>>, vector<1x8x8x128xf32>
      tpu.vector_store %arg10[%c0_100, %c0_101, %c0_102, %c0_103], %125 {strides = array<i32>} : memref<1x8x8x128xf32, #tpu.memory_space<vmem>>, vector<1x8x8x128xf32>,
    } else {
    }
    return
  }
  func.func @transform_0(%arg0: i32, %arg1: i32) -> (i32, i32, i32, i32) {
    %c0_i32 = arith.constant 0 : i32
    %c0_i32_0 = arith.constant 0 : i32
    %c0_i32_1 = arith.constant 0 : i32
    %c0_i32_2 = arith.constant 0 : i32
    return %arg1, %c0_i32, %c0_i32_0, %c0_i32_1 : i32, i32, i32, i32
  }
  func.func @transform_1(%arg0: i32, %arg1: i32) -> (i32, i32, i32) {
    %c0_i32 = arith.constant 0 : i32
    %c0_i32_0 = arith.constant 0 : i32
    %c0_i32_1 = arith.constant 0 : i32
    %c0_i32_2 = arith.constant 0 : i32
    return %c0_i32, %c0_i32_0, %c0_i32_1 : i32, i32, i32
  }
  func.func @transform_2(%arg0: i32, %arg1: i32) -> (i32, i32) {
    %c0_i32 = arith.constant 0 : i32
    %c0_i32_0 = arith.constant 0 : i32
    %c0_i32_1 = arith.constant 0 : i32
    return %c0_i32, %c0_i32_0 : i32, i32
  }
  func.func @transform_3(%arg0: i32, %arg1: i32) -> (i32, i32) {
    %c0_i32 = arith.constant 0 : i32
    %c0_i32_0 = arith.constant 0 : i32
    %c0_i32_1 = arith.constant 0 : i32
    return %c0_i32, %c0_i32_0 : i32, i32
  }
  func.func @transform_4(%arg0: i32, %arg1: i32) -> (i32, i32, i32, i32, i32) {
    %c0_i32 = arith.constant 0 : i32
    %c0_i32_0 = arith.constant 0 : i32
    %c0_i32_1 = arith.constant 0 : i32
    %c0_i32_2 = arith.constant 0 : i32
    %c0_i32_3 = arith.constant 0 : i32
    return %arg1, %c0_i32, %c0_i32_0, %c0_i32_1, %c0_i32_2 : i32, i32, i32, i32, i32
  }
  func.func @transform_5(%arg0: i32, %arg1: i32) -> (i32, i32) {
    %c0_i32 = arith.constant 0 : i32
    %c0_i32_0 = arith.constant 0 : i32
    %c0_i32_1 = arith.constant 0 : i32
    return %c0_i32, %c0_i32_0 : i32, i32
  }
  func.func @transform_6(%arg0: i32, %arg1: i32) -> (i32, i32) {
    %c0_i32 = arith.constant 0 : i32
    %c0_i32_0 = arith.constant 0 : i32
    %c0_i32_1 = arith.constant 0 : i32
    return %c0_i32, %c0_i32_0 : i32, i32
  }
  func.func @transform_7(%arg0: i32, %arg1: i32) -> (i32, i32) {
    %c0_i32 = arith.constant 0 : i32
    %c0_i32_0 = arith.constant 0 : i32
    %c0_i32_1 = arith.constant 0 : i32
    return %c0_i32, %c0_i32_0 : i32, i32
  }
  func.func @transform_8(%arg0: i32, %arg1: i32) -> (i32, i32, i32, i32) {
    %c0_i32 = arith.constant 0 : i32
    %c0_i32_0 = arith.constant 0 : i32
    %c0_i32_1 = arith.constant 0 : i32
    %c0_i32_2 = arith.constant 0 : i32
    return %arg1, %c0_i32, %c0_i32_0, %c0_i32_1 : i32, i32, i32, i32
  }
}

</mosaic_0001>

<bundles_post_ra>
// kernel: resblk_forward.2
= control target key start
LH: loop header
LB: loop body
LE: loop exit
PB: predicated region body
PF: predicated region fallthrough
CT: control target
= control target key end

     0   :  { %s3218_s15 = smov 0   ;;  %s3220_s16 = smov 0   ;;  %s3686_s0 = inlined_call_operand.vmem [shape: bf16[2,4,10,10,128], index: 0, kind: input, shape index: {}]   ;;  %s3687_s1 = inlined_call_operand.vmem [shape: bf16[9,128,128], index: 1, kind: input, shape index: {}]   ;;  %s3688_s2 = inlined_call_operand.vmem [shape: f32[1,128], index: 2, kind: input, shape index: {}]   ;;  %s3689_s3 = inlined_call_operand.vmem [shape: f32[1,128], index: 3, kind: input, shape index: {}]   ;;  %s3690_s4 = inlined_call_operand.vmem [shape: bf16[2,8,8,128], index: 4, kind: output, shape index: {}]  }
   0x1   :  { %s3222_s17 = smov 0   ;;  %s3224_s18 = smov 0  }
   0x2   :  { %s3226_s19 = smov 0  }
   0x3 LB: > { %s23_s20 = sadd.s32 1, %s3181_s17  ;;  %s26_s21 = sadd.s32 1, %s3185_s18  ;;  %s3189_s19 = sphi %s3226_s19, %s14_s19   ;;  %s3185_s18 = sphi %s3224_s18, %s3696_s18   ;;  %s3181_s17 = sphi %s3222_s17, %s3695_s17   ;;  %s3177_s16 = sphi %s3220_s16, %s3694_s16   ;;  %s3173_s15 = sphi %s3218_s15, %s3693_s15  }
   0x4   : > { %p24_p0 = scmp.ge.s32.totalorder %s23_s20, 2  ;;  %p2266_p1 = scmp.ge.s32.totalorder %s3189_s19, 1 }
   0x5   : > { %p174_p2 = scmp.lt.s32.totalorder %s3189_s19, 5 }
   0x6   : > { %s3698_s20 = smov (%p24_p0, %s23_s20), 0  ;;  %s3700_s21 = smov (!%p24_p0, %s26_s21), %s3185_s18 }
   0x7   : > { %p175_p3 = pnand %p2266_p1, %p174_p2  ;;  %p28_p4 = scmp.ge.s32.totalorder %s3700_s21, 2 }
   0x8   : > { %p200_p5 = scmp.lt.s32.totalorder (!%p175_p3), %s3173_s15, 1  ;;  %p211_p6 = scmp.eq.s32.totalorder (!%p175_p3), %s3177_s16, 0 }
   0x9   : > { %s3702_s21 = smov (%p28_p4, %s3700_s21), 0  ;;  %178 = sbr.rel (%p175_p3) target bundleno = 475 (0x1db), region = 36 }
   0xa   : > { %p212_p7 = scmp.eq.s32.totalorder (!%p175_p3), %s3173_s15, 0 }
   0xc   : > { %p213_p8 = pnand (!%p175_p3), %p212_p7, %p211_p6 }
  0x10   : > { %s3704_s15 = smov (!%p200_p5, %s3173_s15), 1  ;;  %216 = sbr.rel (%p213_p8) target bundleno = 23 (0x17), region = 40 }
  0x11   : > { %s3010_s22 = smul.u32 320, %s3704_s15  ;;  %s2582_s23 = sshll.u32 %s3704_s15, 5  ;;  %v3191_v0 = vmov (!%p213_p8), 0.0  }
  0x12   : > { %s3254_s26 = scalar_lea.vmem %s3690_s4, %s2582_s23  ;;  %217 = vst [vmem:[#allocation2] sm:$0x3] (!%p213_p8), %v3191_v0 }
  0x13   : > { %s3259_s29 = scalar_lea.vmem %s3686_s0, %s3010_s22 }
  0x17 PF: > { %v3053_v1 = vld [vmem:[%s3687_s1 + $0x40] sm:$0xff]   ;;  %v3055_v3 = vld [vmem:[%s3687_s1 + $0x48] sm:$0xff]   ;;  %v3057_v5 = vld [vmem:[%s3687_s1 + $0x50] sm:$0xff]   ;;  %vm558_vm0 = vsmask.f32 3328  ;;  %p2578_p9 = scmp.ne.s32.totalorder %s3177_s16, 0 }
  0x18   : > { %v3054_v2 = vld [vmem:[%s3687_s1 + $0x100] sm:$0xff]   ;;  %2714 = vmatprep.subr.bf16.mxu1 %v3053_v1  ;;  %v3056_v4 = vld [vmem:[%s3687_s1 + $0x108] sm:$0xff]   ;;  %v3058_v6 = vld [vmem:[%s3687_s1 + $0x110] sm:$0xff]   ;;  %vm559_vm1 = vsmask.f32 7440 }
  0x19   : > { %2810 = vmatprep.subr.bf16.mxu0 %v3054_v2  ;;  %2715 = vmatpush3.bf16.msra.mxu1 %v3053_v1  ;;  %v3059_v7 = vld [vmem:[%s3687_s1 + $0x58] sm:$0xff]   ;;  %v3061_v9 = vld [vmem:[%s3687_s1 + $0x60] sm:$0xff]   ;;  %v3063_v11 = vld [vmem:[%s3687_s1 + $0x68] sm:$0xff]  }
  0x1a   : > { %2811 = vmatpush3.bf16.msra.mxu0 %v3054_v2  ;;  %2716 = vmatprep.subr.bf16.mxu1 %v3055_v3  ;;  %v3060_v8 = vld [vmem:[%s3687_s1 + $0x118] sm:$0xff]   ;;  %v3062_v10 = vld [vmem:[%s3687_s1 + $0x120] sm:$0xff]   ;;  %v3064_v13 = vld [vmem:[%s3687_s1 + $0x128] sm:$0xff]  }
  0x1b   : > { %2812 = vmatprep.subr.bf16.mxu0 %v3056_v4  ;;  %v3069_v12 = vld [vmem:[%s3259_s29 + $0x50] ss:$8 sps:$4 sm:$0xff]   ;;  %v3070_v19 = vld [vmem:[%s3687_s1] sm:$0xff]   ;;  %v3075_v23 = vld [vmem:[%s3687_s1 + $0x8] sm:$0xff]  }
  0x1c   : > { %2730 = vmatprep.mubr.bf16.mxu1 %v3069_v12  ;;  %v3071_v14 = vld [vmem:[%s3259_s29 + $0xf0] ss:$8 sps:$4 sm:$0xff]   ;;  %v3072_v20 = vld [vmem:[%s3687_s1 + $0x140] sm:$0xff]   ;;  %v3076_v24 = vld [vmem:[%s3687_s1 + $0x148] sm:$0xff]  }
  0x1d   : > { %2717 = vmatpush3.bf16.msra.mxu1 %v3055_v3  ;;  %v3065_v15 = vld [vmem:[%s3687_s1 + $0x70] sm:$0xff]   ;;  %2826 = vmatprep.mubr.bf16.mxu0 %v3071_v14  ;;  %v3067_v17 = vld [vmem:[%s3687_s1 + $0x78] sm:$0xff]   ;;  %v3073_v21 = vld [vmem:[%s3259_s29 + $0x60] ss:$8 sps:$4 sm:$0xff]  }
  0x1e   : > { %2813 = vmatpush3.bf16.msra.mxu0 %v3056_v4  ;;  %2718 = vmatprep.subr.bf16.mxu1 %v3057_v5  ;;  %v3066_v16 = vld [vmem:[%s3687_s1 + $0x130] sm:$0xff]   ;;  %v3068_v18 = vld [vmem:[%s3687_s1 + $0x138] sm:$0xff]   ;;  %v3074_v22 = vld [vmem:[%s3259_s29 + $0x100] ss:$8 sps:$4 sm:$0xff]  }
  0x1f   : > { %2814 = vmatprep.subr.bf16.mxu0 %v3058_v6  ;;  %v3085_v25 = vld [vmem:[%s3259_s29 + $0x70] ss:$8 sps:$4 sm:$0xff]   ;;  %v3089_v30 = vld [vmem:[%s3259_s29 + $0x80] ss:$8 sps:$4 sm:$0xff]   ;;  %v2419_v35 = vld [vmem:[%s3259_s29 + $0xa4] sm:$0x1] }
  0x20   : > { %v3087_v26 = vld [vmem:[%s3259_s29 + $0x110] ss:$8 sps:$4 sm:$0xff]   ;;  %v3090_v31 = vld [vmem:[%s3259_s29 + $0x120] ss:$8 sps:$4 sm:$0xff]   ;;  %v2421_v40 = vld [vmem:[%s3259_s29 + $0xac] sm:$0x1] }
  0x21   : > { %2719 = vmatpush3.bf16.msra.mxu1 %v3057_v5  ;;  %v3077_v27 = vld [vmem:[%s3687_s1 + $0x10] sm:$0xff]   ;;  %v3079_v29 = vld [vmem:[%s3687_s1 + $0x18] sm:$0xff]   ;;  %v3093_v33 = vld [vmem:[%s3259_s29] ss:$8 sps:$4 sm:$0xff]   ;;  %v1195_v41 = vshll.u32 %v2419_v35, 16  ;;  %v1209_v47 = vshll.u32 %v2421_v40, 16 }
  0x22   : > { %2815 = vmatpush3.bf16.msra.mxu0 %v3058_v6  ;;  %2720 = vmatprep.subr.bf16.mxu1 %v3059_v7  ;;  %v3078_v28 = vld [vmem:[%s3687_s1 + $0x150] sm:$0xff]   ;;  %v3080_v32 = vld [vmem:[%s3687_s1 + $0x158] sm:$0xff]   ;;  %v2418_v34 = vld [vmem:[%s3259_s29 + $0xa0] sm:$0xf] }
  0x23   : > { %2816 = vmatprep.subr.bf16.mxu0 %v3060_v8  ;;  %v2420_v36 = vld [vmem:[%s3259_s29 + $0xa8] sm:$0xf]  ;;  %v1186_v37 = vshrl.u32 %v2418_v34, 16  ;;  %v1189_v38 = vshll.u32 %v2418_v34, 16  ;;  %v3081_v39 = vld [vmem:[%s3687_s1 + $0x20] sm:$0xff]   ;;  %v1197_v53 = vrot.slane %v1195_v41, 5  ;;  %vm3360_vm2 = vmor %vm558_vm0, %vm559_vm1 }
  0x24   : > { %v1200_v42 = vshrl.u32 %v2420_v36, 16  ;;  %v1203_v43 = vshll.u32 %v2420_v36, 16  ;;  %v3082_v44 = vld [vmem:[%s3687_s1 + $0x160] sm:$0xff]   ;;  %v3083_v48 = vld [vmem:[%s3687_s1 + $0x28] sm:$0xff]   ;;  %v1211_v56 = vrot.slane %v1209_v47, 5  ;;  %v3086_v3 = vld [vmem:[%s3687_s1 + $0x30] sm:$0xff]  }
  0x25   : > { %2721 = vmatpush3.bf16.msra.mxu1 %v3059_v7  ;;  %v1188_v45 = vrot.slane %v1186_v37, 4  ;;  %v1191_v46 = vrot.slane %v1189_v38, 5  ;;  %v3084_v51 = vld [vmem:[%s3687_s1 + $0x168] sm:$0xff]   ;;  %v2422_v57 = vld [vmem:[%s3259_s29 + $0xb0] sm:$0xf] }
  0x26   : > { %2817 = vmatpush3.bf16.msra.mxu0 %v3060_v8  ;;  %2722 = vmatprep.subr.bf16.mxu1 %v3061_v9  ;;  %v1202_v49 = vrot.slane %v1200_v42, 4  ;;  %v1205_v50 = vrot.slane %v1203_v43, 5  ;;  %v2423_v58 = vld [vmem:[%s3259_s29 + $0xb4] sm:$0x1]  ;;  %v2424_v60 = vld [vmem:[%s3259_s29 + $0xb8] sm:$0xf] }
  0x27   : > { %2818 = vmatprep.subr.bf16.mxu0 %v3062_v10  ;;  %v1192_v52 = vor.u32 %v1191_v46, %v1188_v45  ;;  %v2425_v61 = vld [vmem:[%s3259_s29 + $0xbc] sm:$0x1]  ;;  %v1214_v62 = vshrl.u32 %v2422_v57, 16  ;;  %v1217_v0 = vshll.u32 %v2422_v57, 16  ;;  %v1223_v1 = vshll.u32 %v2423_v58, 16  ;;  %v3088_v7 = vld [vmem:[%s3687_s1 + $0x170] sm:$0xff]  }
  0x28   : > { %v1206_v55 = vor.u32 %v1205_v50, %v1202_v49  ;;  %v1228_v2 = vshrl.u32 %v2424_v60, 16  ;;  %v1231_v6 = vshll.u32 %v2424_v60, 16  ;;  %v3107_v38 = vld [vmem:[%s3259_s29 + $0x20] ss:$8 sps:$4 sm:$0xff]   ;;  %v3110_v49 = vld [vmem:[%s3259_s29 + $0x30] ss:$8 sps:$4 sm:$0xff]  }
  0x29   : > { %2723 = vmatpush3.bf16.msra.mxu1 %v3061_v9  ;;  %v1193_v59 = vrot.slane %v1192_v52, 4  ;;  %v1216_v5 = vrot.slane %v1214_v62, 4  ;;  %v1219_v9 = vrot.slane %v1217_v0, 5  ;;  %v2430_v50 = vld [vmem:[%s3259_s29 + $0xd0] sm:$0xf]  ;;  %v3101_v60 = vld [vmem:[%s3687_s1 + $0x98] sm:$0xff]  }
  0x2a   : > { %2819 = vmatpush3.bf16.msra.mxu0 %v3062_v10  ;;  %2724 = vmatprep.subr.bf16.mxu1 %v3063_v11  ;;  %v1207_v63 = vrot.slane %v1206_v55, 4  ;;  %v1230_v10 = vrot.slane %v1228_v2, 4  ;;  %v1233_v14 = vrot.slane %v1231_v6, 5  ;;  %v2432_v52 = vld [vmem:[%s3259_s29 + $0xd8] sm:$0xf]  ;;  %v1270_v57 = vshrl.u32 %v2430_v50, 16 }
  0x2b   : > { %2820 = vmatprep.subr.bf16.mxu0 %v3064_v13  ;;  %v1198_v4 = vsel %vm3360_vm2, %v1193_v59, %v1197_v53  ;;  %v3100_v53 = vld [vmem:[%s3687_s1 + $0x190] sm:$0xff]   ;;  %v1273_v58 = vshll.u32 %v2430_v50, 16  ;;  %v1284_v62 = vshrl.u32 %v2432_v52, 16 }
  0x2c   : > { %v1212_v8 = vsel %vm3360_vm2, %v1207_v63, %v1211_v56  ;;  %v2433_v56 = vld [vmem:[%s3259_s29 + $0xdc] sm:$0x1]  ;;  %v1287_v63 = vshll.u32 %v2432_v52, 16  ;;  %v1272_v2 = vrot.slane %v1270_v57, 4 }
  0x2d   : > { %2725 = vmatpush3.bf16.msra.mxu1 %v3063_v11  ;;  %v1237_v11 = vshll.u32 %v2425_v61, 16  ;;  %v2450_v12 = vcombine.low %v1198_v4, %v1212_v8  ;;  %v1293_v0 = vshll.u32 %v2433_v56, 16 }
  0x2e   : > { %2821 = vmatpush3.bf16.msra.mxu0 %v3064_v13  ;;  %2726 = vmatprep.subr.bf16.mxu1 %v3065_v15  ;;  %v1225_v13 = vrot.slane %v1223_v1, 5  ;;  %v1289_v8 = vrot.slane %v1287_v63, 5 }
  0x2f   : > { %2822 = vmatprep.subr.bf16.mxu0 %v3066_v16 }
  0x31   : > { %2727 = vmatpush3.bf16.msra.mxu1 %v3065_v15  ;;  %v3091_v15 = vld [vmem:[%s3687_s1 + $0x38] sm:$0xff]  }
  0x32   : > { %2823 = vmatpush3.bf16.msra.mxu0 %v3066_v16  ;;  %2728 = vmatprep.subr.bf16.mxu1 %v3067_v17  ;;  %v1220_v16 = vor.u32 %v1219_v9, %v1216_v5  ;;  %v3102_v5 = vld [vmem:[%s3687_s1 + $0x198] sm:$0xff]   ;;  %v1295_v9 = vrot.slane %v1293_v0, 5 }
  0x33   : > { %2824 = vmatprep.subr.bf16.mxu0 %v3068_v18 }
  0x35   : > { %2729 = vmatpush3.bf16.msra.mxu1 %v3067_v17  ;;  %v1234_v17 = vor.u32 %v1233_v14, %v1230_v10  ;;  %v3103_v14 = vld [vmem:[%s3687_s1 + $0xa0] sm:$0xff]  }
  0x36   : > { %2825 = vmatpush3.bf16.msra.mxu0 %v3068_v18  ;;  %2738 = vmatprep.subr.bf16.mxu1 %v3070_v19  ;;  %v1221_v18 = vrot.slane %v1220_v16, 4 }
  0x37   : > { %2834 = vmatprep.subr.bf16.mxu0 %v3072_v20 }
  0x38   : > { %2731 = vmatmul.mubr.bf16.vlgmr.msra.gmra.mrb[0].mxu1 %v3073_v21  ;;  %v1235_v21 = vrot.slane %v1234_v17, 4  ;;  %v544_v17 = vld [vmem:[%s3259_s29 + $0x8] sm:$0xf] }
  0x39   : > { %2739 = vmatpush3.bf16.msra.mxu1 %v3070_v19  ;;  %2827 = vmatmul.mubr.bf16.vlgmr.msra.gmra.mrb[0].mxu0 %v3074_v22  ;;  %v1239_v19 = vrot.slane %v1237_v11, 5  ;;  %v3094_v22 = vld [vmem:[%s3687_s1 + $0x80] sm:$0xff]  }
  0x3a   : > { %2835 = vmatpush3.bf16.msra.mxu0 %v3072_v20  ;;  %2740 = vmatprep.subr.bf16.mxu1 %v3075_v23  ;;  %v3092_v20 = vld [vmem:[%s3687_s1 + $0x178] sm:$0xff]  }
  0x3b   : > { %2836 = vmatprep.subr.bf16.mxu0 %v3076_v24  ;;  %2734 = vmatprep.mubr.bf16.mxu1 %v3085_v25  ;;  %v3095_v25 = vld [vmem:[%s3687_s1 + $0x180] sm:$0xff]  }
  0x3c   : > { %2830 = vmatprep.mubr.bf16.mxu0 %v3087_v26  ;;  %v3096_v26 = vld [vmem:[%s3259_s29 + $0x10] ss:$8 sps:$4 sm:$0xff]  }
  0x3d   : > { %2741 = vmatpush3.bf16.msra.mxu1 %v3075_v23  ;;  %v1226_v23 = vsel %vm3360_vm2, %v1221_v18, %v1225_v13  ;;  %v543_v13 = vld [vmem:[%s3259_s29 + $0x4] sm:$0x1]  ;;  %v545_v18 = vld [vmem:[%s3259_s29 + $0xc] sm:$0x1] }
  0x3e   : > { %2837 = vmatpush3.bf16.msra.mxu0 %v3076_v24  ;;  %2742 = vmatprep.subr.bf16.mxu1 %v3077_v27  ;;  %v1240_v24 = vsel %vm3360_vm2, %v1235_v21, %v1239_v19 }
  0x3f   : > { %2838 = vmatprep.subr.bf16.mxu0 %v3078_v28 }
  0x40   : > { %2735 = vmatmul.mubr.bf16.gmra.mrb[4].mxu1 %v3089_v30  ;;  %v3098_v30 = vld [vmem:[%s3687_s1 + $0x188] sm:$0xff]  }
  0x41   : > { %2743 = vmatpush3.bf16.msra.mxu1 %v3077_v27  ;;  %2831 = vmatmul.mubr.bf16.gmra.mrb[4].mxu0 %v3090_v31  ;;  %v3097_v27 = vld [vmem:[%s3687_s1 + $0x88] sm:$0xff]   ;;  %v2427_v31 = vld [vmem:[%s3259_s29 + $0xc4] sm:$0x1] }
  0x42   : > { %2839 = vmatpush3.bf16.msra.mxu0 %v3078_v28  ;;  %2744 = vmatprep.subr.bf16.mxu1 %v3079_v29  ;;  %v2426_v28 = vld [vmem:[%s3259_s29 + $0xc0] sm:$0xf]  ;;  %v1251_v36 = vshll.u32 %v2427_v31, 16 }
  0x43   : > { %2840 = vmatprep.subr.bf16.mxu0 %v3080_v32  ;;  %2754 = vmatprep.mubr.bf16.mxu1 %v3093_v33  ;;  %v2429_v33 = vld [vmem:[%s3259_s29 + $0xcc] sm:$0x1]  ;;  %v1242_v34 = vshrl.u32 %v2426_v28, 16  ;;  %v1245_v35 = vshll.u32 %v2426_v28, 16  ;;  %v585_v28 = vshll.u32 %v545_v18, 16 }
  0x44   : > { %2850 = vmatprep.mubr.bf16.mxu0 %v2450_v12  ;;  %v1265_v40 = vshll.u32 %v2429_v33, 16  ;;  %v1253_v45 = vrot.slane %v1251_v36, 5  ;;  %v542_v12 = vld [vmem:[%s3259_s29] sm:$0xf]  ;;  %v3105_v33 = vld [vmem:[%s3687_s1 + $0xa8] sm:$0xff]  }
  0x45   : > { %2745 = vmatpush3.bf16.msra.mxu1 %v3079_v29  ;;  %v2451_v29 = vcombine.low %v1226_v23, %v1240_v24  ;;  %v1244_v41 = vrot.slane %v1242_v34, 4  ;;  %v1247_v42 = vrot.slane %v1245_v35, 5  ;;  %v562_v19 = vshrl.u32 %v542_v12, 16  ;;  %v553_v18 = vld [vmem:[%s3259_s29 + $0x2c] sm:$0x1] }
  0x46   : > { %2841 = vmatpush3.bf16.msra.mxu0 %v3080_v32  ;;  %2746 = vmatprep.subr.bf16.mxu1 %v3081_v39  ;;  %v2428_v32 = vld [vmem:[%s3259_s29 + $0xc8] sm:$0xf]  ;;  %v1267_v47 = vrot.slane %v1265_v40, 5  ;;  %v576_v23 = vshrl.u32 %v544_v17, 16  ;;  %v579_v24 = vshll.u32 %v544_v17, 16 }
  0x47   : > { %2842 = vmatprep.subr.bf16.mxu0 %v3082_v44  ;;  %v1256_v37 = vshrl.u32 %v2428_v32, 16  ;;  %v552_v17 = vld [vmem:[%s3259_s29 + $0x28] sm:$0xf] }
  0x48   : > { %v578_v31 = vrot.slane %v576_v23, 4  ;;  %v632_v23 = vshrl.u32 %v552_v17, 16 }
  0x49   : > { %2747 = vmatpush3.bf16.msra.mxu1 %v3081_v39  ;;  %v1259_v39 = vshll.u32 %v2428_v32, 16  ;;  %v1258_v43 = vrot.slane %v1256_v37, 4  ;;  %v581_v32 = vrot.slane %v579_v24, 5  ;;  %v587_v37 = vrot.slane %v585_v28, 5 }
  0x4a   : > { %2843 = vmatpush3.bf16.msra.mxu0 %v3082_v44  ;;  %2748 = vmatprep.subr.bf16.mxu1 %v3083_v48  ;;  %v3099_v44 = vld [vmem:[%s3687_s1 + $0x90] sm:$0xff]   ;;  %v635_v24 = vshll.u32 %v552_v17, 16  ;;  %v2535_v17 = vld [vmem:[%s3259_s29 + $0xc] sm:$0x1] }
  0x4b   : > { %2844 = vmatprep.subr.bf16.mxu0 %v3084_v51  ;;  %v1261_v46 = vrot.slane %v1259_v39, 5  ;;  %v3106_v39 = vld [vmem:[%s3687_s1 + $0x1a8] sm:$0xff]  }
  0x4d   : > { %2749 = vmatpush3.bf16.msra.mxu1 %v3083_v48  ;;  %v1248_v48 = vor.u32 %v1247_v42, %v1244_v41  ;;  %v1262_v55 = vor.u32 %v1261_v46, %v1258_v43  ;;  %v582_v41 = vor.u32 %v581_v32, %v578_v31  ;;  %v546_v42 = vld [vmem:[%s3259_s29 + $0x10] sm:$0xf]  ;;  %v637_v32 = vrot.slane %v635_v24, 5 }
  0x4e   : > { %2845 = vmatpush3.bf16.msra.mxu0 %v3084_v51  ;;  %2750 = vmatprep.subr.bf16.mxu1 %v3086_v3  ;;  %v2431_v51 = vld [vmem:[%s3259_s29 + $0xd4] sm:$0x1]  ;;  %v590_v46 = vshrl.u32 %v546_v42, 16  ;;  %v554_v31 = vld [vmem:[%s3259_s29 + $0x30] sm:$0xf] }
  0x4f   : > { %2846 = vmatprep.subr.bf16.mxu0 %v3088_v7  ;;  %v1279_v59 = vshll.u32 %v2431_v51, 16  ;;  %v1249_v61 = vrot.slane %v1248_v48, 4  ;;  %v1263_v1 = vrot.slane %v1262_v55, 4  ;;  %v549_v48 = vld [vmem:[%s3259_s29 + $0x1c] sm:$0x1] }
  0x51   : > { %2751 = vmatpush3.bf16.msra.mxu1 %v3086_v3  ;;  %v1275_v3 = vrot.slane %v1273_v58, 5  ;;  %v1281_v4 = vrot.slane %v1279_v59, 5  ;;  %v1254_v6 = vsel %vm3360_vm2, %v1249_v61, %v1253_v45  ;;  %v1268_v10 = vsel %vm3360_vm2, %v1263_v1, %v1267_v47  ;;  %v548_v45 = vld [vmem:[%s3259_s29 + $0x18] sm:$0xf]  ;;  %v3109_v61 = vld [vmem:[%s3687_s1 + $0x1b0] sm:$0xff]  }
  0x52   : > { %2847 = vmatpush3.bf16.msra.mxu0 %v3088_v7  ;;  %2752 = vmatprep.subr.bf16.mxu1 %v3091_v15  ;;  %v1286_v7 = vrot.slane %v1284_v62, 4  ;;  %v583_v47 = vrot.slane %v582_v41, 4  ;;  %v604_v51 = vshrl.u32 %v548_v45, 16  ;;  %v607_v55 = vshll.u32 %v548_v45, 16 }
  0x53   : > { %2848 = vmatprep.subr.bf16.mxu0 %v3092_v20  ;;  %v1276_v11 = vor.u32 %v1275_v3, %v1272_v2  ;;  %v613_v59 = vshll.u32 %v549_v48, 16 }
  0x54   : > { %v1290_v16 = vor.u32 %v1289_v8, %v1286_v7  ;;  %v588_v56 = vsel %vm3360_vm2, %v583_v47, %v587_v37  ;;  %v606_v58 = vrot.slane %v604_v51, 4  ;;  %v609_v0 = vrot.slane %v607_v55, 5  ;;  %v3112_v7 = vld [vmem:[%s3687_s1 + $0x1b8] sm:$0xff]   ;;  %v3113_v8 = vld [vmem:[%s3687_s1 + $0xc0] sm:$0xff]  }
  0x55   : > { %2753 = vmatpush3.bf16.msra.mxu1 %v3091_v15  ;;  %v2452_v15 = vcombine.low %v1254_v6, %v1268_v10  ;;  %v1277_v21 = vrot.slane %v1276_v11, 4  ;;  %v3115_v11 = vld [vmem:[%s3687_s1 + $0x1c0] sm:$0xff]   ;;  %v3121_v51 = vld [vmem:[%s3687_s1 + $0xd8] sm:$0xff]  }
  0x56   : > { %2849 = vmatpush3.bf16.msra.mxu0 %v3092_v20  ;;  %2762 = vmatprep.subr.bf16.mxu1 %v3094_v22  ;;  %v565_v20 = vshll.u32 %v542_v12, 16  ;;  %v610_v2 = vor.u32 %v609_v0, %v606_v58  ;;  %v3116_v12 = vld [vmem:[%s3259_s29 + $0x18] ss:$8 sps:$4 sm:$0xff]  }
  0x57   : > { %2858 = vmatprep.subr.bf16.mxu0 %v3095_v25 }
  0x58   : > { %2755 = vmatmul.mubr.bf16.vlgmr.msra.gmra.mrb[0].mxu1 %v3096_v26  ;;  %v564_v26 = vrot.slane %v562_v19, 4  ;;  %v611_v6 = vrot.slane %v610_v2, 4  ;;  %v3118_v19 = vld [vmem:[%s3687_s1 + $0x1c8] sm:$0xff]   ;;  %v3123_v2 = vld [vmem:[%s3687_s1 + $0xe0] sm:$0xff]  }
  0x59   : > { %2763 = vmatpush3.bf16.msra.mxu1 %v3094_v22  ;;  %2851 = vmatmul.mubr.bf16.vlgmr.msra.gmra.mrb[0].mxu0 %v2451_v29  ;;  %v571_v22 = vshll.u32 %v543_v13, 16  ;;  %v3104_v29 = vld [vmem:[%s3687_s1 + $0x1a0] sm:$0xff]  }
  0x5a   : > { %2859 = vmatpush3.bf16.msra.mxu0 %v3095_v25  ;;  %2764 = vmatprep.subr.bf16.mxu1 %v3097_v27  ;;  %v1291_v25 = vrot.slane %v1290_v16, 4  ;;  %v550_v13 = vld [vmem:[%s3259_s29 + $0x20] sm:$0xf]  ;;  %v551_v16 = vld [vmem:[%s3259_s29 + $0x24] sm:$0x1] }
  0x5b   : > { %2860 = vmatprep.subr.bf16.mxu0 %v3098_v30  ;;  %2758 = vmatprep.mubr.bf16.mxu1 %v3107_v38  ;;  %v573_v36 = vrot.slane %v571_v22, 5  ;;  %v3114_v38 = vld [vmem:[%s3259_s29 + $0x8] ss:$8 sps:$4 sm:$0xff]   ;;  %v627_v22 = vshll.u32 %v551_v16, 16 }
  0x5c   : > { %2854 = vmatprep.mubr.bf16.mxu0 %v2452_v15  ;;  %v1296_v34 = vsel %vm3360_vm2, %v1291_v25, %v1295_v9  ;;  %v3117_v15 = vld [vmem:[%s3687_s1 + $0xc8] sm:$0xff]   ;;  %v641_v25 = vshll.u32 %v553_v18, 16  ;;  %v2536_v18 = vld [vmem:[%s3259_s29 + $0x10] sm:$0xf] }
  0x5d   : > { %2765 = vmatpush3.bf16.msra.mxu1 %v3097_v27  ;;  %v567_v27 = vrot.slane %v565_v20, 5  ;;  %v618_v20 = vshrl.u32 %v550_v13, 16  ;;  %v2534_v16 = vld [vmem:[%s3259_s29 + $0x8] sm:$0xf]  ;;  %v1827_v24 = vshll.u32 %v2536_v18, 16 }
  0x5e   : > { %2861 = vmatpush3.bf16.msra.mxu0 %v3098_v30  ;;  %2766 = vmatprep.subr.bf16.mxu1 %v3099_v44  ;;  %v1282_v30 = vsel %vm3360_vm2, %v1277_v21, %v1281_v4  ;;  %v615_v4 = vrot.slane %v613_v59, 5  ;;  %v621_v21 = vshll.u32 %v550_v13, 16  ;;  %v3129_v59 = vld [vmem:[%s3259_s29 + $0x38] ss:$8 sps:$4 sm:$0xff]  }
  0x5f   : > { %2862 = vmatprep.subr.bf16.mxu0 %v3100_v53  ;;  %v568_v35 = vor.u32 %v567_v27, %v564_v26  ;;  %v2453_v40 = vcombine.low %v1282_v30, %v1296_v34  ;;  %v3127_v26 = vld [vmem:[%s3259_s29 + $0x28] ss:$8 sps:$4 sm:$0xff]   ;;  %v620_v27 = vrot.slane %v618_v20, 4  ;;  %v634_v30 = vrot.slane %v632_v23, 4  ;;  %v555_v34 = vld [vmem:[%s3259_s29 + $0x34] sm:$0x1] }
  0x60   : > { %2759 = vmatmul.mubr.bf16.gmra.mrb[4].mxu1 %v3110_v49  ;;  %v593_v49 = vshll.u32 %v546_v42, 16  ;;  %v616_v10 = vsel %vm3360_vm2, %v611_v6, %v615_v4  ;;  %v623_v28 = vrot.slane %v621_v21, 5  ;;  %v655_v41 = vshll.u32 %v555_v34, 16  ;;  %v3120_v42 = vld [vmem:[%s3687_s1 + $0x1d0] sm:$0xff]   ;;  %v3124_v6 = vld [vmem:[%s3687_s1 + $0x1e0] sm:$0xff]   ;;  %v3131_v13 = vld [vmem:[%s3687_s1 + $0xf8] sm:$0xff]  }
  0x61   : > { %2767 = vmatpush3.bf16.msra.mxu1 %v3099_v44  ;;  %v569_v43 = vrot.slane %v568_v35, 4  ;;  %v547_v44 = vld [vmem:[%s3259_s29 + $0x14] sm:$0x1]  ;;  %2855 = vmatmul.mubr.bf16.gmra.mrb[4].mxu0 %v2453_v40  ;;  %v556_v35 = vld [vmem:[%s3259_s29 + $0x38] sm:$0xf]  ;;  %v649_v40 = vshll.u32 %v554_v31, 16 }
  0x62   : > { %2863 = vmatpush3.bf16.msra.mxu0 %v3100_v53  ;;  %2768 = vmatprep.subr.bf16.mxu1 %v3101_v60  ;;  %v599_v50 = vshll.u32 %v547_v44, 16  ;;  %v592_v53 = vrot.slane %v590_v46, 4  ;;  %v595_v57 = vrot.slane %v593_v49, 5  ;;  %v624_v37 = vor.u32 %v623_v28, %v620_v27  ;;  %v2545_v34 = vld [vmem:[%s3259_s29 + $0x34] sm:$0x1] }
  0x63   : > { %2864 = vmatprep.subr.bf16.mxu0 %v3102_v5  ;;  %v574_v52 = vsel %vm3360_vm2, %v569_v43, %v573_v36  ;;  %2874 = vmatprep.mubr.bf16.mxu0 %v3114_v38  ;;  %v3119_v36 = vld [vmem:[%s3687_s1 + $0xd0] sm:$0xff]   ;;  %v557_v38 = vld [vmem:[%s3259_s29 + $0x3c] sm:$0x1]  ;;  %v638_v43 = vor.u32 %v637_v32, %v634_v30  ;;  %v660_v44 = vshrl.u32 %v556_v35, 16  ;;  %v663_v45 = vshll.u32 %v556_v35, 16 }
  0x64   : > { %v2334_v62 = vcombine.low %v574_v52, %v588_v56  ;;  %v601_v63 = vrot.slane %v599_v50, 5  ;;  %v596_v1 = vor.u32 %v595_v57, %v592_v53  ;;  %v669_v46 = vshll.u32 %v557_v38, 16  ;;  %v2544_v30 = vld [vmem:[%s3259_s29 + $0x30] sm:$0xf] }
  0x65   : > { %2769 = vmatpush3.bf16.msra.mxu1 %v3101_v60  ;;  %v3108_v60 = vld [vmem:[%s3687_s1 + $0xb0] sm:$0xff]   ;;  %v625_v47 = vrot.slane %v624_v37, 4  ;;  %v651_v49 = vrot.slane %v649_v40, 5  ;;  %v657_v50 = vrot.slane %v655_v41, 5  ;;  %v639_v52 = vrot.slane %v638_v43, 4  ;;  %v3138_v40 = vld [vmem:[%s3687_s1 + $0x208] sm:$0xff]  }
  0x66   : > { %2865 = vmatpush3.bf16.msra.mxu0 %v3102_v5  ;;  %2770 = vmatprep.subr.bf16.mxu1 %v3103_v14  ;;  %v597_v3 = vrot.slane %v596_v1, 4  ;;  %v3111_v5 = vld [vmem:[%s3687_s1 + $0xb8] sm:$0xff]   ;;  %v662_v53 = vrot.slane %v660_v44, 4  ;;  %v665_v55 = vrot.slane %v663_v45, 5  ;;  %v671_v56 = vrot.slane %v669_v46, 5 }
  0x67   : > { %2866 = vmatprep.subr.bf16.mxu0 %v3104_v29  ;;  %2778 = vmatprep.mubr.bf16.mxu1 %v2334_v62  ;;  %v3122_v62 = vld [vmem:[%s3687_s1 + $0x1d8] sm:$0xff]   ;;  %v1810_v20 = vshrl.u32 %v2534_v16, 16  ;;  %v1813_v21 = vshll.u32 %v2534_v16, 16  ;;  %v1824_v23 = vshrl.u32 %v2536_v18, 16  ;;  %v3136_v35 = vld [vmem:[%s3259_s29 + $0x68] ss:$8 sps:$4 sm:$0xff]  }
  0x68   : > { %v602_v9 = vsel %vm3360_vm2, %v597_v3, %v601_v63  ;;  %v1883_v43 = vshll.u32 %v2544_v30, 16  ;;  %v1889_v44 = vshll.u32 %v2545_v34, 16  ;;  %v3139_v45 = vld [vmem:[%s3259_s29 + $0xc0] ss:$8 sps:$4 sm:$0xff]  }
  0x69   : > { %2771 = vmatpush3.bf16.msra.mxu1 %v3103_v14  ;;  %v2335_v14 = vcombine.low %v602_v9, %v616_v10  ;;  %v3125_v9 = vld [vmem:[%s3687_s1 + $0xe8] sm:$0xff]   ;;  %v1812_v27 = vrot.slane %v1810_v20, 4  ;;  %v1815_v28 = vrot.slane %v1813_v21, 5  ;;  %v1826_v32 = vrot.slane %v1824_v23, 4  ;;  %v3145_v16 = vld [vmem:[%s3687_s1 + $0x220] sm:$0xff]  }
  0x6a   : > { %2867 = vmatpush3.bf16.msra.mxu0 %v3104_v29  ;;  %2772 = vmatprep.subr.bf16.mxu1 %v3105_v33  ;;  %v629_v29 = vrot.slane %v627_v22, 5  ;;  %v3126_v10 = vld [vmem:[%s3687_s1 + $0x1e8] sm:$0xff]   ;;  %v1819_v22 = vshll.u32 %v2535_v17, 16 }
  0x6b   : > { %2868 = vmatprep.subr.bf16.mxu0 %v3106_v39  ;;  %v3146_v21 = vld [vmem:[%s3687_s1 + $0x228] sm:$0xff]  }
  0x6c   : > { %v630_v57 = vsel %vm3360_vm2, %v625_v47, %v629_v29  ;;  %v2543_v29 = vld [vmem:[%s3259_s29 + $0x2c] sm:$0x1]  ;;  %v1821_v46 = vrot.slane %v1819_v22, 5  ;;  %v2547_v22 = vld [vmem:[%s3259_s29 + $0x3c] sm:$0x1] }
  0x6d   : > { %2773 = vmatpush3.bf16.msra.mxu1 %v3105_v33  ;;  %v643_v33 = vrot.slane %v641_v25, 5 }
  0x6e   : > { %2869 = vmatpush3.bf16.msra.mxu0 %v3106_v39  ;;  %2774 = vmatprep.subr.bf16.mxu1 %v3108_v60  ;;  %v646_v39 = vshrl.u32 %v554_v31, 16  ;;  %v3135_v31 = vld [vmem:[%s3259_s29 + $0xb0] ss:$8 sps:$4 sm:$0xff]  }
  0x6f   : > { %2870 = vmatprep.subr.bf16.mxu0 %v3109_v61 }
  0x70   : > { %v648_v48 = vrot.slane %v646_v39, 4  ;;  %v1875_v39 = vshll.u32 %v2543_v29, 16 }
  0x71   : > { %2775 = vmatpush3.bf16.msra.mxu1 %v3108_v60  ;;  %v644_v60 = vsel %vm3360_vm2, %v639_v52, %v643_v33  ;;  %v1829_v33 = vrot.slane %v1827_v24, 5 }
  0x72   : > { %2871 = vmatpush3.bf16.msra.mxu0 %v3109_v61  ;;  %2776 = vmatprep.subr.bf16.mxu1 %v3111_v5  ;;  %v652_v58 = vor.u32 %v651_v49, %v648_v48  ;;  %v666_v61 = vor.u32 %v665_v55, %v662_v53  ;;  %v2336_v63 = vcombine.low %v630_v57, %v644_v60  ;;  %v1885_v55 = vrot.slane %v1883_v43, 5 }
  0x73   : > { %2872 = vmatprep.subr.bf16.mxu0 %v3112_v7  ;;  %v1830_v41 = vor.u32 %v1829_v33, %v1826_v32  ;;  %v1877_v57 = vrot.slane %v1875_v39, 5  ;;  %v1891_v60 = vrot.slane %v1889_v44, 5  ;;  %v2539_v32 = vld [vmem:[%s3259_s29 + $0x1c] sm:$0x1]  ;;  %v2541_v33 = vld [vmem:[%s3259_s29 + $0x24] sm:$0x1] }
  0x74   : > { %v653_v0 = vrot.slane %v652_v58, 4  ;;  %v667_v1 = vrot.slane %v666_v61, 4  ;;  %v3143_v58 = vld [vmem:[%s3687_s1 + $0x210] sm:$0xff]  }
  0x75   : > { %2777 = vmatpush3.bf16.msra.mxu1 %v3111_v5  ;;  %v3134_v5 = vld [vmem:[%s3259_s29 + $0x58] ss:$8 sps:$4 sm:$0xff]   ;;  %v1831_v52 = vrot.slane %v1830_v41, 4 }
  0x76   : > { %2873 = vmatpush3.bf16.msra.mxu0 %v3112_v7  ;;  %2786 = vmatprep.subr.bf16.mxu1 %v3113_v8  ;;  %v658_v3 = vsel %vm3360_vm2, %v653_v0, %v657_v50  ;;  %v672_v4 = vsel %vm3360_vm2, %v667_v1, %v671_v56  ;;  %v3140_v50 = vld [vmem:[%s3259_s29 + $0x78] ss:$8 sps:$4 sm:$0xff]  }
  0x77   : > { %2882 = vmatprep.subr.bf16.mxu0 %v3115_v11  ;;  %v2337_v7 = vcombine.low %v658_v3, %v672_v4  ;;  %v3144_v4 = vld [vmem:[%s3687_s1 + $0x218] sm:$0xff]  }
  0x78   : > { %2779 = vmatmul.mubr.bf16.vlgmr.msra.gmra.mrb[0].mxu1 %v2335_v14  ;;  %v3132_v14 = vld [vmem:[%s3687_s1 + $0x1f8] sm:$0xff]  }
  0x79   : > { %2787 = vmatpush3.bf16.msra.mxu1 %v3113_v8  ;;  %2875 = vmatmul.mubr.bf16.vlgmr.msra.gmra.mrb[0].mxu0 %v3116_v12  ;;  %v3133_v8 = vld [vmem:[%s3259_s29 + $0xa0] ss:$8 sps:$4 sm:$0xff]   ;;  %v3130_v12 = vld [vmem:[%s3687_s1 + $0x1f0] sm:$0xff]  }
  0x7a   : > { %2883 = vmatpush3.bf16.msra.mxu0 %v3115_v11  ;;  %2788 = vmatprep.subr.bf16.mxu1 %v3117_v15  ;;  %v3128_v11 = vld [vmem:[%s3687_s1 + $0xf0] sm:$0xff]  }
  0x7b   : > { %2884 = vmatprep.subr.bf16.mxu0 %v3118_v19  ;;  %2878 = vmatprep.mubr.bf16.mxu0 %v3127_v26  ;;  %v2542_v26 = vld [vmem:[%s3259_s29 + $0x28] sm:$0xf] }
  0x7c   : > { %2782 = vmatprep.mubr.bf16.mxu1 %v2336_v63  ;;  %v1866_v37 = vshrl.u32 %v2542_v26, 16  ;;  %v1869_v38 = vshll.u32 %v2542_v26, 16 }
  0x7d   : > { %2789 = vmatpush3.bf16.msra.mxu1 %v3117_v15  ;;  %v3137_v15 = vld [vmem:[%s3687_s1 + $0x200] sm:$0xff]  }
  0x7e   : > { %2885 = vmatpush3.bf16.msra.mxu0 %v3118_v19  ;;  %2790 = vmatprep.subr.bf16.mxu1 %v3119_v36  ;;  %v2537_v19 = vld [vmem:[%s3259_s29 + $0x14] sm:$0x1]  ;;  %v1868_v48 = vrot.slane %v1866_v37, 4  ;;  %v1871_v49 = vrot.slane %v1869_v38, 5 }
  0x7f   : > { %2886 = vmatprep.subr.bf16.mxu0 %v3120_v42  ;;  %v1833_v25 = vshll.u32 %v2537_v19, 16  ;;  %v3147_v38 = vld [vmem:[%s3687_s1 + $0x230] sm:$0xff]  }
  0x80   : > { %2783 = vmatmul.mubr.bf16.gmra.mrb[4].mxu1 %v2337_v7  ;;  %v1872_v56 = vor.u32 %v1871_v49, %v1868_v48  ;;  %v2548_v7 = vld [vmem:[%s3259_s29 + $0x40] sm:$0xf] }
  0x81   : > { %2791 = vmatpush3.bf16.msra.mxu1 %v3119_v36  ;;  %2879 = vmatmul.mubr.bf16.gmra.mrb[4].mxu0 %v3129_v59  ;;  %v1816_v36 = vor.u32 %v1815_v28, %v1812_v27  ;;  %v1835_v47 = vrot.slane %v1833_v25, 5 }
  0x82   : > { %2887 = vmatpush3.bf16.msra.mxu0 %v3120_v42  ;;  %2792 = vmatprep.subr.bf16.mxu1 %v3121_v51  ;;  %v1880_v42 = vshrl.u32 %v2544_v30, 16  ;;  %v1873_v61 = vrot.slane %v1872_v56, 4 }
  0x83   : > { %2888 = vmatprep.subr.bf16.mxu0 %v3122_v62  ;;  %2898 = vmatprep.mubr.bf16.mxu0 %v3134_v5  ;;  %v1836_v0 = vsel %vm3360_vm2, %v1831_v52, %v1835_v47  ;;  %v3148_v47 = vld [vmem:[%s3687_s1 + $0x238] sm:$0xff]  }
  0x84   : > { %2802 = vmatprep.mubr.bf16.mxu1 %v3133_v8  ;;  %v1882_v53 = vrot.slane %v1880_v42, 4  ;;  %v1878_v3 = vsel %vm3360_vm2, %v1873_v61, %v1877_v57  ;;  %v1861_v42 = vshll.u32 %v2541_v33, 16  ;;  %v3192_v33 = vmov (!%p2578_p9), 0  }
  0x85   : > { %2793 = vmatpush3.bf16.msra.mxu1 %v3121_v51  ;;  %v1817_v51 = vrot.slane %v1816_v36, 4  ;;  %2118 = vst [vmem:[%s3254_s26] sm:$0xf] (!%p2578_p9), %v3192_v33  ;;  %2119 = vst [vmem:[%s3254_s26 + $0x4] sm:$0xf] (!%p2578_p9), %v3192_v33 }
  0x86   : > { %2889 = vmatpush3.bf16.msra.mxu0 %v3122_v62  ;;  %2794 = vmatprep.subr.bf16.mxu1 %v3123_v2  ;;  %v1886_v59 = vor.u32 %v1885_v55, %v1882_v53  ;;  %v3141_v62 = vld [vmem:[%s3259_s29 + $0xd0] ss:$8 sps:$4 sm:$0xff]   ;;  %2120 = vst [vmem:[%s3254_s26 + $0x8] sm:$0xf] (!%p2578_p9), %v3192_v33  ;;  %2121 = vst [vmem:[%s3254_s26 + $0xc] sm:$0xf] (!%p2578_p9), %v3192_v33 }
  0x87   : > { %2890 = vmatprep.subr.bf16.mxu0 %v3124_v6  ;;  %v1822_v63 = vsel %vm3360_vm2, %v1817_v51, %v1821_v46  ;;  %v1863_v51 = vrot.slane %v1861_v42, 5  ;;  %2122 = vst [vmem:[%s3254_s26 + $0x10] sm:$0xf] (!%p2578_p9), %v3192_v33  ;;  %2123 = vst [vmem:[%s3254_s26 + $0x14] sm:$0xf] (!%p2578_p9), %v3192_v33 }
  0x88   : > { %v1887_v1 = vrot.slane %v1886_v59, 4  ;;  %v2566_v8 = vcombine.low %v1822_v63, %v1836_v0  ;;  %2124 = vst [vmem:[%s3254_s26 + $0x18] sm:$0xf] (!%p2578_p9), %v3192_v33  ;;  %2125 = vst [vmem:[%s3254_s26 + $0x1c] sm:$0xf] (!%p2578_p9), %v3192_v33 }
  0x89   : > { %2795 = vmatpush3.bf16.msra.mxu1 %v3123_v2  ;;  %v3142_v2 = vld [vmem:[%s3259_s29 + $0x88] ss:$8 sps:$4 sm:$0xff]  }
  0x8a   : > { %2891 = vmatpush3.bf16.msra.mxu0 %v3124_v6  ;;  %2796 = vmatprep.subr.bf16.mxu1 %v3125_v9  ;;  %v1892_v5 = vsel %vm3360_vm2, %v1887_v1, %v1891_v60  ;;  %v2546_v6 = vld [vmem:[%s3259_s29 + $0x38] sm:$0xf] }
  0x8b   : > { %2892 = vmatprep.subr.bf16.mxu0 %v3126_v10 }
  0x8d   : > { %2797 = vmatpush3.bf16.msra.mxu1 %v3125_v9  ;;  %v2538_v9 = vld [vmem:[%s3259_s29 + $0x18] sm:$0xf] }
  0x8e   : > { %2893 = vmatpush3.bf16.msra.mxu0 %v3126_v10  ;;  %2798 = vmatprep.subr.bf16.mxu1 %v3128_v11  ;;  %v2540_v10 = vld [vmem:[%s3259_s29 + $0x20] sm:$0xf]  ;;  %v1838_v17 = vshrl.u32 %v2538_v9, 16  ;;  %v1841_v18 = vshll.u32 %v2538_v9, 16 }
  0x8f   : > { %2894 = vmatprep.subr.bf16.mxu0 %v3130_v12  ;;  %v1852_v19 = vshrl.u32 %v2540_v10, 16  ;;  %v1855_v20 = vshll.u32 %v2540_v10, 16 }
  0x90   : > { %v1840_v27 = vrot.slane %v1838_v17, 4  ;;  %v1843_v28 = vrot.slane %v1841_v18, 5 }
  0x91   : > { %2799 = vmatpush3.bf16.msra.mxu1 %v3128_v11  ;;  %v2568_v11 = vcombine.low %v1878_v3, %v1892_v5  ;;  %v1854_v29 = vrot.slane %v1852_v19, 4  ;;  %v1857_v30 = vrot.slane %v1855_v20, 5 }
  0x92   : > { %2895 = vmatpush3.bf16.msra.mxu0 %v3130_v12  ;;  %2800 = vmatprep.subr.bf16.mxu1 %v3131_v13  ;;  %v1894_v12 = vshrl.u32 %v2546_v6, 16  ;;  %v1844_v39 = vor.u32 %v1843_v28, %v1840_v27 }
  0x93   : > { %2896 = vmatprep.subr.bf16.mxu0 %v3132_v14  ;;  %v1858_v41 = vor.u32 %v1857_v30, %v1854_v29 }
  0x94   : > { %v1896_v23 = vrot.slane %v1894_v12, 4  ;;  %v1845_v48 = vrot.slane %v1844_v39, 4 }
  0x95   : > { %2801 = vmatpush3.bf16.msra.mxu1 %v3131_v13  ;;  %v1897_v13 = vshll.u32 %v2546_v6, 16 }
  0x96   : > { %2897 = vmatpush3.bf16.msra.mxu0 %v3132_v14  ;;  %2930 = vmatprep.subr.bf16.mxu1 %v3137_v15  ;;  %v1908_v14 = vshrl.u32 %v2548_v7, 16 }
  0x97   : > { %2906 = vmatprep.subr.bf16.mxu0 %v3137_v15  ;;  %v1899_v24 = vrot.slane %v1897_v13, 5 }
  0x98   : > { %2803 = vmatmul.mubr.bf16.vlgmr.msra.gmra.mrb[0].mxu1 %v3135_v31  ;;  %v1910_v25 = vrot.slane %v1908_v14, 4  ;;  %v2549_v31 = vld [vmem:[%s3259_s29 + $0x44] sm:$0x1] }
  0x99   : > { %2899 = vmatmul.mubr.bf16.vlgmr.msra.gmra.mrb[0].mxu0 %v3136_v35  ;;  %2938 = vmatpush3.bf16.msra.mxu1 %v3137_v15  ;;  %v1900_v34 = vor.u32 %v1899_v24, %v1896_v23  ;;  %v1903_v35 = vshll.u32 %v2547_v22, 16  ;;  %v1917_v37 = vshll.u32 %v2549_v31, 16 }
  0x9a   : > { %2907 = vmatpush3.bf16.msra.mxu0 %v3137_v15  ;;  %2931 = vmatprep.subr.bf16.mxu1 %v3138_v40  ;;  %v1911_v15 = vshll.u32 %v2548_v7, 16 }
  0x9b   : > { %2908 = vmatprep.subr.bf16.mxu0 %v3138_v40  ;;  %2806 = vmatprep.mubr.bf16.mxu1 %v3139_v45  ;;  %v1901_v43 = vrot.slane %v1900_v34, 4  ;;  %v1905_v44 = vrot.slane %v1903_v35, 5  ;;  %v1919_v46 = vrot.slane %v1917_v37, 5 }
  0x9c   : > { %2902 = vmatprep.mubr.bf16.mxu0 %v3140_v50  ;;  %v1913_v26 = vrot.slane %v1911_v15, 5  ;;  %v1859_v50 = vrot.slane %v1858_v41, 4 }
  0x9d   : > { %2939 = vmatpush3.bf16.msra.mxu1 %v3138_v40  ;;  %v1906_v52 = vsel %vm3360_vm2, %v1901_v43, %v1905_v44 }
  0x9e   : > { %2909 = vmatpush3.bf16.msra.mxu0 %v3138_v40  ;;  %2932 = vmatprep.subr.bf16.mxu1 %v3143_v58  ;;  %v1914_v36 = vor.u32 %v1913_v26, %v1910_v25  ;;  %v1847_v40 = vshll.u32 %v2539_v32, 16  ;;  %v1864_v56 = vsel %vm3360_vm2, %v1859_v50, %v1863_v51 }
  0x9f   : > { %2910 = vmatprep.subr.bf16.mxu0 %v3143_v58 }
  0xa0   : > { %2807 = vmatmul.mubr.bf16.gmra.mrb[4].mxu1 %v3141_v62  ;;  %v1915_v45 = vrot.slane %v1914_v36, 4  ;;  %v1849_v49 = vrot.slane %v1847_v40, 5 }
  0xa1   : > { %2903 = vmatmul.mubr.bf16.gmra.mrb[4].mxu0 %v3142_v2  ;;  %2940 = vmatpush3.bf16.msra.mxu1 %v3143_v58 }
  0xa2   : > { %2911 = vmatpush3.bf16.msra.mxu0 %v3143_v58  ;;  %2933 = vmatprep.subr.bf16.mxu1 %v3144_v4  ;;  %v1920_v53 = vsel %vm3360_vm2, %v1915_v45, %v1919_v46  ;;  %v1850_v55 = vsel %vm3360_vm2, %v1845_v48, %v1849_v49 }
  0xa3   : > { %2912 = vmatprep.subr.bf16.mxu0 %v3144_v4  ;;  %2922 = vmatprep.mubr.bf16.mxu0 %v2566_v8  ;;  %v2569_v57 = vcombine.low %v1906_v52, %v1920_v53  ;;  %v2567_v58 = vcombine.low %v1850_v55, %v1864_v56 }
  0xa4   : > { %2926 = vmatprep.mubr.bf16.mxu1 %v2568_v11 }
  0xa5   : > { %2941 = vmatpush3.bf16.msra.mxu1 %v3144_v4 }
  0xa6   : > { %2913 = vmatpush3.bf16.msra.mxu0 %v3144_v4  ;;  %2934 = vmatprep.subr.bf16.mxu1 %v3145_v16 }
  0xa7   : > { %2914 = vmatprep.subr.bf16.mxu0 %v3145_v16 }
  0xa9   : > { %2942 = vmatpush3.bf16.msra.mxu1 %v3145_v16 }
  0xaa   : > { %2915 = vmatpush3.bf16.msra.mxu0 %v3145_v16  ;;  %2935 = vmatprep.subr.bf16.mxu1 %v3146_v21 }
  0xab   : > { %2916 = vmatprep.subr.bf16.mxu0 %v3146_v21 }
  0xad   : > { %2943 = vmatpush3.bf16.msra.mxu1 %v3146_v21 }
  0xae   : > { %2917 = vmatpush3.bf16.msra.mxu0 %v3146_v21  ;;  %2936 = vmatprep.subr.bf16.mxu1 %v3147_v38 }
  0xaf   : > { %2918 = vmatprep.subr.bf16.mxu0 %v3147_v38 }
  0xb1   : > { %2944 = vmatpush3.bf16.msra.mxu1 %v3147_v38 }
  0xb2   : > { %2919 = vmatpush3.bf16.msra.mxu0 %v3147_v38  ;;  %2937 = vmatprep.subr.bf16.mxu1 %v3148_v47 }
  0xb3   : > { %2920 = vmatprep.subr.bf16.mxu0 %v3148_v47 }
  0xb5   : > { %2945 = vmatpush3.bf16.msra.mxu1 %v3148_v47 }
  0xb6   : > { %2921 = vmatpush3.bf16.msra.mxu0 %v3148_v47 }
  0xb8   : > { %2927 = vmatmul.mubr.bf16.vlgmr.msra.gmra.mrb[8].mxu1 %v2569_v57 }
  0xb9   : > { %2923 = vmatmul.mubr.bf16.vlgmr.msra.gmra.mrb[0].mxu0 %v2567_v58 }
 0x16b   : > { %v2804_v59 = vpop.f32.mrb[0].mxu1 }
 0x16c   : > { %v959_v60 = vpop.f32.mrb[1].mxu1 }
 0x16d   : > { %v2805_v61 = vpop.f32.mrb[2].mxu1 }
 0x16e   : > { %v962_v62 = vpop.f32.mrb[3].mxu1 }
 0x173   : > { %v2808_v63 = vpop.f32.mrb[4].mxu1 }
 0x174   : > { %v2904_v0 = vpop.f32.mrb[4].mxu0  ;;  %v975_v1 = vpop.f32.mrb[5].mxu1 }
 0x175   : > { %v2950_v2 = vadd.f32 %v2904_v0, %v2808_v63  ;;  %v1770_v3 = vpop.f32.mrb[5].mxu0  ;;  %v2809_v4 = vpop.f32.mrb[6].mxu1 }
 0x176   : > { %v2952_v5 = vadd.f32 %v1770_v3, %v975_v1  ;;  %v2905_v54 = vpop.f32.mrb[6].mxu0  ;;  %v978_v6 = vpop.f32.mrb[7].mxu1 }
 0x177   : > { %v2954_v7 = vadd.f32 %v2905_v54, %v2809_v4  ;;  %v1773_v8 = vpop.f32.mrb[7].mxu0 }
 0x178   : > { %v2956_v9 = vadd.f32 %v1773_v8, %v978_v6 }
 0x18a   : > { %2077 = sbr.rel (%p2578_p9) target bundleno = 433 (0x1b1), region = 44 }
 0x18b   : > { %v2928_v10 = vpop.f32.mrb[8].mxu1 }
 0x18c   : > { %v2924_v11 = vpop.f32.mrb[0].mxu0  ;;  %v3603_v12 = vadd.f32 %v2950_v2, %v2928_v10  ;;  %v2052_v13 = vpop.f32.mrb[9].mxu1 }
 0x18d   : > { %v3605_v14 = vadd.f32 %v2924_v11, %v2804_v59  ;;  %v2036_v15 = vpop.f32.mrb[1].mxu0  ;;  %v3607_v16 = vadd.f32 %v2952_v5, %v2052_v13  ;;  %v2929_v17 = vpop.f32.mrb[10].mxu1  ;;  %v2078_v59 = vld [vmem:[#allocation2] sm:$0x1] (!%p2578_p9) }
 0x18e   : > { %v3609_v18 = vadd.f32 %v2036_v15, %v959_v60  ;;  %v2925_v19 = vpop.f32.mrb[2].mxu0  ;;  %v3611_v20 = vadd.f32 %v2954_v7, %v2929_v17  ;;  %v2055_v21 = vpop.f32.mrb[11].mxu1  ;;  %v2101_v41 = vmul.f32 (!%p2578_p9), %v3603_v12, %v3603_v12 }
 0x18f   : > { %v3613_v22 = vadd.f32 %v2925_v19, %v2805_v61  ;;  %v2039_v23 = vpop.f32.mrb[3].mxu0  ;;  %v3615_v24 = vadd.f32 %v2956_v9, %v2055_v21  ;;  %v2097_v29 = vmul.f32 (!%p2578_p9), %v3605_v14, %v3605_v14  ;;  %v2099_v35 = vmul.f32 (!%p2578_p9), %v3607_v16, %v3607_v16 }
 0x190   : > { %v3617_v25 = vadd.f32 %v2039_v23, %v962_v62  ;;  %v2095_v27 = vmul.f32 (!%p2578_p9), %v3609_v18, %v3609_v18  ;;  %v2102_v44 = vmul.f32 (!%p2578_p9), %v3611_v20, %v3611_v20  ;;  %v2094_v62 = vld [vmem:[#allocation2 + $0x1] sm:$0x1] (!%p2578_p9) }
 0x191   : > { %v2098_v31 = vmul.f32 %v3613_v22, %v3613_v22  ;;  %v2100_v38 = vmul.f32 %v3615_v24, %v3615_v24 }
 0x192   : > { %v2079_v26 = vadd.f32 %v3617_v25, %v3609_v18  ;;  %v2096_v28 = vmul.f32 %v3617_v25, %v3617_v25 }
 0x194   : > { %v2080_v30 = vadd.f32 %v3605_v14, %v2079_v26  ;;  %v2103_v32 = vadd.f32 %v2096_v28, %v2095_v27 }
 0x196   : > { %v2081_v34 = vadd.f32 %v3613_v22, %v2080_v30  ;;  %v2104_v36 = vadd.f32 %v2103_v32, %v2097_v29 }
 0x198   : > { %v2082_v37 = vadd.f32 %v3607_v16, %v2081_v34  ;;  %v2105_v39 = vadd.f32 %v2104_v36, %v2098_v31 }
 0x19a   : > { %v2083_v40 = vadd.f32 %v3615_v24, %v2082_v37  ;;  %v2106_v42 = vadd.f32 %v2105_v39, %v2099_v35 }
 0x19c   : > { %v2084_v43 = vadd.f32 %v3603_v12, %v2083_v40  ;;  %v2107_v45 = vadd.f32 %v2106_v42, %v2100_v38 }
 0x19e   : > { %v2085_v46 = vadd.f32 %v3611_v20, %v2084_v43  ;;  %v2108_v47 = vadd.f32 %v2107_v45, %v2101_v41 }
 0x1a0   : > { %v2086_v48 = vrot.slane %v2085_v46, 4  ;;  %v2109_v49 = vadd.f32 %v2108_v47, %v2102_v44 }
 0x1a2   : > { %v2087_v50 = vadd.f32 %v2086_v48, %v2085_v46  ;;  %v2110_v51 = vrot.slane %v2109_v49, 4 }
 0x1a4   : > { %v2088_v52 = vrot.slane %v2087_v50, 2  ;;  %v2111_v53 = vadd.f32 %v2110_v51, %v2109_v49 }
 0x1a6   : > { %v2089_v55 = vadd.f32 %v2088_v52, %v2087_v50  ;;  %v2112_v56 = vrot.slane %v2111_v53, 2 }
 0x1a8   : > { %v2090_v57 = vrot.slane %v2089_v55, 1  ;;  %v2113_v58 = vadd.f32 %v2112_v56, %v2111_v53 }
 0x1aa   : > { %v2091_v60 = vadd.f32 %v2090_v57, %v2089_v55  ;;  %v2114_v61 = vrot.slane %v2113_v58, 1 }
 0x1ac   : > { %v2092_v63 = vadd.f32 %v2091_v60, %v2078_v59  ;;  %v2115_v0 = vadd.f32 %v2114_v61, %v2113_v58 }
 0x1ae   : > { %2093 = vst [vmem:[#allocation2] sm:$0x1] %v2092_v63  ;;  %v2116_v1 = vadd.f32 %v2115_v0, %v2094_v62 }
 0x1b0   : > { %2117 = vst [vmem:[#allocation2 + $0x1] sm:$0x1] %v2116_v1 }
 0x1b1 PF: > { %p2579_p10 = scmp.ne.s32.totalorder %s3177_s16, 1 }
 0x1b2   : > { %v2145_v9 = vlaneseq (!%p2579_p10)  ;;  %v2132_v11 = vld [vmem:[%s3688_s2] sm:$0x1] (!%p2579_p10) }
 0x1b3   : > { %2129 = sbr.rel (%p2579_p10) target bundleno = 475 (0x1db), region = 48  ;;  %v2133_v19 = vld [vmem:[%s3689_s3] sm:$0x1] (!%p2579_p10) }
 0x1b4   : > { %v2146_v10 = vshrl.u32 (!%p2579_p10), %v2145_v9, 7 }
 0x1b5   : > { %v2130_v2 = vld [vmem:[#allocation2] sm:$0x1] (!%p2579_p10) }
 0x1b6   : > { %v2134_v4 = vmul.f32 (!%p2579_p10), 0.0078125, %v2130_v2  ;;  %v2147_v13 = vsub.s32 (!%p2579_p10), 0, %v2146_v10 }
 0x1b7   : > { %v2131_v3 = vld [vmem:[#allocation2 + $0x1] sm:$0x1] (!%p2579_p10) }
 0x1b8   : > { %v2135_v5 = vmul.f32 (!%p2579_p10), 0.0078125, %v2131_v3  ;;  %v2136_v54 = vmul.f32 (!%p2579_p10), %v2134_v4, %v2134_v4 }
 0x1ba   : > { %v2137_v6 = vsub.f32 %v2135_v5, %v2136_v54 }
 0x1bc   : > { %v2138_v7 = vmax.f32 %v2137_v6, 0.0 }
 0x1be   : > { %v2139_v8 = vadd.f32 1e-05, %v2138_v7 }
 0x1c0   : > { %3149 = vrsqrt.f32 %v2139_v8 }
 0x1ca   : > { %v3150_v15 = vpop.eup %3149 }
 0x1cb   : > { %v2141_v17 = vmul.f32 %v3150_v15, %v2132_v11 }
 0x1cd   : > { %v2142_v21 = vmul.f32 %v2141_v17, %v2134_v4  ;;  %v2148_v23 = vrot.slane %v2141_v17, %v2147_v13 }
 0x1cf   : > { %v2143_v26 = vsub.f32 %v2133_v19, %v2142_v21  ;;  %v2150_v27 = vmul.f32 %v3609_v18, %v2148_v23  ;;  %v2151_v28 = vmul.f32 %v3617_v25, %v2148_v23  ;;  %v2152_v29 = vmul.f32 %v3605_v14, %v2148_v23 }
 0x1d0   : > { %v2153_v30 = vmul.f32 %v3613_v22, %v2148_v23  ;;  %v2154_v31 = vmul.f32 %v3607_v16, %v2148_v23  ;;  %v2155_v32 = vmul.f32 %v3615_v24, %v2148_v23  ;;  %v2156_v33 = vmul.f32 %v3603_v12, %v2148_v23 }
 0x1d1   : > { %v2162_v34 = vrot.slane %v2143_v26, %v2147_v13  ;;  %v2157_v35 = vmul.f32 %v3611_v20, %v2148_v23 }
 0x1d3   : > { %v2164_v36 = vadd.f32 %v2162_v34, %v2150_v27  ;;  %v2165_v37 = vadd.f32 %v2162_v34, %v2151_v28  ;;  %v2166_v38 = vadd.f32 %v2162_v34, %v2152_v29  ;;  %v2167_v39 = vadd.f32 %v2162_v34, %v2153_v30 }
 0x1d4   : > { %v2168_v18 = vadd.f32 %v2162_v34, %v2154_v31  ;;  %v2169_v25 = vadd.f32 %v2162_v34, %v2155_v32  ;;  %v2170_v14 = vadd.f32 %v2162_v34, %v2156_v33  ;;  %v2171_v22 = vadd.f32 %v2162_v34, %v2157_v35 }
 0x1d5   : > { %v2172_v16 = vmax.f32 %v2164_v36, 0.0  ;;  %v2173_v40 = vmax.f32 %v2165_v37, 0.0  ;;  %v2174_v24 = vmax.f32 %v2166_v38, 0.0  ;;  %v2175_v41 = vmax.f32 %v2167_v39, 0.0 }
 0x1d6   : > { %v2176_v12 = vmax.f32 %v2168_v18, 0.0  ;;  %v2177_v42 = vmax.f32 %v2169_v25, 0.0  ;;  %v2178_v43 = vmax.f32 %v2170_v14, 0.0  ;;  %v2179_v20 = vmax.f32 %v2171_v22, 0.0 }
 0x1d7   : > { %v2586_v44 = vpack.c.bf16 %v2173_v40, %v2172_v16  ;;  %v2591_v45 = vpack.c.bf16 %v2175_v41, %v2174_v24 }
 0x1d8   : > { %v2596_v46 = vpack.c.bf16 %v2177_v42, %v2176_v12  ;;  %v2601_v47 = vpack.c.bf16 %v2179_v20, %v2178_v43 }
 0x1d9   : > { %2587 = vst [vmem:[%s3254_s26] sm:$0xff] %v2586_v44   ;;  %2603 = vst [vmem:[%s3254_s26 + $0x8] sm:$0xff] %v2591_v45  }
 0x1da   : > { %2604 = vst [vmem:[%s3254_s26 + $0x10] sm:$0xff] %v2596_v46   ;;  %2605 = vst [vmem:[%s3254_s26 + $0x18] sm:$0xff] %v2601_v47  }
 0x1db PF: > { %s14_s19 = sadd.s32 1, %s3189_s19   ;;  %s3693_s15 = smov %s3181_s17 }
 0x1dc   : > { %p11_p11 = scmp.ge.s32.totalorder %s14_s19, 6   ;;  %s3694_s16 = smov %s3185_s18 }
 0x1dd   : > { %s3695_s17 = smov %s3698_s20  ;;  %s3696_s18 = smov %s3702_s21 }
 0x1de   :  { %13 = sbr.rel (!%p11_p11) target bundleno = 3 (0x3), region = 91 }

// kernel: resblk_forward.3
= control target key start
LH: loop header
LB: loop body
LE: loop exit
PB: predicated region body
PF: predicated region fallthrough
CT: control target
= control target key end

     0   :  { %s3771_s27 = smov 0   ;;  %s3773_s28 = smov 0   ;;  %s4534_s0 = inlined_call_operand.vmem [shape: bf16[2,10,10,128], index: 0, kind: input, shape index: {}]   ;;  %s4535_s1 = inlined_call_operand.vmem [shape: bf16[9,128,128], index: 1, kind: input, shape index: {}]   ;;  %s4536_s2 = inlined_call_operand.vmem [shape: f32[1,128], index: 2, kind: input, shape index: {}]   ;;  %s4537_s3 = inlined_call_operand.vmem [shape: f32[1,128], index: 3, kind: input, shape index: {}]   ;;  %s4538_s4 = inlined_call_operand.vmem [shape: bf16[2,4,10,10,128], index: 4, kind: input, shape index: {}]   ;;  %s4539_s5 = inlined_call_operand.vmem [shape: bf16[128,128], index: 5, kind: input, shape index: {}]   ;;  %s4540_s6 = inlined_call_operand.vmem [shape: f32[1,128], index: 6, kind: input, shape index: {}]   ;;  %s4541_s7 = inlined_call_operand.vmem [shape: f32[1,128], index: 7, kind: input, shape index: {}]   ;;  %s4542_s8 = inlined_call_operand.vmem [shape: f32[2,8,8,128], index: 8, kind: output, shape index: {}]  }
   0x1   :  { %s3775_s29 = smov 0   ;;  %s3777_s30 = smov 0  }
   0x2   :  { %s3779_s9 = smov 0  }
   0x3 LB: > { %s27_s10 = sadd.s32 1, %s3714_s29  ;;  %s30_s11 = sadd.s32 1, %s3718_s30  ;;  %s3722_s9 = sphi %s3779_s9, %s18_s9   ;;  %s3718_s30 = sphi %s3777_s30, %s4550_s30   ;;  %s3714_s29 = sphi %s3775_s29, %s4549_s29   ;;  %s3710_s28 = sphi %s3773_s28, %s4548_s28   ;;  %s3706_s27 = sphi %s3771_s27, %s4547_s27  }
   0x4   : > { %p28_p0 = scmp.ge.s32.totalorder %s27_s10, 2  ;;  %p2762_p1 = scmp.ge.s32.totalorder %s3722_s9, 1 }
   0x5   : > { %p284_p2 = scmp.lt.s32.totalorder %s3722_s9, 5 }
   0x6   : > { %s4552_s10 = smov (%p28_p0, %s27_s10), 0  ;;  %s4554_s11 = smov (!%p28_p0, %s30_s11), %s3718_s30 }
   0x7   : > { %p285_p3 = pnand %p2762_p1, %p284_p2  ;;  %p32_p4 = scmp.ge.s32.totalorder %s4554_s11, 2 }
   0x8   : > { %p323_p5 = scmp.lt.s32.totalorder (!%p285_p3), %s3706_s27, 1  ;;  %p339_p6 = scmp.eq.s32.totalorder (!%p285_p3), %s3710_s28, 0 }
   0x9   : > { %s4556_s11 = smov (%p32_p4, %s4554_s11), 0  ;;  %288 = sbr.rel (%p285_p3) target bundleno = 488 (0x1e8), region = 52 }
   0xa   : > { %p340_p7 = scmp.eq.s32.totalorder (!%p285_p3), %s3706_s27, 0 }
   0xc   : > { %p341_p8 = pnand (!%p285_p3), %p340_p7, %p339_p6 }
  0x10   : > { %s4558_s27 = smov (!%p323_p5, %s3706_s27), 1  ;;  %344 = sbr.rel (%p341_p8) target bundleno = 23 (0x17), region = 56 }
  0x11   : > { %s3540_s12 = smul.u32 80, %s4558_s27  ;;  %s3115_s13 = sshll.u32 %s4558_s27, 6  ;;  %v3724_v0 = vmov (!%p341_p8), 0.0  }
  0x12   : > { %s3541_s14 = smul.u32 320, %s4558_s27  ;;  %s3807_s17 = scalar_lea.vmem %s4542_s8, %s3115_s13  ;;  %345 = vst [vmem:[#allocation2] sm:$0xf] (!%p341_p8), %v3724_v0 }
  0x13   : > { %s3812_s20 = scalar_lea.vmem %s4534_s0, %s3540_s12 }
  0x14   : > { %s3817_s23 = scalar_lea.vmem %s4538_s4, %s3541_s14 }
  0x17 PF: > { %v3584_v1 = vld [vmem:[%s4535_s1 + $0x40] sm:$0xff]   ;;  %v3586_v3 = vld [vmem:[%s4535_s1 + $0x48] sm:$0xff]   ;;  %v3588_v5 = vld [vmem:[%s4535_s1 + $0x50] sm:$0xff]   ;;  %vm378_vm0 = vsmask.f32 3328  ;;  %vm800_vm3 = vcmask 1042432  }
  0x18   : > { %v3585_v2 = vld [vmem:[%s4535_s1 + $0x100] sm:$0xff]   ;;  %3236 = vmatprep.subr.bf16.mxu1 %v3584_v1  ;;  %v3587_v4 = vld [vmem:[%s4535_s1 + $0x108] sm:$0xff]   ;;  %v3589_v6 = vld [vmem:[%s4535_s1 + $0x110] sm:$0xff]   ;;  %vm379_vm1 = vsmask.f32 7440  ;;  %vm801_vm4 = vcmask 1046532  }
  0x19   : > { %3332 = vmatprep.subr.bf16.mxu0 %v3585_v2  ;;  %3237 = vmatpush3.bf16.msra.mxu1 %v3584_v1  ;;  %v3590_v7 = vld [vmem:[%s4535_s1 + $0x58] sm:$0xff]   ;;  %v3592_v9 = vld [vmem:[%s4535_s1 + $0x60] sm:$0xff]   ;;  %v3594_v11 = vld [vmem:[%s4535_s1 + $0x68] sm:$0xff]   ;;  %p3111_p9 = scmp.ne.s32.totalorder %s3710_s28, 0 }
  0x1a   : > { %3333 = vmatpush3.bf16.msra.mxu0 %v3585_v2  ;;  %3238 = vmatprep.subr.bf16.mxu1 %v3586_v3  ;;  %v3591_v8 = vld [vmem:[%s4535_s1 + $0x118] sm:$0xff]   ;;  %v3593_v10 = vld [vmem:[%s4535_s1 + $0x120] sm:$0xff]   ;;  %v3856_v13 = vld [vmem:[%s3812_s20 + $0x8] sm:$0xf] }
  0x1b   : > { %3334 = vmatprep.subr.bf16.mxu0 %v3587_v4  ;;  %v3853_v12 = vld [vmem:[%s3812_s20] sm:$0xf]  ;;  %v3859_v14 = vld [vmem:[%s3812_s20 + $0x4] sm:$0x1]  ;;  %v3595_v15 = vld [vmem:[%s4535_s1 + $0x128] sm:$0xff]   ;;  %v396_v20 = vshrl.u32 %v3856_v13, 16 }
  0x1c   : > { %v3865_v16 = vld [vmem:[%s3812_s20 + $0xc] sm:$0x1]  ;;  %v382_v17 = vshrl.u32 %v3853_v12, 16  ;;  %v385_v18 = vshll.u32 %v3853_v12, 16  ;;  %v391_v19 = vshll.u32 %v3859_v14, 16  ;;  %v399_v21 = vshll.u32 %v3856_v13, 16  ;;  %vm3892_vm2 = vmor %vm378_vm0, %vm379_vm1 }
  0x1d   : > { %3239 = vmatpush3.bf16.msra.mxu1 %v3586_v3  ;;  %v405_v22 = vshll.u32 %v3865_v16, 16  ;;  %v3596_v23 = vld [vmem:[%s4535_s1 + $0x70] sm:$0xff]   ;;  %v398_v28 = vrot.slane %v396_v20, 4  ;;  %v2879_v31 = vld [vmem:[%s3812_s20 + $0x8] sm:$0xf]  ;;  %v3598_v38 = vld [vmem:[%s4535_s1 + $0x78] sm:$0xff]  }
  0x1e   : > { %3335 = vmatpush3.bf16.msra.mxu0 %v3587_v4  ;;  %3240 = vmatprep.subr.bf16.mxu1 %v3588_v5  ;;  %v3597_v24 = vld [vmem:[%s4535_s1 + $0x130] sm:$0xff]   ;;  %v384_v25 = vrot.slane %v382_v17, 4  ;;  %v387_v26 = vrot.slane %v385_v18, 5  ;;  %v393_v27 = vrot.slane %v391_v19, 5  ;;  %v401_v29 = vrot.slane %v399_v21, 5  ;;  %v3599_v48 = vld [vmem:[%s4535_s1 + $0x138] sm:$0xff]   ;;  %vm4066_vm5 = vmor %vm800_vm3, %vm801_vm4 }
  0x1f   : > { %3336 = vmatprep.subr.bf16.mxu0 %v3589_v6  ;;  %v407_v30 = vrot.slane %v405_v22, 5  ;;  %v3881_v32 = vld [vmem:[%s3812_s20 + $0xc] sm:$0x1]  ;;  %v2881_v34 = vld [vmem:[%s3812_s20 + $0x10] sm:$0xf]  ;;  %v1177_v36 = vshrl.u32 %v2879_v31, 16 }
  0x20   : > { %v388_v33 = vor.u32 %v387_v26, %v384_v25  ;;  %v3885_v35 = vld [vmem:[%s3812_s20 + $0x14] sm:$0x1]  ;;  %v1180_v37 = vshll.u32 %v2879_v31, 16  ;;  %v402_v40 = vor.u32 %v401_v29, %v398_v28  ;;  %v1186_v41 = vshll.u32 %v3881_v32, 16  ;;  %v3902_v52 = vld [vmem:[%s3812_s20 + $0x10] sm:$0xf] }
  0x21   : > { %3241 = vmatpush3.bf16.msra.mxu1 %v3588_v5  ;;  %v1191_v42 = vshrl.u32 %v2881_v34, 16  ;;  %v1194_v43 = vshll.u32 %v2881_v34, 16  ;;  %v1179_v45 = vrot.slane %v1177_v36, 4  ;;  %v1200_v47 = vshll.u32 %v3885_v35, 16  ;;  %v3907_v56 = vld [vmem:[%s3812_s20 + $0x18] sm:$0xf] }
  0x22   : > { %3337 = vmatpush3.bf16.msra.mxu0 %v3589_v6  ;;  %3242 = vmatprep.subr.bf16.mxu1 %v3590_v7  ;;  %v389_v44 = vrot.slane %v388_v33, 4  ;;  %v1182_v46 = vrot.slane %v1180_v37, 5  ;;  %v403_v49 = vrot.slane %v402_v40, 4  ;;  %v1188_v55 = vrot.slane %v1186_v41, 5  ;;  %v3910_v57 = vld [vmem:[%s3812_s20 + $0x14] sm:$0x1] }
  0x23   : > { %3338 = vmatprep.subr.bf16.mxu0 %v3591_v8  ;;  %v1193_v50 = vrot.slane %v1191_v42, 4  ;;  %v1196_v51 = vrot.slane %v1194_v43, 5  ;;  %v1202_v60 = vrot.slane %v1200_v47, 5  ;;  %v3915_v61 = vld [vmem:[%s3812_s20 + $0x1c] sm:$0x1]  ;;  %v410_v62 = vshrl.u32 %v3902_v52, 16 }
  0x24   : > { %v394_v53 = vsel %vm3892_vm2, %v389_v44, %v393_v27  ;;  %v1183_v54 = vor.u32 %v1182_v46, %v1179_v45  ;;  %v408_v58 = vsel %vm3892_vm2, %v403_v49, %v407_v30  ;;  %v3600_v0 = vld [vmem:[%s4535_s1] sm:$0xff]   ;;  %v413_v3 = vshll.u32 %v3902_v52, 16  ;;  %v3935_v17 = vld [vmem:[%s3812_s20 + $0x1c] sm:$0x1]  ;;  %v3602_v44 = vld [vmem:[%s4535_s1 + $0x8] sm:$0xff]  }
  0x25   : > { %3243 = vmatpush3.bf16.msra.mxu1 %v3590_v7  ;;  %v1197_v59 = vor.u32 %v1196_v51, %v1193_v50  ;;  %v2783_v63 = vcombine.low %v394_v53, %v408_v58  ;;  %v3924_v2 = vld [vmem:[%s4535_s1 + $0x140] sm:$0xff]   ;;  %v419_v4 = vshll.u32 %v3910_v57, 16  ;;  %v412_v6 = vrot.slane %v410_v62, 4 }
  0x26   : > { %3339 = vmatpush3.bf16.msra.mxu0 %v3591_v8  ;;  %3244 = vmatprep.subr.bf16.mxu1 %v3592_v9  ;;  %v1184_v1 = vrot.slane %v1183_v54, 4  ;;  %v424_v7 = vshrl.u32 %v3907_v56, 16  ;;  %v427_v8 = vshll.u32 %v3907_v56, 16  ;;  %v2885_v18 = vld [vmem:[%s3812_s20 + $0x20] sm:$0xf]  ;;  %v1214_v30 = vshll.u32 %v3935_v17, 16 }
  0x27   : > { %3340 = vmatprep.subr.bf16.mxu0 %v3593_v10  ;;  %v1198_v5 = vrot.slane %v1197_v59, 4  ;;  %3252 = vmatprep.mubr.bf16.mxu1 %v2783_v63  ;;  %v3941_v22 = vld [vmem:[%s3812_s20 + $0x24] sm:$0x1]  ;;  %v421_v25 = vrot.slane %v419_v4, 5  ;;  %v1219_v33 = vshrl.u32 %v2885_v18, 16  ;;  %v1222_v34 = vshll.u32 %v2885_v18, 16 }
  0x28   : > { %v426_v20 = vrot.slane %v424_v7, 4  ;;  %v429_v21 = vrot.slane %v427_v8, 5  ;;  %v1228_v36 = vshll.u32 %v3941_v22, 16  ;;  %v1216_v47 = vrot.slane %v1214_v30, 5  ;;  %v3965_v63 = vld [vmem:[%s3812_s20 + $0x20] sm:$0xf] }
  0x29   : > { %3245 = vmatpush3.bf16.msra.mxu1 %v3592_v9  ;;  %v2883_v9 = vld [vmem:[%s3812_s20 + $0x18] sm:$0xf]  ;;  %v1203_v19 = vsel %vm3892_vm2, %v1198_v5, %v1202_v60  ;;  %v1221_v42 = vrot.slane %v1219_v33, 4  ;;  %v1224_v43 = vrot.slane %v1222_v34, 5  ;;  %v1468_v58 = vrot.slane %v3881_v32, 5  ;;  %v3604_v60 = vld [vmem:[%s4535_s1 + $0x10] sm:$0xff]  }
  0x2a   : > { %3341 = vmatpush3.bf16.msra.mxu0 %v3593_v10  ;;  %3246 = vmatprep.subr.bf16.mxu1 %v3594_v11  ;;  %v1189_v10 = vsel %vm3892_vm2, %v1184_v1, %v1188_v55  ;;  %v430_v27 = vor.u32 %v429_v21, %v426_v20  ;;  %v1205_v28 = vshrl.u32 %v2883_v9, 16  ;;  %v1208_v29 = vshll.u32 %v2883_v9, 16  ;;  %v3603_v55 = vld [vmem:[%s4535_s1 + $0x148] sm:$0xff]   ;;  %v3971_v1 = vld [vmem:[%s3812_s20 + $0x24] sm:$0x1]  ;;  %v3607_v30 = vld [vmem:[%s4535_s1 + $0x158] sm:$0xff]  }
  0x2b   : > { %3342 = vmatprep.subr.bf16.mxu0 %v3595_v15  ;;  %v1225_v50 = vor.u32 %v1224_v43, %v1221_v42  ;;  %v438_v4 = vshrl.u32 %v3965_v63, 16  ;;  %v441_v5 = vshll.u32 %v3965_v63, 16  ;;  %v3669_v39 = vld [vmem:[%s4539_s5 + $0x20] sm:$0xff]  }
  0x2c   : > { %v431_v37 = vrot.slane %v430_v27, 4  ;;  %v1210_v40 = vrot.slane %v1208_v29, 5  ;;  %v3995_v27 = vld [vmem:[%s3812_s20 + $0x34] sm:$0x1] }
  0x2d   : > { %3247 = vmatpush3.bf16.msra.mxu1 %v3594_v11  ;;  %v415_v11 = vrot.slane %v413_v3, 5  ;;  %v1226_v53 = vrot.slane %v1225_v50, 4  ;;  %v3974_v3 = vld [vmem:[%s3812_s20 + $0x2c] sm:$0x1]  ;;  %v443_v18 = vrot.slane %v441_v5, 5  ;;  %v1256_v42 = vshll.u32 %v3995_v27, 16 }
  0x2e   : > { %3343 = vmatpush3.bf16.msra.mxu0 %v3595_v15  ;;  %3248 = vmatprep.subr.bf16.mxu1 %v3596_v23  ;;  %v433_v15 = vshll.u32 %v3915_v61, 16  ;;  %v461_v9 = vshll.u32 %v3974_v3, 16 }
  0x2f   : > { %3344 = vmatprep.subr.bf16.mxu0 %v3597_v24  ;;  %v1258_v50 = vrot.slane %v1256_v42, 5 }
  0x30   : > { %v435_v26 = vrot.slane %v433_v15, 5  ;;  %v440_v15 = vrot.slane %v438_v4, 4 }
  0x31   : > { %3249 = vmatpush3.bf16.msra.mxu1 %v3596_v23  ;;  %v2911_v23 = vcombine.low %v1189_v10, %v1203_v19  ;;  %v3605_v10 = vld [vmem:[%s4535_s1 + $0x150] sm:$0xff]  }
  0x32   : > { %3345 = vmatpush3.bf16.msra.mxu0 %v3597_v24  ;;  %3250 = vmatprep.subr.bf16.mxu1 %v3598_v38  ;;  %v416_v24 = vor.u32 %v415_v11, %v412_v6  ;;  %v436_v45 = vsel %vm3892_vm2, %v431_v37, %v435_v26  ;;  %v447_v6 = vshll.u32 %v3971_v1, 16  ;;  %v3606_v11 = vld [vmem:[%s4535_s1 + $0x18] sm:$0xff]   ;;  %v2889_v26 = vld [vmem:[%s3812_s20 + $0x30] sm:$0xf] }
  0x33   : > { %3346 = vmatprep.subr.bf16.mxu0 %v3599_v48  ;;  %3348 = vmatprep.mubr.bf16.mxu0 %v2911_v23  ;;  %v463_v23 = vrot.slane %v461_v9, 5  ;;  %v1250_v37 = vshll.u32 %v2889_v26, 16 }
  0x34   : > { %v417_v31 = vrot.slane %v416_v24, 4  ;;  %v449_v19 = vrot.slane %v447_v6, 5  ;;  %v2887_v24 = vld [vmem:[%s3812_s20 + $0x28] sm:$0xf]  ;;  %v2891_v6 = vld [vmem:[%s3812_s20 + $0x38] sm:$0xf] }
  0x35   : > { %3251 = vmatpush3.bf16.msra.mxu1 %v3598_v38  ;;  %v1207_v38 = vrot.slane %v1205_v28, 4  ;;  %v1233_v28 = vshrl.u32 %v2887_v24, 16  ;;  %v1236_v29 = vshll.u32 %v2887_v24, 16 }
  0x36   : > { %3347 = vmatpush3.bf16.msra.mxu0 %v3599_v48  ;;  %3260 = vmatprep.subr.bf16.mxu1 %v3600_v0  ;;  %v422_v41 = vsel %vm3892_vm2, %v417_v31, %v421_v25  ;;  %v1230_v48 = vrot.slane %v1228_v36, 5  ;;  %v3991_v25 = vld [vmem:[%s3812_s20 + $0x2c] sm:$0x1]  ;;  %v3608_v31 = vld [vmem:[%s4535_s1 + $0x20] sm:$0xff]   ;;  %v1247_v36 = vshrl.u32 %v2889_v26, 16 }
  0x37   : > { %3356 = vmatprep.subr.bf16.mxu0 %v3924_v2  ;;  %v1211_v46 = vor.u32 %v1210_v40, %v1207_v38  ;;  %v2784_v49 = vcombine.low %v422_v41, %v436_v45  ;;  %v1242_v34 = vshll.u32 %v3991_v25, 16  ;;  %v1235_v40 = vrot.slane %v1233_v28, 4  ;;  %v4041_v28 = vld [vmem:[%s3812_s20 + $0x44] sm:$0x1] }
  0x38   : > { %v1231_v59 = vsel %vm3892_vm2, %v1226_v53, %v1230_v48  ;;  %v1238_v41 = vrot.slane %v1236_v29, 5  ;;  %v1249_v45 = vrot.slane %v1247_v36, 4  ;;  %v4014_v53 = vld [vmem:[%s3812_s20 + $0x34] sm:$0x1]  ;;  %v1261_v29 = vshrl.u32 %v2891_v6, 16 }
  0x39   : > { %v1212_v51 = vrot.slane %v1211_v46, 4  ;;  %3253 = vmatmul.mubr.bf16.vlgmr.msra.gmra.mrb[0].mxu1 %v2784_v49  ;;  %v1252_v46 = vrot.slane %v1250_v37, 5  ;;  %v475_v5 = vshll.u32 %v4014_v53, 16  ;;  %v1264_v37 = vshll.u32 %v2891_v6, 16 }
  0x3a   : > { %3261 = vmatpush3.bf16.msra.mxu1 %v3600_v0  ;;  %v3968_v0 = vld [vmem:[%s3812_s20 + $0x28] sm:$0xf]  ;;  %v1239_v49 = vor.u32 %v1238_v41, %v1235_v40  ;;  %v1263_v42 = vrot.slane %v1261_v29, 4  ;;  %v3615_v29 = vld [vmem:[%s4535_s1 + $0x178] sm:$0xff]  }
  0x3b   : > { %v1217_v54 = vsel %vm3892_vm2, %v1212_v51, %v1216_v47  ;;  %3262 = vmatprep.subr.bf16.mxu1 %v3602_v44  ;;  %v452_v7 = vshrl.u32 %v3968_v0, 16  ;;  %v455_v8 = vshll.u32 %v3968_v0, 16  ;;  %v4006_v47 = vld [vmem:[%s3812_s20 + $0x30] sm:$0xf]  ;;  %v4011_v51 = vld [vmem:[%s3812_s20 + $0x38] sm:$0xf] }
  0x3c   : > { %v2912_v62 = vcombine.low %v1217_v54, %v1231_v59  ;;  %v466_v54 = vshrl.u32 %v4006_v47, 16  ;;  %v469_v4 = vshll.u32 %v4006_v47, 16  ;;  %v1240_v9 = vrot.slane %v1239_v49, 4 }
  0x3d   : > { %v454_v20 = vrot.slane %v452_v7, 4  ;;  %v457_v21 = vrot.slane %v455_v8, 5  ;;  %v3610_v7 = vld [vmem:[%s4535_s1 + $0x28] sm:$0xff]   ;;  %v1476_v49 = vrot.slane %v3935_v17, 5 }
  0x3e   : > { %3349 = vmatmul.mubr.bf16.vlgmr.msra.gmra.mrb[0].mxu0 %v2912_v62  ;;  %3263 = vmatpush3.bf16.msra.mxu1 %v3602_v44  ;;  %v1244_v44 = vrot.slane %v1242_v34, 5  ;;  %v4023_v62 = vld [vmem:[%s3812_s20 + $0x3c] sm:$0x1] }
  0x3f   : > { %3357 = vmatpush3.bf16.msra.mxu0 %v3924_v2  ;;  %3264 = vmatprep.subr.bf16.mxu1 %v3604_v60  ;;  %v444_v2 = vor.u32 %v443_v18, %v440_v15  ;;  %v458_v33 = vor.u32 %v457_v21, %v454_v20  ;;  %v480_v15 = vshrl.u32 %v4011_v51, 16  ;;  %v4033_v18 = vld [vmem:[%s3812_s20 + $0x3c] sm:$0x1]  ;;  %v471_v20 = vrot.slane %v469_v4, 5 }
  0x40   : > { %3358 = vmatprep.subr.bf16.mxu0 %v3603_v55  ;;  %v477_v21 = vrot.slane %v475_v5, 5  ;;  %v1245_v24 = vsel %vm3892_vm2, %v1240_v9, %v1244_v44  ;;  %v489_v26 = vshll.u32 %v4023_v62, 16 }
  0x41   : > { %v445_v38 = vrot.slane %v444_v2, 4  ;;  %v459_v43 = vrot.slane %v458_v33, 4  ;;  %v482_v2 = vrot.slane %v480_v15, 4 }
  0x42   : > { %3265 = vmatpush3.bf16.msra.mxu1 %v3604_v60  ;;  %v1253_v60 = vor.u32 %v1252_v46, %v1249_v45  ;;  %v491_v41 = vrot.slane %v489_v26, 5  ;;  %v1266_v46 = vrot.slane %v1264_v37, 5  ;;  %v2925_v26 = vld [vmem:[%s3812_s20 + $0x18] sm:$0xe] }
  0x43   : > { %3359 = vmatpush3.bf16.msra.mxu0 %v3603_v55  ;;  %3266 = vmatprep.subr.bf16.mxu1 %v3606_v11  ;;  %v450_v48 = vsel %vm3892_vm2, %v445_v38, %v449_v19  ;;  %v3609_v55 = vld [vmem:[%s4535_s1 + $0x160] sm:$0xff]   ;;  %v464_v59 = vsel %vm3892_vm2, %v459_v43, %v463_v23  ;;  %v483_v23 = vshll.u32 %v4011_v51, 16  ;;  %v3612_v38 = vld [vmem:[%s4535_s1 + $0x30] sm:$0xff]   ;;  %v1270_v43 = vshll.u32 %v4033_v18, 16 }
  0x44   : > { %3360 = vmatprep.subr.bf16.mxu0 %v3605_v10  ;;  %v2785_v8 = vcombine.low %v450_v48, %v464_v59  ;;  %v1254_v19 = vrot.slane %v1253_v60, 4  ;;  %v1472_v48 = vrot.slane %v3885_v35, 5  ;;  %v3613_v59 = vld [vmem:[%s4535_s1 + $0x170] sm:$0xff]   ;;  %v1267_v5 = vor.u32 %v1266_v46, %v1263_v42  ;;  %v3618_v42 = vld [vmem:[%s4535_s1 + $0x180] sm:$0xff]  }
  0x45   : > { %v485_v36 = vrot.slane %v483_v23, 5  ;;  %v1272_v35 = vrot.slane %v1270_v43, 5  ;;  %v1480_v23 = vrot.slane %v3941_v22, 5  ;;  %v2933_v37 = vrot.slane %v2925_v26, 9 }
  0x46   : > { %3267 = vmatpush3.bf16.msra.mxu1 %v3606_v11  ;;  %v468_v11 = vrot.slane %v466_v54, 4  ;;  %3256 = vmatprep.mubr.bf16.mxu1 %v2785_v8  ;;  %v1259_v33 = vsel %vm3892_vm2, %v1254_v19, %v1258_v50  ;;  %v1284_v54 = vshll.u32 %v4041_v28, 16  ;;  %v2923_v8 = vld [vmem:[%s3812_s20 + $0x8] sm:$0xe]  ;;  %v1268_v19 = vrot.slane %v1267_v5, 4 }
  0x47   : > { %3361 = vmatpush3.bf16.msra.mxu0 %v3605_v10  ;;  %3268 = vmatprep.subr.bf16.mxu1 %v3608_v31  ;;  %v2893_v10 = vld [vmem:[%s3812_s20 + $0x40] sm:$0xf]  ;;  %v2913_v40 = vcombine.low %v1245_v24, %v1259_v33  ;;  %v486_v45 = vor.u32 %v485_v36, %v482_v2  ;;  %v2931_v15 = vrot.slane %v2923_v8, 9  ;;  %v1477_v43 = vsel %vm4066_vm5, %v2933_v37, %v1476_v49 }
  0x48   : > { %3362 = vmatprep.subr.bf16.mxu0 %v3607_v30  ;;  %v472_v34 = vor.u32 %v471_v20, %v468_v11  ;;  %v1278_v50 = vshll.u32 %v2893_v10, 16  ;;  %v2924_v11 = vld [vmem:[%s3812_s20 + $0x10] sm:$0xe]  ;;  %v2795_v20 = vcombine.low %v3853_v12, %v3856_v13  ;;  %v1286_v2 = vrot.slane %v1284_v54, 5  ;;  %v2926_v13 = vld [vmem:[%s3812_s20 + $0x20] sm:$0xe] }
  0x49   : > { %3352 = vmatprep.mubr.bf16.mxu0 %v2913_v40  ;;  %v487_v4 = vrot.slane %v486_v45, 4  ;;  %v1469_v33 = vsel %vm4066_vm5, %v2931_v15, %v1468_v58  ;;  %v1273_v22 = vsel %vm3892_vm2, %v1268_v19, %v1272_v35  ;;  %v3617_v36 = vld [vmem:[%s4535_s1 + $0x80] sm:$0xff]   ;;  %v3622_v45 = vld [vmem:[%s4535_s1 + $0x90] sm:$0xff]   ;;  %v1484_v46 = vrot.slane %v3991_v25, 5 }
  0x4a   : > { %3269 = vmatpush3.bf16.msra.mxu1 %v3608_v31  ;;  %v3611_v31 = vld [vmem:[%s4535_s1 + $0x168] sm:$0xff]   ;;  %v473_v44 = vrot.slane %v472_v34, 4  ;;  %v1280_v17 = vrot.slane %v1278_v50, 5  ;;  %v1492_v54 = vrot.slane %v4033_v18, 5  ;;  %v1496_v25 = vrot.slane %v4041_v28, 5  ;;  %v3626_v19 = vld [vmem:[%s4535_s1 + $0xa0] sm:$0xff]  }
  0x4b   : > { %3363 = vmatpush3.bf16.msra.mxu0 %v3607_v30  ;;  %3270 = vmatprep.subr.bf16.mxu1 %v3610_v7  ;;  %v1275_v30 = vshrl.u32 %v2893_v10, 16  ;;  %v809_v35 = vrot.slane %v3865_v16, 5  ;;  %v813_v18 = vrot.slane %v3910_v57, 5  ;;  %v777_v16 = vld [vmem:[%s3812_s20 + $0x8] sm:$0xe] }
  0x4c   : > { %3364 = vmatprep.subr.bf16.mxu0 %v3609_v55  ;;  %v478_v60 = vsel %vm3892_vm2, %v473_v44, %v477_v21  ;;  %v2932_v21 = vrot.slane %v2924_v11, 9  ;;  %v3620_v44 = vld [vmem:[%s4535_s1 + $0x88] sm:$0xff]   ;;  %v3623_v11 = vld [vmem:[%s4535_s1 + $0x190] sm:$0xff]   ;;  %v2808_v15 = vrot.slane %v777_v16, 9  ;;  %v780_v37 = vld [vmem:[%s3812_s20 + $0x20] sm:$0xe] }
  0x4d   : > { %v1277_v6 = vrot.slane %v1275_v30, 4  ;;  %v1488_v30 = vrot.slane %v3995_v27, 5  ;;  %v2798_v27 = vcombine.low %v4006_v47, %v4011_v51  ;;  %v3624_v47 = vld [vmem:[%s4535_s1 + $0x98] sm:$0xff]  }
  0x4e   : > { %3271 = vmatpush3.bf16.msra.mxu1 %v3610_v7  ;;  %v3614_v7 = vld [vmem:[%s4535_s1 + $0x38] sm:$0xff]   ;;  %v1473_v12 = vsel %vm4066_vm5, %v2932_v21, %v1472_v48 }
  0x4f   : > { %3365 = vmatpush3.bf16.msra.mxu0 %v3609_v55  ;;  %3272 = vmatprep.subr.bf16.mxu1 %v3612_v38  ;;  %v492_v55 = vsel %vm3892_vm2, %v487_v4, %v491_v41  ;;  %v1281_v24 = vor.u32 %v1280_v17, %v1277_v6  ;;  %v2955_v58 = vcombine.low %v1469_v33, %v1473_v12  ;;  %v776_v17 = vld [vmem:[%s3812_s20] sm:$0xe]  ;;  %v3625_v21 = vld [vmem:[%s4535_s1 + $0x198] sm:$0xff]  }
  0x50   : > { %3366 = vmatprep.subr.bf16.mxu0 %v3611_v31  ;;  %v2786_v10 = vcombine.low %v478_v60, %v492_v55  ;;  %v2796_v41 = vcombine.low %v3902_v52, %v3907_v56  ;;  %v2797_v52 = vcombine.low %v3965_v63, %v3968_v0  ;;  %v805_v56 = vrot.slane %v3859_v14, 5  ;;  %v3621_v63 = vld [vmem:[%s4535_s1 + $0x188] sm:$0xff]   ;;  %v2928_v0 = vld [vmem:[%s3812_s20 + $0x30] sm:$0xe]  ;;  %v2930_v60 = vld [vmem:[%s3812_s20 + $0x40] sm:$0xe] }
  0x51   : > { %v1282_v34 = vrot.slane %v1281_v24, 4  ;;  %v2927_v14 = vld [vmem:[%s3812_s20 + $0x28] sm:$0xe]  ;;  %v2936_v50 = vrot.slane %v2928_v0, 9  ;;  %v2938_v8 = vrot.slane %v2930_v60, 9  ;;  %v2807_v57 = vrot.slane %v776_v17, 9 }
  0x52   : > { %3273 = vmatpush3.bf16.msra.mxu1 %v3612_v38  ;;  %v2934_v38 = vrot.slane %v2926_v13, 9  ;;  %v2935_v49 = vrot.slane %v2927_v14, 9  ;;  %v817_v55 = vrot.slane %v3915_v61, 5  ;;  %v778_v24 = vld [vmem:[%s3812_s20 + $0x10] sm:$0xe]  ;;  %v3638_v0 = vld [vmem:[%s4535_s1 + $0x1c0] sm:$0xff]  }
  0x53   : > { %3367 = vmatpush3.bf16.msra.mxu0 %v3611_v31  ;;  %3257 = vmatmul.mubr.bf16.gmra.mrb[4].mxu1 %v2786_v10  ;;  %v1287_v32 = vsel %vm3892_vm2, %v1282_v34, %v1286_v2  ;;  %v1489_v5 = vsel %vm4066_vm5, %v2936_v50, %v1488_v30  ;;  %v810_v10 = vsel %vm4066_vm5, %v2808_v15, %v809_v35  ;;  %v779_v61 = vld [vmem:[%s3812_s20 + $0x18] sm:$0xe]  ;;  %v2809_v26 = vrot.slane %v778_v24, 9  ;;  %v3628_v34 = vld [vmem:[%s4535_s1 + $0xa8] sm:$0xff]   ;;  %v4214_v60 = vld [vmem:[%s3812_s20 + $0x1c] sm:$0x1] }
  0x54   : > { %3368 = vmatprep.subr.bf16.mxu0 %v3613_v59  ;;  %3274 = vmatprep.subr.bf16.mxu1 %v3614_v7  ;;  %v2914_v40 = vcombine.low %v1273_v22, %v1287_v32  ;;  %v1481_v31 = vsel %vm4066_vm5, %v2934_v38, %v1480_v23  ;;  %v1485_v4 = vsel %vm4066_vm5, %v2935_v49, %v1484_v46  ;;  %v3637_v33 = vld [vmem:[%s3812_s20 + $0x10] ss:$8 sps:$4 sm:$0xff]   ;;  %v781_v38 = vld [vmem:[%s3812_s20 + $0x28] sm:$0xe]  ;;  %v829_v46 = vrot.slane %v4014_v53, 5 }
  0x55   : > { %3276 = vmatprep.mubr.bf16.mxu1 %v2795_v20  ;;  %v2956_v48 = vcombine.low %v1477_v43, %v1481_v31  ;;  %v2957_v28 = vcombine.low %v1485_v4, %v1489_v5  ;;  %v806_v20 = vsel %vm4066_vm5, %v2807_v57, %v805_v56  ;;  %v814_v12 = vsel %vm4066_vm5, %v2809_v26, %v813_v18  ;;  %v3631_v32 = vld [vmem:[%s4535_s1 + $0xb0] sm:$0xff]   ;;  %v783_v56 = vld [vmem:[%s3812_s20 + $0x38] sm:$0xe]  ;;  %v3640_v53 = vld [vmem:[%s4535_s1 + $0xc8] sm:$0xff]  }
  0x56   : > { %3275 = vmatpush3.bf16.msra.mxu1 %v3614_v7  ;;  %3353 = vmatmul.mubr.bf16.gmra.mrb[4].mxu0 %v2914_v40  ;;  %v1497_v7 = vsel %vm4066_vm5, %v2938_v8, %v1496_v25  ;;  %v2831_v2 = vcombine.low %v806_v20, %v810_v10  ;;  %v3634_v40 = vld [vmem:[%s4535_s1 + $0xb8] sm:$0xff]   ;;  %v2812_v43 = vrot.slane %v781_v38, 9  ;;  %v825_v31 = vrot.slane %v3974_v3, 5  ;;  %v3639_v50 = vld [vmem:[%s3812_s20 + $0x20] ss:$8 sps:$4 sm:$0xff]   ;;  %v3642_v17 = vld [vmem:[%s4535_s1 + $0xd0] sm:$0xff]  }
  0x57   : > { %3369 = vmatpush3.bf16.msra.mxu0 %v3613_v59  ;;  %3284 = vmatprep.subr.bf16.mxu1 %v3617_v36  ;;  %v2929_v59 = vld [vmem:[%s3812_s20 + $0x38] sm:$0xe]  ;;  %v2814_v14 = vrot.slane %v783_v56, 9  ;;  %v1863_v18 = vshll.u32 %v4214_v60, 16  ;;  %v3643_v24 = vld [vmem:[%s4535_s1 + $0x1d0] sm:$0xff]   ;;  %v3646_v26 = vld [vmem:[%s4535_s1 + $0xe0] sm:$0xff]  }
  0x58   : > { %3370 = vmatprep.subr.bf16.mxu0 %v3615_v29  ;;  %3372 = vmatprep.mubr.bf16.mxu0 %v2955_v58  ;;  %v2937_v6 = vrot.slane %v2929_v59, 9  ;;  %v3629_v58 = vld [vmem:[%s4535_s1 + $0x1a8] sm:$0xff]   ;;  %v826_v3 = vsel %vm4066_vm5, %v2812_v43, %v825_v31  ;;  %v3635_v30 = vld [vmem:[%s4535_s1 + $0x1b8] sm:$0xff]  }
  0x59   : > { %v3005_v59 = vld [vmem:[%s3812_s20 + $0x18] sm:$0xf]  ;;  %v4255_v31 = vld [vmem:[%s3812_s20 + $0x2c] sm:$0x1] }
  0x5a   : > { %v1493_v51 = vsel %vm4066_vm5, %v2937_v6, %v1492_v54  ;;  %v3003_v54 = vld [vmem:[%s3812_s20 + $0x10] sm:$0xf]  ;;  %v1854_v8 = vshrl.u32 %v3005_v59, 16  ;;  %v1857_v35 = vshll.u32 %v3005_v59, 16 }
  0x5b   : > { %3371 = vmatpush3.bf16.msra.mxu0 %v3615_v29  ;;  %3277 = vmatmul.mubr.bf16.vlgmr.msra.gmra.mrb[0].mxu1 %v2796_v41  ;;  %v2958_v23 = vcombine.low %v1493_v51, %v1497_v7  ;;  %v2810_v29 = vrot.slane %v779_v61, 9  ;;  %v2811_v41 = vrot.slane %v780_v37, 9  ;;  %v1840_v4 = vshrl.u32 %v3003_v54, 16  ;;  %v3651_v7 = vld [vmem:[%s3812_s20 + $0x30] ss:$8 sps:$4 sm:$0xff]  }
  0x5c   : > { %3380 = vmatprep.subr.bf16.mxu0 %v3618_v42  ;;  %3285 = vmatpush3.bf16.msra.mxu1 %v3617_v36  ;;  %v3627_v36 = vld [vmem:[%s4535_s1 + $0x1a0] sm:$0xff]   ;;  %v1843_v5 = vshll.u32 %v3003_v54, 16  ;;  %v1856_v16 = vrot.slane %v1854_v8, 4  ;;  %v1859_v57 = vrot.slane %v1857_v35, 5  ;;  %v3017_v8 = vld [vmem:[%s3812_s20 + $0x48] sm:$0xf] }
  0x5d   : > { %3286 = vmatprep.subr.bf16.mxu1 %v3620_v44  ;;  %3280 = vmatprep.mubr.bf16.mxu1 %v2797_v52  ;;  %v818_v13 = vsel %vm4066_vm5, %v2810_v29, %v817_v55  ;;  %v782_v52 = vld [vmem:[%s3812_s20 + $0x30] sm:$0xe]  ;;  %v3653_v29 = vld [vmem:[%s3812_s20 + $0x40] ss:$8 sps:$4 sm:$0xff]   ;;  %v4249_v37 = vld [vmem:[%s3812_s20 + $0x24] sm:$0x1] }
  0x5e   : > { %3373 = vmatmul.mubr.bf16.vlgmr.msra.gmra.mrb[0].mxu0 %v2956_v48  ;;  %v2832_v22 = vcombine.low %v814_v12, %v818_v13  ;;  %v833_v48 = vrot.slane %v4023_v62, 5  ;;  %v4206_v62 = vld [vmem:[%s3812_s20 + $0x14] sm:$0x1]  ;;  %v1845_v51 = vrot.slane %v1843_v5, 5  ;;  %v1860_v20 = vor.u32 %v1859_v57, %v1856_v16  ;;  %v3009_v13 = vld [vmem:[%s3812_s20 + $0x28] sm:$0xf] }
  0x5f   : > { %3381 = vmatpush3.bf16.msra.mxu0 %v3618_v42  ;;  %3376 = vmatprep.mubr.bf16.mxu0 %v2957_v28  ;;  %v821_v42 = vrot.slane %v3971_v1, 5  ;;  %v1849_v6 = vshll.u32 %v4206_v62, 16  ;;  %v3641_v28 = vld [vmem:[%s4535_s1 + $0x1c8] sm:$0xff]   ;;  %v1882_v38 = vshrl.u32 %v3009_v13, 16  ;;  %v1877_v56 = vshll.u32 %v4249_v37, 16  ;;  %v3652_v35 = vld [vmem:[%s4535_s1 + $0x1f0] sm:$0xff]  }
  0x60   : > { %3287 = vmatpush3.bf16.msra.mxu1 %v3620_v44  ;;  %3382 = vmatprep.subr.bf16.mxu0 %v3621_v63  ;;  %v3632_v44 = vld [vmem:[%s4535_s1 + $0x1b0] sm:$0xff]   ;;  %v1861_v61 = vrot.slane %v1860_v20, 4  ;;  %v1938_v20 = vshrl.u32 %v3017_v8, 16 }
  0x61   : > { %3288 = vmatprep.subr.bf16.mxu1 %v3622_v45  ;;  %v822_v1 = vsel %vm4066_vm5, %v2811_v41, %v821_v42  ;;  %v1851_v55 = vrot.slane %v1849_v6, 5  ;;  %v3647_v41 = vld [vmem:[%s4535_s1 + $0x1e0] sm:$0xff]  }
  0x62   : > { %v2833_v49 = vcombine.low %v822_v1, %v826_v3  ;;  %v1891_v3 = vshll.u32 %v4255_v31, 16 }
  0x63   : > { %3281 = vmatmul.mubr.bf16.gmra.mrb[4].mxu1 %v2798_v27  ;;  %3383 = vmatpush3.bf16.msra.mxu0 %v3621_v63  ;;  %v2813_v63 = vrot.slane %v782_v52, 9  ;;  %v834_v27 = vsel %vm4066_vm5, %v2814_v14, %v833_v48  ;;  %v3654_v48 = vld [vmem:[%s4535_s1 + $0xf8] sm:$0xff]   ;;  %v4270_v14 = vld [vmem:[%s3812_s20 + $0x34] sm:$0x1] }
  0x64   : > { %3289 = vmatpush3.bf16.msra.mxu1 %v3622_v45  ;;  %3384 = vmatprep.subr.bf16.mxu0 %v3623_v11  ;;  %v3636_v45 = vld [vmem:[%s4535_s1 + $0xc0] sm:$0xff]   ;;  %v1905_v5 = vshll.u32 %v4270_v14, 16 }
  0x65   : > { %3290 = vmatprep.subr.bf16.mxu1 %v3624_v47  ;;  %3300 = vmatprep.mubr.bf16.mxu1 %v2831_v2  ;;  %v830_v25 = vsel %vm4066_vm5, %v2813_v63, %v829_v46  ;;  %v3007_v2 = vld [vmem:[%s3812_s20 + $0x20] sm:$0xf]  ;;  %v3649_v46 = vld [vmem:[%s4535_s1 + $0x1e8] sm:$0xff]  }
  0x66   : > { %3377 = vmatmul.mubr.bf16.gmra.mrb[4].mxu0 %v2958_v23  ;;  %v3644_v23 = vld [vmem:[%s4535_s1 + $0xd8] sm:$0xff]  }
  0x67   : > { %3385 = vmatpush3.bf16.msra.mxu0 %v3623_v11  ;;  %3396 = vmatprep.mubr.bf16.mxu0 %v3637_v33  ;;  %v2834_v11 = vcombine.low %v830_v25, %v834_v27  ;;  %v3015_v27 = vld [vmem:[%s3812_s20 + $0x40] sm:$0xf] }
  0x68   : > { %3291 = vmatpush3.bf16.msra.mxu1 %v3624_v47  ;;  %3386 = vmatprep.subr.bf16.mxu0 %v3625_v21  ;;  %v1842_v47 = vrot.slane %v1840_v4, 4  ;;  %v1893_v4 = vrot.slane %v1891_v3, 5  ;;  %v1924_v57 = vshrl.u32 %v3015_v27, 16  ;;  %v3048_v3 = vld [vmem:[%s3812_s20 + $0x18] sm:$0xe] }
  0x69   : > { %3292 = vmatprep.subr.bf16.mxu1 %v3626_v19 }
  0x6a   : > { %v1846_v15 = vor.u32 %v1845_v51, %v1842_v47  ;;  %v3659_v51 = vld [vmem:[%s4539_s5] sm:$0xff]  }
  0x6b   : > { %3387 = vmatpush3.bf16.msra.mxu0 %v3625_v21  ;;  %v1865_v21 = vrot.slane %v1863_v18, 5 }
  0x6c   : > { %3293 = vmatpush3.bf16.msra.mxu1 %v3626_v19  ;;  %3388 = vmatprep.subr.bf16.mxu0 %v3627_v36  ;;  %v3656_v19 = vld [vmem:[%s3812_s20 + $0x8] ss:$8 sps:$4 sm:$0xff]   ;;  %v1847_v10 = vrot.slane %v1846_v15, 4  ;;  %v3655_v15 = vld [vmem:[%s4535_s1 + $0x1f8] sm:$0xff]  }
  0x6d   : > { %3294 = vmatprep.subr.bf16.mxu1 %v3628_v34  ;;  %v1866_v12 = vsel %vm3892_vm2, %v1861_v61, %v1865_v21  ;;  %v1941_v21 = vshll.u32 %v3017_v8, 16  ;;  %v1926_v61 = vrot.slane %v1924_v57, 4  ;;  %v3675_v57 = vld [vmem:[%s4539_s5 + $0x38] sm:$0xff]  }
  0x6e   : > { %v1852_v33 = vsel %vm3892_vm2, %v1847_v10, %v1851_v55 }
  0x6f   : > { %3389 = vmatpush3.bf16.msra.mxu0 %v3627_v36  ;;  %v3645_v36 = vld [vmem:[%s4535_s1 + $0x1d8] sm:$0xff]  }
  0x70   : > { %3295 = vmatpush3.bf16.msra.mxu1 %v3628_v34  ;;  %3390 = vmatprep.subr.bf16.mxu0 %v3629_v58  ;;  %v1871_v34 = vshll.u32 %v3007_v2, 16 }
  0x71   : > { %3296 = vmatprep.subr.bf16.mxu1 %v3631_v32 }
  0x72   : > { %v1873_v43 = vrot.slane %v1871_v34, 5 }
  0x73   : > { %3391 = vmatpush3.bf16.msra.mxu0 %v3629_v58  ;;  %v3648_v58 = vld [vmem:[%s4535_s1 + $0xe8] sm:$0xff]  }
  0x74   : > { %3297 = vmatpush3.bf16.msra.mxu1 %v3631_v32  ;;  %3392 = vmatprep.subr.bf16.mxu0 %v3632_v44  ;;  %v3035_v32 = vcombine.low %v1852_v33, %v1866_v12  ;;  %v1940_v33 = vrot.slane %v1938_v20, 4  ;;  %v1943_v12 = vrot.slane %v1941_v21, 5  ;;  %v3051_v20 = vld [vmem:[%s3812_s20 + $0x30] sm:$0xe]  ;;  %v3052_v21 = vld [vmem:[%s3812_s20 + $0x38] sm:$0xe] }
  0x75   : > { %3298 = vmatprep.subr.bf16.mxu1 %v3634_v40 }
  0x77   : > { %3393 = vmatpush3.bf16.msra.mxu0 %v3632_v44  ;;  %v1884_v44 = vrot.slane %v1882_v38, 4 }
  0x78   : > { %3299 = vmatpush3.bf16.msra.mxu1 %v3634_v40  ;;  %3394 = vmatprep.subr.bf16.mxu0 %v3635_v30  ;;  %v1885_v40 = vshll.u32 %v3009_v13, 16 }
  0x79   : > { %3308 = vmatprep.subr.bf16.mxu1 %v3636_v45 }
  0x7a   : > { %v1887_v52 = vrot.slane %v1885_v40, 5 }
  0x7b   : > { %3301 = vmatmul.mubr.bf16.vlgmr.msra.gmra.mrb[0].mxu1 %v2832_v22  ;;  %3395 = vmatpush3.bf16.msra.mxu0 %v3635_v30  ;;  %v1868_v22 = vshrl.u32 %v3007_v2, 16  ;;  %v3011_v30 = vld [vmem:[%s3812_s20 + $0x30] sm:$0xf] }
  0x7c   : > { %3309 = vmatpush3.bf16.msra.mxu1 %v3636_v45  ;;  %3304 = vmatprep.mubr.bf16.mxu1 %v2833_v49  ;;  %v3650_v45 = vld [vmem:[%s4535_s1 + $0xf0] sm:$0xff]   ;;  %v1888_v63 = vor.u32 %v1887_v52, %v1884_v44  ;;  %v4274_v49 = vld [vmem:[%s3812_s20 + $0x3c] sm:$0x1]  ;;  %v1899_v54 = vshll.u32 %v3011_v30, 16 }
  0x7d   : > { %3310 = vmatprep.subr.bf16.mxu1 %v3640_v53  ;;  %3404 = vmatprep.subr.bf16.mxu0 %v3638_v0  ;;  %v1870_v42 = vrot.slane %v1868_v22, 4  ;;  %v1919_v47 = vshll.u32 %v4274_v49, 16  ;;  %v3665_v44 = vld [vmem:[%s4539_s5 + $0x10] sm:$0xff]  }
  0x7e   : > { %3397 = vmatmul.mubr.bf16.vlgmr.msra.gmra.mrb[0].mxu0 %v3639_v50  ;;  %v1896_v50 = vshrl.u32 %v3011_v30, 16 }
  0x7f   : > { %3405 = vmatpush3.bf16.msra.mxu0 %v3638_v0  ;;  %3400 = vmatprep.mubr.bf16.mxu0 %v3651_v7  ;;  %v1874_v1 = vor.u32 %v1873_v43, %v1870_v42  ;;  %v3013_v0 = vld [vmem:[%s3812_s20 + $0x38] sm:$0xf]  ;;  %v1889_v7 = vrot.slane %v1888_v63, 4  ;;  %v3658_v43 = vld [vmem:[%s4535_s1 + $0x200] sm:$0xff]  }
  0x80   : > { %3311 = vmatpush3.bf16.msra.mxu1 %v3640_v53  ;;  %3406 = vmatprep.subr.bf16.mxu0 %v3641_v28  ;;  %v1879_v53 = vrot.slane %v1877_v56, 5  ;;  %v1910_v25 = vshrl.u32 %v3013_v0, 16  ;;  %v1913_v6 = vshll.u32 %v3013_v0, 16  ;;  %v1898_v18 = vrot.slane %v1896_v50, 4  ;;  %v3660_v0 = vld [vmem:[%s4535_s1 + $0x208] sm:$0xff]  }
  0x81   : > { %3312 = vmatprep.subr.bf16.mxu1 %v3642_v17  ;;  %v1875_v59 = vrot.slane %v1874_v1, 4  ;;  %v3047_v1 = vld [vmem:[%s3812_s20 + $0x10] sm:$0xe] }
  0x82   : > { %v1915_v16 = vrot.slane %v1913_v6, 5 }
  0x83   : > { %3305 = vmatmul.mubr.bf16.gmra.mrb[4].mxu1 %v2834_v11  ;;  %3407 = vmatpush3.bf16.msra.mxu0 %v3641_v28  ;;  %v1901_v28 = vrot.slane %v1899_v54, 5  ;;  %v1927_v11 = vshll.u32 %v3015_v27, 16  ;;  %v1880_v34 = vsel %vm3892_vm2, %v1875_v59, %v1879_v53  ;;  %v3663_v53 = vld [vmem:[%s3812_s20 + $0x38] ss:$8 sps:$4 sm:$0xff]   ;;  %v3055_v54 = vrot.slane %v3047_v1, 9 }
  0x84   : > { %3313 = vmatpush3.bf16.msra.mxu1 %v3642_v17  ;;  %3324 = vmatprep.mubr.bf16.mxu1 %v3656_v19  ;;  %v1912_v17 = vrot.slane %v1910_v25, 4  ;;  %v4290_v19 = vld [vmem:[%s3812_s20 + $0x44] sm:$0x1]  ;;  %v2131_v25 = vrot.slane %v4206_v62, 5  ;;  %v3056_v27 = vrot.slane %v3048_v3, 9  ;;  %v2135_v59 = vrot.slane %v4214_v60, 5 }
  0x85   : > { %3314 = vmatprep.subr.bf16.mxu1 %v3644_v23  ;;  %3408 = vmatprep.subr.bf16.mxu0 %v3643_v24  ;;  %v1902_v55 = vor.u32 %v1901_v28, %v1898_v18  ;;  %v1929_v2 = vrot.slane %v1927_v11, 5  ;;  %v1933_v40 = vshll.u32 %v4290_v19, 16  ;;  %v3664_v62 = vld [vmem:[%s4535_s1 + $0x210] sm:$0xff]   ;;  %v3666_v28 = vld [vmem:[%s4535_s1 + $0x218] sm:$0xff]  }
  0x86   : > { %3401 = vmatmul.mubr.bf16.gmra.mrb[4].mxu0 %v3653_v29  ;;  %v1916_v10 = vor.u32 %v1915_v16, %v1912_v17  ;;  %v1921_v29 = vrot.slane %v1919_v47, 5  ;;  %v2132_v60 = vsel %vm4066_vm5, %v3055_v54, %v2131_v25  ;;  %v3671_v47 = vld [vmem:[%s4539_s5 + $0x28] sm:$0xff]   ;;  %v3672_v11 = vld [vmem:[%s4535_s1 + $0x230] sm:$0xff]  }
  0x87   : > { %3409 = vmatpush3.bf16.msra.mxu0 %v3643_v24  ;;  %3420 = vmatprep.mubr.bf16.mxu0 %v3035_v32  ;;  %v4294_v24 = vld [vmem:[%s3812_s20 + $0x4c] sm:$0x1]  ;;  %v1903_v13 = vrot.slane %v1902_v55, 4  ;;  %v3662_v32 = vld [vmem:[%s3812_s20 + $0x28] ss:$8 sps:$4 sm:$0xff]   ;;  %v1930_v38 = vor.u32 %v1929_v2, %v1926_v61  ;;  %v1935_v30 = vrot.slane %v1933_v40, 5 }
  0x88   : > { %3315 = vmatpush3.bf16.msra.mxu1 %v3644_v23  ;;  %3410 = vmatprep.subr.bf16.mxu0 %v3645_v36  ;;  %v3657_v23 = vld [vmem:[%s3812_s20 + $0x18] ss:$8 sps:$4 sm:$0xff]   ;;  %v1917_v22 = vrot.slane %v1916_v10, 4  ;;  %v1947_v42 = vshll.u32 %v4294_v24, 16  ;;  %v3670_v16 = vld [vmem:[%s4535_s1 + $0x228] sm:$0xff]   ;;  %v2139_v10 = vrot.slane %v4249_v37, 5 }
  0x89   : > { %3316 = vmatprep.subr.bf16.mxu1 %v3646_v26  ;;  %v3050_v55 = vld [vmem:[%s3812_s20 + $0x28] sm:$0xe]  ;;  %v2143_v2 = vrot.slane %v4255_v31, 5 }
  0x8a   : > { %v1922_v56 = vsel %vm3892_vm2, %v1917_v22, %v1921_v29  ;;  %v1949_v63 = vrot.slane %v1947_v42, 5  ;;  %v3058_v61 = vrot.slane %v3050_v55, 9  ;;  %v3059_v29 = vrot.slane %v3051_v20, 9  ;;  %v3677_v22 = vld [vmem:[%s3817_s23 + $0x100] ss:$8 sps:$4 sm:$0xff]  }
  0x8b   : > { %3411 = vmatpush3.bf16.msra.mxu0 %v3645_v36  ;;  %v1894_v36 = vsel %vm3892_vm2, %v1889_v7, %v1893_v4  ;;  %v3676_v4 = vld [vmem:[%s3817_s23 + $0xf0] ss:$8 sps:$4 sm:$0xff]  }
  0x8c   : > { %3317 = vmatpush3.bf16.msra.mxu1 %v3646_v26  ;;  %3412 = vmatprep.subr.bf16.mxu0 %v3647_v41  ;;  %v1907_v26 = vrot.slane %v1905_v5, 5  ;;  %v3667_v5 = vld [vmem:[%s4539_s5 + $0x18] sm:$0xff]   ;;  %v3673_v7 = vld [vmem:[%s4539_s5 + $0x30] sm:$0xff]   ;;  %v2144_v31 = vsel %vm4066_vm5, %v3058_v61, %v2143_v2 }
  0x8d   : > { %3318 = vmatprep.subr.bf16.mxu1 %v3648_v58 }
  0x8e   : > { %v1908_v52 = vsel %vm3892_vm2, %v1903_v13, %v1907_v26  ;;  %v3674_v26 = vld [vmem:[%s4535_s1 + $0x238] sm:$0xff]   ;;  %v2151_v13 = vrot.slane %v4274_v49, 5  ;;  %v3054_v49 = vld [vmem:[%s3812_s20 + $0x48] sm:$0xe] }
  0x8f   : > { %3413 = vmatpush3.bf16.msra.mxu0 %v3647_v41  ;;  %v1944_v41 = vor.u32 %v1943_v12, %v1940_v33  ;;  %v3037_v50 = vcombine.low %v1908_v52, %v1922_v56  ;;  %v2147_v33 = vrot.slane %v4270_v14, 5  ;;  %v3060_v12 = vrot.slane %v3052_v21, 9 }
  0x90   : > { %3319 = vmatpush3.bf16.msra.mxu1 %v3648_v58  ;;  %3414 = vmatprep.subr.bf16.mxu0 %v3649_v46  ;;  %v3661_v58 = vld [vmem:[%s4539_s5 + $0x8] sm:$0xff]   ;;  %v3062_v42 = vrot.slane %v3054_v49, 9 }
  0x91   : > { %3320 = vmatprep.subr.bf16.mxu1 %v3650_v45  ;;  %v2152_v14 = vsel %vm4066_vm5, %v3060_v12, %v2151_v13 }
  0x93   : > { %3415 = vmatpush3.bf16.msra.mxu0 %v3649_v46  ;;  %v1931_v46 = vrot.slane %v1930_v38, 4  ;;  %v2155_v38 = vrot.slane %v4290_v19, 5 }
  0x94   : > { %3321 = vmatpush3.bf16.msra.mxu1 %v3650_v45  ;;  %3416 = vmatprep.subr.bf16.mxu0 %v3652_v35  ;;  %v3036_v45 = vcombine.low %v1880_v34, %v1894_v36  ;;  %v3678_v34 = vld [vmem:[%s3817_s23 + $0x110] ss:$8 sps:$4 sm:$0xff]   ;;  %v2148_v36 = vsel %vm4066_vm5, %v3059_v29, %v2147_v33 }
  0x95   : > { %3322 = vmatprep.subr.bf16.mxu1 %v3654_v48  ;;  %v1936_v6 = vsel %vm3892_vm2, %v1931_v46, %v1935_v30  ;;  %v3081_v40 = vcombine.low %v2148_v36, %v2152_v14 }
  0x97   : > { %3417 = vmatpush3.bf16.msra.mxu0 %v3652_v35  ;;  %v2136_v35 = vsel %vm4066_vm5, %v3056_v27, %v2135_v59 }
  0x98   : > { %3323 = vmatpush3.bf16.msra.mxu1 %v3654_v48  ;;  %3418 = vmatprep.subr.bf16.mxu0 %v3655_v15  ;;  %v1945_v48 = vrot.slane %v1944_v41, 4  ;;  %v3079_v17 = vcombine.low %v2132_v60, %v2136_v35 }
  0x99   : > { %3452 = vmatprep.subr.bf16.mxu1 %v3659_v51 }
  0x9a   : > { %v1950_v8 = vsel %vm3892_vm2, %v1945_v48, %v1949_v63 }
  0x9b   : > { %3325 = vmatmul.mubr.bf16.vlgmr.msra.gmra.mrb[0].mxu1 %v3657_v23  ;;  %3419 = vmatpush3.bf16.msra.mxu0 %v3655_v15  ;;  %v3038_v18 = vcombine.low %v1936_v6, %v1950_v8  ;;  %v3049_v15 = vld [vmem:[%s3812_s20 + $0x20] sm:$0xe] }
  0x9c   : > { %3453 = vmatpush3.bf16.msra.mxu1 %v3659_v51  ;;  %3328 = vmatprep.mubr.bf16.mxu1 %v3662_v32  ;;  %v3668_v51 = vld [vmem:[%s4535_s1 + $0x220] sm:$0xff]   ;;  %v3057_v23 = vrot.slane %v3049_v15, 9 }
  0x9d   : > { %3454 = vmatprep.subr.bf16.mxu1 %v3661_v58  ;;  %3428 = vmatprep.subr.bf16.mxu0 %v3658_v43  ;;  %v3053_v32 = vld [vmem:[%s3812_s20 + $0x40] sm:$0xe] }
  0x9e   : > { %3421 = vmatmul.mubr.bf16.vlgmr.msra.gmra.mrb[0].mxu0 %v3036_v45  ;;  %v2140_v37 = vsel %vm4066_vm5, %v3057_v23, %v2139_v10  ;;  %v3061_v41 = vrot.slane %v3053_v32, 9 }
  0x9f   : > { %3429 = vmatpush3.bf16.msra.mxu0 %v3658_v43  ;;  %3424 = vmatprep.mubr.bf16.mxu0 %v3037_v50  ;;  %v2159_v43 = vrot.slane %v4294_v24, 5 }
  0xa0   : > { %3455 = vmatpush3.bf16.msra.mxu1 %v3661_v58  ;;  %3430 = vmatprep.subr.bf16.mxu0 %v3660_v0  ;;  %v3080_v58 = vcombine.low %v2140_v37, %v2144_v31  ;;  %v2156_v52 = vsel %vm4066_vm5, %v3061_v41, %v2155_v38  ;;  %v3725_v38 = vmov (!%p3111_p9), 0.0  }
  0xa1   : > { %3456 = vmatprep.subr.bf16.mxu1 %v3665_v44  ;;  %v2160_v56 = vsel %vm4066_vm5, %v3062_v42, %v2159_v43  ;;  %2560 = vst [vmem:[%s3807_s17] sm:$0xff] (!%p3111_p9), %v3725_v38  ;;  %2561 = vst [vmem:[%s3807_s17 + $0x8] sm:$0xff] (!%p3111_p9), %v3725_v38 }
  0xa2   : > { %v3082_v45 = vcombine.low %v2156_v52, %v2160_v56  ;;  %2562 = vst [vmem:[%s3807_s17 + $0x10] sm:$0xff] (!%p3111_p9), %v3725_v38  ;;  %2563 = vst [vmem:[%s3807_s17 + $0x18] sm:$0xff] (!%p3111_p9), %v3725_v38 }
  0xa3   : > { %3329 = vmatmul.mubr.bf16.gmra.mrb[4].mxu1 %v3663_v53  ;;  %3431 = vmatpush3.bf16.msra.mxu0 %v3660_v0  ;;  %2564 = vst [vmem:[%s3807_s17 + $0x20] sm:$0xff] (!%p3111_p9), %v3725_v38  ;;  %2565 = vst [vmem:[%s3807_s17 + $0x28] sm:$0xff] (!%p3111_p9), %v3725_v38 }
  0xa4   : > { %3457 = vmatpush3.bf16.msra.mxu1 %v3665_v44  ;;  %3468 = vmatprep.mubr.bf16.mxu1 %v3676_v4  ;;  %v3679_v44 = vld [vmem:[%s3817_s23 + $0x120] ss:$8 sps:$4 sm:$0xff]   ;;  %2566 = vst [vmem:[%s3807_s17 + $0x30] sm:$0xff] (!%p3111_p9), %v3725_v38  ;;  %2567 = vst [vmem:[%s3807_s17 + $0x38] sm:$0xff] (!%p3111_p9), %v3725_v38 }
  0xa5   : > { %3458 = vmatprep.subr.bf16.mxu1 %v3667_v5  ;;  %3432 = vmatprep.subr.bf16.mxu0 %v3664_v62 }
  0xa6   : > { %3425 = vmatmul.mubr.bf16.gmra.mrb[4].mxu0 %v3038_v18 }
  0xa7   : > { %3433 = vmatpush3.bf16.msra.mxu0 %v3664_v62  ;;  %3444 = vmatprep.mubr.bf16.mxu0 %v3079_v17 }
  0xa8   : > { %3459 = vmatpush3.bf16.msra.mxu1 %v3667_v5  ;;  %3434 = vmatprep.subr.bf16.mxu0 %v3666_v28 }
  0xa9   : > { %3460 = vmatprep.subr.bf16.mxu1 %v3669_v39 }
  0xab   : > { %3435 = vmatpush3.bf16.msra.mxu0 %v3666_v28 }
  0xac   : > { %3461 = vmatpush3.bf16.msra.mxu1 %v3669_v39  ;;  %3436 = vmatprep.subr.bf16.mxu0 %v3668_v51 }
  0xad   : > { %3462 = vmatprep.subr.bf16.mxu1 %v3671_v47 }
  0xaf   : > { %3437 = vmatpush3.bf16.msra.mxu0 %v3668_v51 }
  0xb0   : > { %3463 = vmatpush3.bf16.msra.mxu1 %v3671_v47  ;;  %3438 = vmatprep.subr.bf16.mxu0 %v3670_v16 }
  0xb1   : > { %3464 = vmatprep.subr.bf16.mxu1 %v3673_v7 }
  0xb3   : > { %3439 = vmatpush3.bf16.msra.mxu0 %v3670_v16 }
  0xb4   : > { %3465 = vmatpush3.bf16.msra.mxu1 %v3673_v7  ;;  %3440 = vmatprep.subr.bf16.mxu0 %v3672_v11 }
  0xb5   : > { %3466 = vmatprep.subr.bf16.mxu1 %v3675_v57 }
  0xb7   : > { %3441 = vmatpush3.bf16.msra.mxu0 %v3672_v11 }
  0xb8   : > { %3467 = vmatpush3.bf16.msra.mxu1 %v3675_v57  ;;  %3442 = vmatprep.subr.bf16.mxu0 %v3674_v26 }
  0xbb   : > { %3469 = vmatmul.mubr.bf16.vlgmr.msra.gmra.mrb[8].mxu1 %v3677_v22  ;;  %3443 = vmatpush3.bf16.msra.mxu0 %v3674_v26 }
  0xbc   : > { %3472 = vmatprep.mubr.bf16.mxu1 %v3678_v34 }
  0xbe   : > { %3445 = vmatmul.mubr.bf16.vlgmr.msra.gmra.mrb[0].mxu0 %v3080_v58 }
  0xbf   : > { %3448 = vmatprep.mubr.bf16.mxu0 %v3081_v40 }
  0xc3   : > { %3473 = vmatmul.mubr.bf16.gmra.mrb[12].mxu1 %v3679_v44 }
  0xc6   : > { %3449 = vmatmul.mubr.bf16.gmra.mrb[4].mxu0 %v3082_v45 }
 0x16e   : > { %v3326_v1 = vpop.f32.mrb[0].mxu1 }
 0x16f   : > { %v1121_v19 = vpop.f32.mrb[1].mxu1 }
 0x170   : > { %v3327_v3 = vpop.f32.mrb[2].mxu1 }
 0x171   : > { %v1124_v46 = vpop.f32.mrb[3].mxu1 }
 0x176   : > { %v3330_v30 = vpop.f32.mrb[4].mxu1 }
 0x177   : > { %v1137_v48 = vpop.f32.mrb[5].mxu1 }
 0x178   : > { %v3331_v63 = vpop.f32.mrb[6].mxu1 }
 0x179   : > { %v1140_v24 = vpop.f32.mrb[7].mxu1 }
 0x18e   : > { %v4393_v0 = vpop.f32.mrb[8].mxu1 }
 0x18f   : > { %v4395_v53 = vpop.f32.mrb[9].mxu1  ;;  %v2539_v29 = vmul.f32 (!%p3111_p9), %v4393_v0, %v4393_v0 }
 0x190   : > { %v4397_v50 = vpop.f32.mrb[10].mxu1  ;;  %v2537_v2 = vmul.f32 (!%p3111_p9), %v4395_v53, %v4395_v53 }
 0x191   : > { %v4399_v54 = vpop.f32.mrb[11].mxu1  ;;  %v3446_v9 = vpop.f32.mrb[0].mxu0  ;;  %v2540_v37 = vmul.f32 (!%p3111_p9), %v4397_v50, %v4397_v50 }
 0x192   : > { %v4401_v25 = vadd.f32 %v3446_v9, %v3326_v1  ;;  %v2276_v27 = vpop.f32.mrb[1].mxu0  ;;  %v2521_v61 = vadd.f32 (!%p3111_p9), %v4399_v54, %v4395_v53  ;;  %v2538_v26 = vmul.f32 (!%p3111_p9), %v4399_v54, %v4399_v54 }
 0x193   : > { %v4403_v59 = vadd.f32 %v2276_v27, %v1121_v19  ;;  %v3447_v4 = vpop.f32.mrb[2].mxu0 }
 0x194   : > { %v4405_v5 = vadd.f32 %v3447_v4, %v3327_v3  ;;  %v2279_v6 = vpop.f32.mrb[3].mxu0  ;;  %v2499_v20 = vmul.f32 (!%p3111_p9), %v4401_v25, %v4401_v25  ;;  %v2522_v22 = vadd.f32 (!%p3111_p9), %v4393_v0, %v2521_v61  ;;  %v2545_v31 = vadd.f32 (!%p3111_p9), %v2538_v26, %v2537_v2 }
 0x195   : > { %v4409_v62 = vadd.f32 %v2279_v6, %v1124_v46  ;;  %v2497_v15 = vmul.f32 (!%p3111_p9), %v4403_v59, %v4403_v59 }
 0x196   : > { %v4407_v8 = vpop.f32.mrb[12].mxu1  ;;  %v2500_v23 = vmul.f32 (!%p3111_p9), %v4405_v5, %v4405_v5  ;;  %v2523_v32 = vadd.f32 (!%p3111_p9), %v4397_v50, %v2522_v22  ;;  %v2546_v58 = vadd.f32 (!%p3111_p9), %v2545_v31, %v2539_v29  ;;  %v2496_v31 = vld [vmem:[#allocation2 + $0x1] sm:$0x1] (!%p3111_p9) }
 0x197   : > { %v4411_v60 = vpop.f32.mrb[13].mxu1  ;;  %2479 = sbr.rel (%p3111_p9) target bundleno = 438 (0x1b6), region = 60  ;;  %v2481_v11 = vadd.f32 (!%p3111_p9), %v4409_v62, %v4403_v59  ;;  %v2498_v55 = vmul.f32 (!%p3111_p9), %v4409_v62, %v4409_v62  ;;  %v2543_v3 = vmul.f32 (!%p3111_p9), %v4407_v8, %v4407_v8 }
 0x198   : > { %v4413_v35 = vpop.f32.mrb[14].mxu1  ;;  %v2541_v49 = vmul.f32 (!%p3111_p9), %v4411_v60, %v4411_v60  ;;  %v2524_v43 = vadd.f32 (!%p3111_p9), %v2523_v32, %v4411_v60  ;;  %v2547_v52 = vadd.f32 (!%p3111_p9), %v2546_v58, %v2540_v37 }
 0x199   : > { %v4415_v18 = vpop.f32.mrb[15].mxu1  ;;  %v3450_v39 = vpop.f32.mrb[4].mxu0  ;;  %v2482_v21 = vadd.f32 (!%p3111_p9), %v4401_v25, %v2481_v11  ;;  %v2505_v10 = vadd.f32 (!%p3111_p9), %v2498_v55, %v2497_v15 }
 0x19a   : > { %v4417_v28 = vadd.f32 %v3450_v39, %v3330_v30  ;;  %v2292_v17 = vpop.f32.mrb[5].mxu0  ;;  %v2542_v44 = vmul.f32 (!%p3111_p9), %v4415_v18, %v4415_v18  ;;  %v2525_v19 = vadd.f32 (!%p3111_p9), %v2524_v43, %v4415_v18  ;;  %v2548_v46 = vadd.f32 (!%p3111_p9), %v2547_v52, %v2541_v49 }
 0x19b   : > { %v4419_v47 = vadd.f32 %v2292_v17, %v1137_v48  ;;  %v3451_v51 = vpop.f32.mrb[6].mxu0  ;;  %v2483_v33 = vadd.f32 (!%p3111_p9), %v4405_v5, %v2482_v21  ;;  %v2506_v13 = vadd.f32 (!%p3111_p9), %v2505_v10, %v2499_v20 }
 0x19c   : > { %v4421_v7 = vadd.f32 %v3451_v51, %v3331_v63  ;;  %v2295_v16 = vpop.f32.mrb[7].mxu0  ;;  %v2503_v41 = vmul.f32 (!%p3111_p9), %v4417_v28, %v4417_v28  ;;  %v2526_v63 = vadd.f32 (!%p3111_p9), %v4407_v8, %v2525_v19  ;;  %v2549_v9 = vadd.f32 (!%p3111_p9), %v2548_v46, %v2542_v44 }
 0x19d   : > { %v4423_v57 = vadd.f32 %v2295_v16, %v1140_v24  ;;  %v2501_v12 = vmul.f32 (!%p3111_p9), %v4419_v47, %v4419_v47  ;;  %v2484_v36 = vadd.f32 (!%p3111_p9), %v4419_v47, %v2483_v33  ;;  %v2507_v14 = vadd.f32 (!%p3111_p9), %v2506_v13, %v2500_v23 }
 0x19e   : > { %v2504_v45 = vmul.f32 %v4421_v7, %v4421_v7  ;;  %v2544_v24 = vmul.f32 %v4413_v35, %v4413_v35  ;;  %v2527_v6 = vadd.f32 %v4413_v35, %v2526_v63  ;;  %v2550_v39 = vadd.f32 %v2549_v9, %v2543_v3 }
 0x19f   : > { %v2502_v34 = vmul.f32 %v4423_v57, %v4423_v57  ;;  %v2485_v40 = vadd.f32 %v4423_v57, %v2484_v36  ;;  %v2508_v42 = vadd.f32 %v2507_v14, %v2501_v12  ;;  %v2480_v12 = vld [vmem:[#allocation2] sm:$0x1]  ;;  %v2520_v36 = vld [vmem:[#allocation2 + $0x2] sm:$0x1] }
 0x1a0   : > { %v2528_v16 = vrot.slane %v2527_v6, 4  ;;  %v2551_v11 = vadd.f32 %v2550_v39, %v2544_v24 }
 0x1a1   : > { %v2486_v56 = vadd.f32 %v4417_v28, %v2485_v40  ;;  %v2509_v1 = vadd.f32 %v2508_v42, %v2502_v34  ;;  %v2536_v42 = vld [vmem:[#allocation2 + $0x3] sm:$0x1] }
 0x1a2   : > { %v2529_v20 = vadd.f32 %v2528_v16, %v2527_v6  ;;  %v2552_v21 = vrot.slane %v2551_v11, 4 }
 0x1a3   : > { %v2487_v30 = vadd.f32 %v4421_v7, %v2486_v56  ;;  %v2510_v48 = vadd.f32 %v2509_v1, %v2503_v41 }
 0x1a4   : > { %v2530_v61 = vrot.slane %v2529_v20, 2  ;;  %v2553_v2 = vadd.f32 %v2552_v21, %v2551_v11 }
 0x1a5   : > { %v2488_v27 = vrot.slane %v2487_v30, 4  ;;  %v2511_v4 = vadd.f32 %v2510_v48, %v2504_v45 }
 0x1a6   : > { %v2531_v33 = vadd.f32 %v2530_v61, %v2529_v20  ;;  %v2554_v13 = vrot.slane %v2553_v2, 2 }
 0x1a7   : > { %v2489_v17 = vadd.f32 %v2488_v27, %v2487_v30  ;;  %v2512_v51 = vrot.slane %v2511_v4, 4 }
 0x1a8   : > { %v2532_v37 = vrot.slane %v2531_v33, 1  ;;  %v2555_v14 = vadd.f32 %v2554_v13, %v2553_v2 }
 0x1a9   : > { %v2490_v15 = vrot.slane %v2489_v17, 2  ;;  %v2513_v55 = vadd.f32 %v2512_v51, %v2511_v4 }
 0x1aa   : > { %v2533_v58 = vadd.f32 %v2532_v37, %v2531_v33  ;;  %v2556_v38 = vrot.slane %v2555_v14, 1 }
 0x1ab   : > { %v2491_v23 = vadd.f32 %v2490_v15, %v2489_v17  ;;  %v2514_v10 = vrot.slane %v2513_v55, 2 }
 0x1ac   : > { %v2534_v41 = vadd.f32 %v2533_v58, %v2520_v36  ;;  %v2557_v43 = vadd.f32 %v2556_v38, %v2555_v14 }
 0x1ad   : > { %v2492_v26 = vrot.slane %v2491_v23, 1  ;;  %v2515_v29 = vadd.f32 %v2514_v10, %v2513_v55 }
 0x1ae   : > { %2535 = vst [vmem:[#allocation2 + $0x2] sm:$0x1] %v2534_v41  ;;  %v2558_v44 = vadd.f32 %v2557_v43, %v2536_v42 }
 0x1af   : > { %v2493_v22 = vadd.f32 %v2492_v26, %v2491_v23  ;;  %v2516_v34 = vrot.slane %v2515_v29, 1 }
 0x1b0   : > { %2559 = vst [vmem:[#allocation2 + $0x3] sm:$0x1] %v2558_v44 }
 0x1b1   : > { %v2494_v32 = vadd.f32 %v2493_v22, %v2480_v12  ;;  %v2517_v49 = vadd.f32 %v2516_v34, %v2515_v29 }
 0x1b3   : > { %2495 = vst [vmem:[#allocation2] sm:$0x1] %v2494_v32  ;;  %v2518_v40 = vadd.f32 %v2517_v49, %v2496_v31 }
 0x1b5   : > { %2519 = vst [vmem:[#allocation2 + $0x1] sm:$0x1] %v2518_v40 }
 0x1b6 PF: > { %p3112_p10 = scmp.ne.s32.totalorder %s3710_s28, 1 }
 0x1b7   : > { %v2614_v19 = vld [vmem:[#allocation2 + $0x2] sm:$0x1] (!%p3112_p10)  ;;  %v2615_v3 = vld [vmem:[#allocation2 + $0x3] sm:$0x1] (!%p3112_p10)  ;;  %v2587_v17 = vlaneseq (!%p3112_p10)  ;;  %v2574_v16 = vld [vmem:[%s4536_s2] sm:$0x1] (!%p3112_p10) }
 0x1b8   : > { %2571 = sbr.rel (%p3112_p10) target bundleno = 488 (0x1e8), region = 64  ;;  %v2618_v46 = vmul.f32 (!%p3112_p10), 0.0078125, %v2614_v19  ;;  %v2619_v48 = vmul.f32 (!%p3112_p10), 0.0078125, %v2615_v3  ;;  %v2616_v15 = vld [vmem:[%s4540_s6] sm:$0x1] (!%p3112_p10) }
 0x1b9   : > { %v2588_v51 = vshrl.u32 (!%p3112_p10), %v2587_v17, 7  ;;  %v2575_v23 = vld [vmem:[%s4537_s3] sm:$0x1] (!%p3112_p10) }
 0x1ba   : > { %v2572_v52 = vld [vmem:[#allocation2] sm:$0x1] (!%p3112_p10)  ;;  %v2620_v63 = vmul.f32 (!%p3112_p10), %v2618_v46, %v2618_v46 }
 0x1bb   : > { %v2576_v45 = vmul.f32 (!%p3112_p10), 0.0078125, %v2572_v52  ;;  %v2589_v11 = vsub.s32 (!%p3112_p10), 0, %v2588_v51  ;;  %v2617_v26 = vld [vmem:[%s4541_s7] sm:$0x1] (!%p3112_p10) }
 0x1bc   : > { %v2573_v56 = vld [vmem:[#allocation2 + $0x1] sm:$0x1] (!%p3112_p10)  ;;  %v2621_v9 = vsub.f32 (!%p3112_p10), %v2619_v48, %v2620_v63 }
 0x1bd   : > { %v2577_v1 = vmul.f32 (!%p3112_p10), 0.0078125, %v2573_v56  ;;  %v2578_v30 = vmul.f32 (!%p3112_p10), %v2576_v45, %v2576_v45 }
 0x1be   : > { %v2622_v4 = vmax.f32 (!%p3112_p10), %v2621_v9, 0.0 }
 0x1bf   : > { %v2579_v24 = vsub.f32 %v2577_v1, %v2578_v30 }
 0x1c0   : > { %v2623_v39 = vadd.f32 1e-05, %v2622_v4 }
 0x1c1   : > { %v2580_v27 = vmax.f32 %v2579_v24, 0.0 }
 0x1c3   : > { %v2581_v6 = vadd.f32 1e-05, %v2580_v27 }
 0x1c5   : > { %3680 = vrsqrt.f32 %v2581_v6 }
 0x1c6   : > { %3682 = vrsqrt.f32 %v2623_v39 }
 0x1cf   : > { %v3681_v55 = vpop.eup %3680 }
 0x1d0   : > { %v3683_v20 = vpop.eup %3682  ;;  %v2583_v21 = vmul.f32 %v3681_v55, %v2574_v16 }
 0x1d1   : > { %v2625_v10 = vmul.f32 %v3683_v20, %v2616_v15 }
 0x1d2   : > { %v2584_v61 = vmul.f32 %v2583_v21, %v2576_v45  ;;  %v2590_v2 = vrot.slane %v2583_v21, %v2589_v11 }
 0x1d3   : > { %v2626_v29 = vmul.f32 %v2625_v10, %v2618_v46  ;;  %v2632_v33 = vrot.slane %v2625_v10, %v2589_v11 }
 0x1d4   : > { %v2585_v12 = vsub.f32 %v2575_v23, %v2584_v61  ;;  %v2592_v13 = vmul.f32 %v4403_v59, %v2590_v2  ;;  %v2593_v22 = vmul.f32 %v4409_v62, %v2590_v2  ;;  %v2594_v34 = vmul.f32 %v4401_v25, %v2590_v2 }
 0x1d5   : > { %v2627_v37 = vsub.f32 %v2617_v26, %v2626_v29  ;;  %v2634_v31 = vmul.f32 %v2632_v33, %v4395_v53  ;;  %v2635_v36 = vmul.f32 %v2632_v33, %v4399_v54  ;;  %v2636_v14 = vmul.f32 %v4393_v0, %v2632_v33 }
 0x1d6   : > { %v2604_v32 = vrot.slane %v2585_v12, %v2589_v11  ;;  %v2595_v49 = vmul.f32 %v4405_v5, %v2590_v2  ;;  %v2637_v58 = vmul.f32 %v4397_v50, %v2632_v33  ;;  %v2596_v38 = vmul.f32 %v4419_v47, %v2590_v2 }
 0x1d7   : > { %v2646_v40 = vrot.slane %v2627_v37, %v2589_v11  ;;  %v2638_v59 = vmul.f32 %v2632_v33, %v4411_v60  ;;  %v2597_v62 = vmul.f32 %v4423_v57, %v2590_v2  ;;  %v2639_v25 = vmul.f32 %v2632_v33, %v4415_v18 }
 0x1d8   : > { %v2606_v41 = vadd.f32 %v2604_v32, %v2592_v13  ;;  %v2607_v53 = vadd.f32 %v2604_v32, %v2593_v22  ;;  %v2608_v42 = vadd.f32 %v2604_v32, %v2594_v34  ;;  %v2609_v54 = vadd.f32 %v2604_v32, %v2595_v49 }
 0x1d9   : > { %v2648_v43 = vadd.f32 %v2646_v40, %v2634_v31  ;;  %v2649_v0 = vadd.f32 %v2646_v40, %v2635_v36  ;;  %v2650_v44 = vadd.f32 %v2646_v40, %v2636_v14  ;;  %v2651_v52 = vadd.f32 %v2646_v40, %v2637_v58 }
 0x1da   : > { %v2610_v5 = vadd.f32 %v2604_v32, %v2596_v38  ;;  %v2652_v56 = vadd.f32 %v2646_v40, %v2638_v59  ;;  %v2611_v50 = vadd.f32 %v2604_v32, %v2597_v62  ;;  %v2653_v45 = vadd.f32 %v2646_v40, %v2639_v25 }
 0x1db   : > { %v2656_v47 = vadd.f32 %v2648_v43, %v2606_v41  ;;  %v2657_v1 = vadd.f32 %v2649_v0, %v2607_v53  ;;  %v2658_v60 = vadd.f32 %v2650_v44, %v2608_v42  ;;  %v2659_v57 = vadd.f32 %v2651_v52, %v2609_v54 }
 0x1dc   : > { %v2660_v18 = vadd.f32 %v2652_v56, %v2610_v5  ;;  %v2661_v19 = vadd.f32 %v2653_v45, %v2611_v50  ;;  %v2598_v3 = vmul.f32 %v4417_v28, %v2590_v2  ;;  %v2640_v46 = vmul.f32 %v4407_v8, %v2632_v33 }
 0x1dd   : > { %v2664_v30 = vmax.f32 %v2656_v47, 0.0  ;;  %v2665_v48 = vmax.f32 %v2657_v1, 0.0  ;;  %v2666_v63 = vmax.f32 %v2658_v60, 0.0  ;;  %v2667_v24 = vmax.f32 %v2659_v57, 0.0 }
 0x1de   : > { %v2668_v9 = vmax.f32 %v2660_v18, 0.0  ;;  %v2669_v27 = vmax.f32 %v2661_v19, 0.0  ;;  %v2612_v4 = vadd.f32 %v2604_v32, %v2598_v3  ;;  %v2654_v6 = vadd.f32 %v2646_v40, %v2640_v46 }
 0x1df   : > { %2672 = vst [vmem:[%s3807_s17] sm:$0xff] %v2664_v30  ;;  %2673 = vst [vmem:[%s3807_s17 + $0x8] sm:$0xff] %v2665_v48  ;;  %v2599_v28 = vmul.f32 %v4421_v7, %v2590_v2  ;;  %v2641_v39 = vmul.f32 %v4413_v35, %v2632_v33 }
 0x1e0   : > { %2674 = vst [vmem:[%s3807_s17 + $0x10] sm:$0xff] %v2666_v63  ;;  %2675 = vst [vmem:[%s3807_s17 + $0x18] sm:$0xff] %v2667_v24  ;;  %v2662_v8 = vadd.f32 %v2654_v6, %v2612_v4 }
 0x1e1   : > { %2676 = vst [vmem:[%s3807_s17 + $0x20] sm:$0xff] %v2668_v9  ;;  %2677 = vst [vmem:[%s3807_s17 + $0x28] sm:$0xff] %v2669_v27  ;;  %v2613_v17 = vadd.f32 %v2604_v32, %v2599_v28  ;;  %v2655_v51 = vadd.f32 %v2646_v40, %v2641_v39 }
 0x1e2   : > { %v2670_v16 = vmax.f32 %v2662_v8, 0.0 }
 0x1e3   : > { %v2663_v11 = vadd.f32 %v2655_v51, %v2613_v17 }
 0x1e4   : > { %2678 = vst [vmem:[%s3807_s17 + $0x30] sm:$0xff] %v2670_v16 }
 0x1e5   : > { %v2671_v15 = vmax.f32 %v2663_v11, 0.0 }
 0x1e7   : > { %2679 = vst [vmem:[%s3807_s17 + $0x38] sm:$0xff] %v2671_v15 }
 0x1e8 PF: > { %s18_s9 = sadd.s32 1, %s3722_s9   ;;  %s4547_s27 = smov %s3714_s29 }
 0x1e9   : > { %p15_p11 = scmp.ge.s32.totalorder %s18_s9, 6   ;;  %s4548_s28 = smov %s3718_s30 }
 0x1ea   : > { %s4549_s29 = smov %s4552_s10  ;;  %s4550_s30 = smov %s4556_s11 }
 0x1eb   :  { %17 = sbr.rel (!%p15_p11) target bundleno = 3 (0x3), region = 108 }

</bundles_post_ra>
